<compile_context>
chip_gen: v6e
topology: v6e:2x2x1
jax: 0.10.0
libtpu: 0.0.40
codegen_flags: <defaults>
</compile_context>

<pallas_src>
import functools

import jax
import jax.numpy as jnp
import numpy as np
from jax.experimental import pallas as pl
from jax.experimental.pallas import tpu as pltpu

EPS = 1e-5  # nn.GroupNorm default


# ---------------------------------------------------------------------------
# Pallas kernel: one batch element per grid step
# ---------------------------------------------------------------------------
def _gam_kernel(C, N, R, T, inv_v, inv_1, inv_2,
                feat_ref,
                wk_ref, bk_ref, wq_ref, bq_ref, wv_ref, bv_ref,
                mv_ref, mvt_ref, gv_ref, btv_ref, pv_ref,
                m1q_ref, m1k_ref, m1qt_ref, m1kt_ref,
                g1q_ref, bt1q_ref, g1k_ref, bt1k_ref, p1k_ref,
                w1q_ref, w1k_ref, b1_ref,
                g2_ref, bt2_ref, w2_ref, b2_ref,
                sel_ref, selt_ref,
                out_ref):
    f32 = jnp.float32

    def mm(a, b):
        return jnp.dot(a, b, preferred_element_type=f32)

    feat = feat_ref[0].astype(f32)                         # (Cin, N)

    # 1x1 convs: channel contractions on the MXU.
    key = mm(wk_ref[...], feat) + bk_ref[...]              # (C, N)
    query = mm(wq_ref[...], feat) + bq_ref[...]            # (C, N)
    value = mm(wv_ref[...], feat) + bv_ref[...]            # (C, N)

    def group_stats(gsum, gss, inv_cnt):
        mean = gsum * inv_cnt
        var = gss * inv_cnt - mean * mean
        return mean, jax.lax.rsqrt(var + EPS)

    def chan_affine(mt, mean_g, rstd_g, gamma, beta, passm):
        # per-channel scale/shift; passthrough channels get scale=1, shift=0.
        mean_c = mm(mt, mean_g)
        rstd_c = mm(mt, rstd_g)
        scale = gamma * rstd_c + passm
        shift = beta - mean_c * scale
        return scale, shift

    # --- value_conv tail: MyGroupNorm(min(32,C), C) + ReLU (single-pass stats)
    sv = jnp.sum(value, axis=1, keepdims=True)
    ssv = jnp.sum(value * value, axis=1, keepdims=True)
    mgv, rgv = group_stats(mm(mv_ref[...], sv), mm(mv_ref[...], ssv), inv_v)
    sc_v, sh_v = chan_affine(mvt_ref[...], mgv, rgv,
                             gv_ref[...], btv_ref[...], pv_ref[...])
    value = jnp.maximum(value * sc_v + sh_v, 0.0)          # (C, N)

    # --- weight_conv stage 1: ReLU + GN(2C) + conv1, done separably in 2-D.
    # pair[c,i,j] is relu(query[c,i]) for the first C channels and
    # relu(key[c,j]) for the last C channels, so GN1 statistics over N*N are
    # N-scaled 1-D statistics (the N factor is folded into inv_1).
    rq = jnp.maximum(query, 0.0)
    rk = jnp.maximum(key, 0.0)
    sq = jnp.sum(rq, axis=1, keepdims=True)
    ssq = jnp.sum(rq * rq, axis=1, keepdims=True)
    sk = jnp.sum(rk, axis=1, keepdims=True)
    ssk = jnp.sum(rk * rk, axis=1, keepdims=True)
    mg1, rg1 = group_stats(mm(m1q_ref[...], sq) + mm(m1k_ref[...], sk),
                           mm(m1q_ref[...], ssq) + mm(m1k_ref[...], ssk),
                           inv_1)
    zc = jnp.zeros((C, 1), f32)
    sc_q, sh_q = chan_affine(m1qt_ref[...], mg1, rg1,
                             g1q_ref[...], bt1q_ref[...], zc)
    sc_k, sh_k = chan_affine(m1kt_ref[...], mg1, rg1,
                             g1k_ref[...], bt1k_ref[...], p1k_ref[...])
    a_q = rq * sc_q + sh_q                                 # (C, N)
    b_k = rk * sc_k + sh_k                                 # (C, N)

    # conv1 (2C -> C) is separable: conv1_out[o,i,j] = arow[o,i] + bcol[o,j]
    arow = mm(w1q_ref[...], a_q) + b1_ref[...]             # (C, N)
    bcol = mm(w1k_ref[...], b_k)                           # (C, N)
    btile = jnp.concatenate([bcol] * R, axis=1)            # (C, R*N)

    sel = sel_ref[...]                                     # (R, R*N) 0/1
    selt = selt_ref[...]                                   # (R*N, R) 0/1

    def gather_mat(t):
        # one-hot (N, R) selecting query rows t*R .. t*R+R-1 (gather-by-matmul
        # avoids dynamic lane slicing entirely).
        rows = jax.lax.broadcasted_iota(jnp.int32, (N, R), 0)
        cols = jax.lax.broadcasted_iota(jnp.int32, (N, R), 1)
        return (rows == t * R + cols).astype(f32)

    def chunk_relu(gmat):
        a_blk = mm(arow, gmat)                             # (C, R)
        a_rep = mm(a_blk, sel)                             # (C, R*N)
        return jnp.maximum(a_rep + btile, 0.0)             # (C, R*N)

    # --- Pass 1: per-channel sum / sum-of-squares for GroupNorm #2.
    def p1(t, carry):
        s2, ss2 = carry
        y = chunk_relu(gather_mat(t))
        s2 = s2 + jnp.sum(y, axis=1, keepdims=True)
        ss2 = ss2 + jnp.sum(y * y, axis=1, keepdims=True)
        return s2, ss2

    s2, ss2 = jax.lax.fori_loop(
        0, T, p1, (jnp.zeros((C, 1), f32), jnp.zeros((C, 1), f32)))

    mg2, rg2 = group_stats(mm(mv_ref[...], s2), mm(mv_ref[...], ss2), inv_2)
    sc2, sh2 = chan_affine(mvt_ref[...], mg2, rg2,
                           g2_ref[...], bt2_ref[...], pv_ref[...])

    w2b = w2_ref[...].astype(jnp.bfloat16)
    b2 = b2_ref[...]
    out_ref[0] = jnp.zeros((C, N), out_ref.dtype)

    # --- Pass 2: GN2 + conv2 + softmax row-sums + weighted value per chunk.
    @pl.loop(0, T)
    def _(t):
        gmat = gather_mat(t)
        y = chunk_relu(gmat)                               # (C, R*N)
        yn = (y * sc2 + sh2).astype(jnp.bfloat16)
        score = jnp.dot(w2b, yn, preferred_element_type=f32) + b2  # (C, R*N)
        # chunk-wide max per channel is a valid (shift-invariant) softmax
        # stabilizer; per-row segment sums are done with a 0/1 matmul.
        m = jnp.max(score, axis=1, keepdims=True)
        e = jnp.exp(score - m)
        denom = mm(e, selt)                                # (C, R)
        row_w = denom * pl.reciprocal(denom, approx=True)  # sum_j softmax ~ 1
        out_cols = mm(value, gmat) * row_w                 # (C, R)
        # scatter the R output columns to their positions via a 0/1 matmul.
        rows = jax.lax.broadcasted_iota(jnp.int32, (R, N), 0)
        cols = jax.lax.broadcasted_iota(jnp.int32, (R, N), 1)
        smat = (cols == t * R + rows).astype(f32)          # (R, N)
        out_ref[0] = out_ref[0] + mm(out_cols, smat).astype(out_ref.dtype)


# ---------------------------------------------------------------------------
# host-side derived inputs (membership matrices, padded affines, selectors)
# ---------------------------------------------------------------------------
def _derived_inputs(params, C, N, R):
    f32 = np.float32

    def to_np(x):
        return np.asarray(x, f32)

    def col(x):
        return to_np(x).reshape(-1, 1)

    def membership(num_groups, total, nc):
        gsize = nc // num_groups
        m = np.zeros((num_groups, total), f32)
        for c in range(nc):
            m[c // gsize, c] = 1.0
        return m

    # value GroupNorm and GroupNorm #2 share the (min(32,C), C) structure.
    Gv = min(32, C)
    ncv = C - C % Gv
    gsv = ncv // Gv
    mv = membership(Gv, C, ncv)

    G1 = min(32, 2 * C)
    nc1 = 2 * C - (2 * C) % G1
    gs1 = nc1 // G1
    m1 = membership(G1, 2 * C, nc1)
    m1q, m1k = m1[:, :C], m1[:, C:]

    def pad_cn(vec, nc):
        out = np.zeros((C, 1), f32)
        out[:nc, 0] = to_np(vec).reshape(-1)[:nc]
        return out

    pv = np.zeros((C, 1), f32)
    pv[ncv:, 0] = 1.0
    gvf = pad_cn(params["gv"], ncv)
    btvf = pad_cn(params["betav"], ncv)
    g2f = pad_cn(params["g2"], ncv)
    bt2f = pad_cn(params["beta2"], ncv)

    g1 = to_np(params["g1"]).reshape(-1)
    bt1 = to_np(params["beta1"]).reshape(-1)
    nk = nc1 - C                       # number of normalized key channels
    g1q, bt1q = col(g1[:C]), col(bt1[:C])
    g1k = np.zeros((C, 1), f32)
    bt1k = np.zeros((C, 1), f32)
    p1k = np.zeros((C, 1), f32)
    g1k[:nk, 0] = g1[C:nc1]
    bt1k[:nk, 0] = bt1[C:nc1]
    p1k[nk:, 0] = 1.0

    w1 = to_np(params["w1"])
    w1q, w1k = w1[:, :C], w1[:, C:]
    w2 = to_np(params["w2"])

    sel = np.zeros((R, R * N), f32)
    for r in range(R):
        sel[r, r * N:(r + 1) * N] = 1.0
    selt = np.ascontiguousarray(sel.T)

    extras = [
        to_np(params["wk"]), col(params["bk"]),
        to_np(params["wq"]), col(params["bq"]),
        to_np(params["wv"]), col(params["bv"]),
        mv, np.ascontiguousarray(mv.T), gvf, btvf, pv,
        m1q, m1k,
        np.ascontiguousarray(m1q.T), np.ascontiguousarray(m1k.T),
        g1q, bt1q, g1k, bt1k, p1k,
        w1q, w1k, col(params["b1"]),
        g2f, bt2f,
        w2, col(params["b2"]),
        sel, selt,
    ]
    extras = [jnp.asarray(a) for a in extras]
    inv_v = 1.0 / (gsv * N)
    inv_1 = 1.0 / (gs1 * N)
    inv_2 = 1.0 / (gsv * N * N)
    return extras, inv_v, inv_1, inv_2


# ---------------------------------------------------------------------------
# wrapper
# ---------------------------------------------------------------------------
def global_attention_forward(feat, params, C, chunk=8):
    B, Cin, N = feat.shape
    # queries per inner chunk; larger chunks amortize loop overhead but raise
    # live VMEM (~5 f32 buffers of (C, R*N)).  Tune per generation if needed.
    R = 1
    for r in (chunk, 8, 4, 2, 1):
        if r <= N and N % r == 0:
            R = r
            break
    T = N // R

    extras, inv_v, inv_1, inv_2 = _derived_inputs(params, C, N, R)
    kernel = functools.partial(_gam_kernel, C, N, R, T, inv_v, inv_1, inv_2)

    in_specs = [pl.BlockSpec((1, Cin, N), lambda b: (b, 0, 0))]
    in_specs += [pl.BlockSpec(a.shape, lambda b: (0, 0)) for a in extras]
    out_specs = pl.BlockSpec((1, C, N), lambda b: (b, 0, 0))

    return pl.pallas_call(
        kernel,
        grid=(B,),
        in_specs=in_specs,
        out_specs=out_specs,
        out_shape=jax.ShapeDtypeStruct((B, C, N), feat.dtype),
        compiler_params=pltpu.CompilerParams(
            dimension_semantics=("parallel",),
            vmem_limit_bytes=48 * 1024 * 1024),  # safe on v5e/v6e/v7x
    )(feat, *extras)


# ---------------------------------------------------------------------------
# deterministic parameter init (shapes from the module's __init__)
# ---------------------------------------------------------------------------
def init_params(key, C, additional_dim=0):
    Cin = C + additional_dim
    ks = jax.random.split(key, 16)

    def w(k, shape, scale=0.3):
        return (scale * jax.random.normal(k, shape)).astype(jnp.float32)

    nc_v = C - C % min(32, C)
    nc_1 = 2 * C - (2 * C) % min(32, 2 * C)
    nc_2 = C - C % min(32, C)
    return dict(
        wk=w(ks[0], (C, Cin)), bk=w(ks[1], (C, 1), 0.1),
        wq=w(ks[2], (C, Cin)), bq=w(ks[3], (C, 1), 0.1),
        wv=w(ks[4], (C, Cin)), bv=w(ks[5], (C, 1), 0.1),
        gv=1.0 + w(ks[6], (nc_v, 1), 0.1), betav=w(ks[7], (nc_v, 1), 0.1),
        g1=1.0 + w(ks[8], (nc_1, 1), 0.1), beta1=w(ks[9], (nc_1, 1), 0.1),
        w1=w(ks[10], (C, 2 * C)), b1=w(ks[11], (C,), 0.1),
        g2=1.0 + w(ks[12], (nc_2, 1), 0.1), beta2=w(ks[13], (nc_2, 1), 0.1),
        w2=w(ks[14], (C, C)), b2=w(ks[15], (C,), 0.1),
    )


# ---------------------------------------------------------------------------
# pure-JAX reference (mirrors the PyTorch forward) for a correctness check
# ---------------------------------------------------------------------------
def reference_forward(feat, p, C):
    B, Cin, N = feat.shape

    def conv1x1(x, w, b):                                   # x: (B, Cin, N)
        return jnp.einsum('oc,bcn->bon', w, x) + b[None]

    key = conv1x1(feat, p['wk'], p['bk'])
    query = conv1x1(feat, p['wq'], p['bq'])
    value = conv1x1(feat, p['wv'], p['bv'])

    def gn(x, gamma, beta, G):
        Cn = x.shape[1]
        sp = x.shape[2:]
        xr = x.reshape((x.shape[0], G, Cn // G) + sp)
        axes = tuple(range(2, xr.ndim))
        m = jnp.mean(xr, axis=axes, keepdims=True)
        v = jnp.mean((xr - m) ** 2, axis=axes, keepdims=True)
        xn = ((xr - m) / jnp.sqrt(v + EPS)).reshape(x.shape)
        gshape = (1, Cn) + (1,) * len(sp)
        return xn * gamma.reshape(gshape) + beta.reshape(gshape)

    def my_gn(x, gamma, beta, G):
        Cn = x.shape[1]
        nc = Cn - Cn % G
        if nc == Cn:
            return gn(x, gamma, beta, G)
        return jnp.concatenate([gn(x[:, :nc], gamma, beta, G), x[:, nc:]],
                               axis=1)

    value = jax.nn.relu(my_gn(value, p['gv'], p['betav'], min(32, C)))

    q4 = jnp.broadcast_to(query[:, :, :, None], (B, C, N, N))
    k4 = jnp.broadcast_to(key[:, :, None, :], (B, C, N, N))
    pair = jnp.concatenate([q4, k4], axis=1)                # (B, 2C, N, N)

    x = jax.nn.relu(pair)
    x = my_gn(x, p['g1'], p['beta1'], min(32, 2 * C))
    x = jnp.einsum('oc,bcij->boij', p['w1'], x) + p['b1'][None, :, None, None]
    x = jax.nn.relu(x)
    x = my_gn(x, p['g2'], p['beta2'], min(32, C))
    score = jnp.einsum('oc,bcij->boij', p['w2'], x) + p['b2'][None, :, None, None]
    weight = jax.nn.softmax(score, axis=-1)
    return jnp.sum(value[:, :, :, None] * weight, axis=-1)


if __name__ == "__main__":
    # case 1: tiny channels (group size 1); case 2: exercises multi-channel
    # groups, a group straddling the query/key boundary, MyGroupNorm
    # passthrough channels, additional_dim != 0, and multiple query chunks.
    cases = [
        dict(C=4, additional_dim=0, B=2, N=128),
        dict(C=33, additional_dim=3, B=2, N=256),
    ]
    for cfg in cases:
        C, add_dim, B, N = cfg["C"], cfg["additional_dim"], cfg["B"], cfg["N"]
        Cin = C + add_dim
        key0 = jax.random.PRNGKey(0)
        kfeat, kparam = jax.random.split(key0)
        feat = jax.random.normal(kfeat, (B, Cin, N), dtype=jnp.float32)
        params = init_params(kparam, C, add_dim)

        out = global_attention_forward(feat, params, C)
        out = jax.block_until_ready(out)

        ref = reference_forward(feat, params, C)
        assert out.shape == (B, C, N)
        np.testing.assert_allclose(np.asarray(out), np.asarray(ref),
                                   rtol=1e-2, atol=1e-2)
    print("KERNEL_OK")
</pallas_src>

<mosaic_0001>
module attributes {stable_mosaic.version = 11 : i64} {
  func.func @_gam_kernel(%arg0: i32, %arg1: memref<1x4x128xf32, #tpu.memory_space<vmem>>, %arg2: memref<4x4xf32, #tpu.memory_space<vmem>>, %arg3: memref<4x1xf32, #tpu.memory_space<vmem>>, %arg4: memref<4x4xf32, #tpu.memory_space<vmem>>, %arg5: memref<4x1xf32, #tpu.memory_space<vmem>>, %arg6: memref<4x4xf32, #tpu.memory_space<vmem>>, %arg7: memref<4x1xf32, #tpu.memory_space<vmem>>, %arg8: memref<4x4xf32, #tpu.memory_space<vmem>>, %arg9: memref<4x4xf32, #tpu.memory_space<vmem>>, %arg10: memref<4x1xf32, #tpu.memory_space<vmem>>, %arg11: memref<4x1xf32, #tpu.memory_space<vmem>>, %arg12: memref<4x1xf32, #tpu.memory_space<vmem>>, %arg13: memref<8x4xf32, #tpu.memory_space<vmem>>, %arg14: memref<8x4xf32, #tpu.memory_space<vmem>>, %arg15: memref<4x8xf32, #tpu.memory_space<vmem>>, %arg16: memref<4x8xf32, #tpu.memory_space<vmem>>, %arg17: memref<4x1xf32, #tpu.memory_space<vmem>>, %arg18: memref<4x1xf32, #tpu.memory_space<vmem>>, %arg19: memref<4x1xf32, #tpu.memory_space<vmem>>, %arg20: memref<4x1xf32, #tpu.memory_space<vmem>>, %arg21: memref<4x1xf32, #tpu.memory_space<vmem>>, %arg22: memref<4x4xf32, #tpu.memory_space<vmem>>, %arg23: memref<4x4xf32, #tpu.memory_space<vmem>>, %arg24: memref<4x1xf32, #tpu.memory_space<vmem>>, %arg25: memref<4x1xf32, #tpu.memory_space<vmem>>, %arg26: memref<4x1xf32, #tpu.memory_space<vmem>>, %arg27: memref<4x4xf32, #tpu.memory_space<vmem>>, %arg28: memref<4x1xf32, #tpu.memory_space<vmem>>, %arg29: memref<8x1024xf32, #tpu.memory_space<vmem>>, %arg30: memref<1024x8xf32, #tpu.memory_space<vmem>>, %arg31: memref<1x4x128xf32, #tpu.memory_space<vmem>>) attributes {dimension_semantics = [#tpu.dimension_semantics<parallel>], iteration_bounds = array<i64: 2>, scalar_prefetch = 0 : i64, scratch_operands = 0 : i64, tpu.core_type = #tpu.core_type<tc>, window_params = [{transform_indices = @transform_0, window_bounds = array<i64: 1, 4, 128>}, {pipeline_mode = #tpu.pipeline_mode<synchronous>, transform_indices = @transform_1, window_bounds = array<i64: 4, 4>}, {pipeline_mode = #tpu.pipeline_mode<synchronous>, transform_indices = @transform_2, window_bounds = array<i64: 4, 1>}, {pipeline_mode = #tpu.pipeline_mode<synchronous>, transform_indices = @transform_3, window_bounds = array<i64: 4, 4>}, {pipeline_mode = #tpu.pipeline_mode<synchronous>, transform_indices = @transform_4, window_bounds = array<i64: 4, 1>}, {pipeline_mode = #tpu.pipeline_mode<synchronous>, transform_indices = @transform_5, window_bounds = array<i64: 4, 4>}, {pipeline_mode = #tpu.pipeline_mode<synchronous>, transform_indices = @transform_6, window_bounds = array<i64: 4, 1>}, {pipeline_mode = #tpu.pipeline_mode<synchronous>, transform_indices = @transform_7, window_bounds = array<i64: 4, 4>}, {pipeline_mode = #tpu.pipeline_mode<synchronous>, transform_indices = @transform_8, window_bounds = array<i64: 4, 4>}, {pipeline_mode = #tpu.pipeline_mode<synchronous>, transform_indices = @transform_9, window_bounds = array<i64: 4, 1>}, {pipeline_mode = #tpu.pipeline_mode<synchronous>, transform_indices = @transform_10, window_bounds = array<i64: 4, 1>}, {pipeline_mode = #tpu.pipeline_mode<synchronous>, transform_indices = @transform_11, window_bounds = array<i64: 4, 1>}, {pipeline_mode = #tpu.pipeline_mode<synchronous>, transform_indices = @transform_12, window_bounds = array<i64: 8, 4>}, {pipeline_mode = #tpu.pipeline_mode<synchronous>, transform_indices = @transform_13, window_bounds = array<i64: 8, 4>}, {pipeline_mode = #tpu.pipeline_mode<synchronous>, transform_indices = @transform_14, window_bounds = array<i64: 4, 8>}, {pipeline_mode = #tpu.pipeline_mode<synchronous>, transform_indices = @transform_15, window_bounds = array<i64: 4, 8>}, {pipeline_mode = #tpu.pipeline_mode<synchronous>, transform_indices = @transform_16, window_bounds = array<i64: 4, 1>}, {pipeline_mode = #tpu.pipeline_mode<synchronous>, transform_indices = @transform_17, window_bounds = array<i64: 4, 1>}, {pipeline_mode = #tpu.pipeline_mode<synchronous>, transform_indices = @transform_18, window_bounds = array<i64: 4, 1>}, {pipeline_mode = #tpu.pipeline_mode<synchronous>, transform_indices = @transform_19, window_bounds = array<i64: 4, 1>}, {pipeline_mode = #tpu.pipeline_mode<synchronous>, transform_indices = @transform_20, window_bounds = array<i64: 4, 1>}, {pipeline_mode = #tpu.pipeline_mode<synchronous>, transform_indices = @transform_21, window_bounds = array<i64: 4, 4>}, {pipeline_mode = #tpu.pipeline_mode<synchronous>, transform_indices = @transform_22, window_bounds = array<i64: 4, 4>}, {pipeline_mode = #tpu.pipeline_mode<synchronous>, transform_indices = @transform_23, window_bounds = array<i64: 4, 1>}, {pipeline_mode = #tpu.pipeline_mode<synchronous>, transform_indices = @transform_24, window_bounds = array<i64: 4, 1>}, {pipeline_mode = #tpu.pipeline_mode<synchronous>, transform_indices = @transform_25, window_bounds = array<i64: 4, 1>}, {pipeline_mode = #tpu.pipeline_mode<synchronous>, transform_indices = @transform_26, window_bounds = array<i64: 4, 4>}, {pipeline_mode = #tpu.pipeline_mode<synchronous>, transform_indices = @transform_27, window_bounds = array<i64: 4, 1>}, {pipeline_mode = #tpu.pipeline_mode<synchronous>, transform_indices = @transform_28, window_bounds = array<i64: 8, 1024>}, {pipeline_mode = #tpu.pipeline_mode<synchronous>, transform_indices = @transform_29, window_bounds = array<i64: 1024, 8>}, {transform_indices = @transform_30, window_bounds = array<i64: 1, 4, 128>}]} {
    %c0 = arith.constant 0 : index
    %c0_0 = arith.constant 0 : index
    %c0_1 = arith.constant 0 : index
    %0 = vector.load %arg1[%c0, %c0_0, %c0_1] : memref<1x4x128xf32, #tpu.memory_space<vmem>>, vector<1x4x128xf32>
    %1 = vector.shape_cast %0 : vector<1x4x128xf32> to vector<4x128xf32>
    %c0_2 = arith.constant 0 : index
    %c0_3 = arith.constant 0 : index
    %2 = vector.load %arg2[%c0_2, %c0_3] : memref<4x4xf32, #tpu.memory_space<vmem>>, vector<4x4xf32>
    %cst = arith.constant dense<0.000000e+00> : vector<4x128xf32>
    %3 = tpu.matmul %2, %1, %cst {dimension_numbers = #tpu.dot_dimension_numbers<[1], [0], [0], [1], [0, 0, 1, 1], [], []>} : vector<4x4xf32>, vector<4x128xf32>, vector<4x128xf32> -> vector<4x128xf32>
    %c0_4 = arith.constant 0 : index
    %c0_5 = arith.constant 0 : index
    %4 = vector.load %arg3[%c0_4, %c0_5] : memref<4x1xf32, #tpu.memory_space<vmem>>, vector<4x1xf32>
    %5 = vector.broadcast %4 : vector<4x1xf32> to vector<4x128xf32>
    %6 = arith.addf %3, %5 : vector<4x128xf32>
    %c0_6 = arith.constant 0 : index
    %c0_7 = arith.constant 0 : index
    %7 = vector.load %arg4[%c0_6, %c0_7] : memref<4x4xf32, #tpu.memory_space<vmem>>, vector<4x4xf32>
    %cst_8 = arith.constant dense<0.000000e+00> : vector<4x128xf32>
    %8 = tpu.matmul %7, %1, %cst_8 {dimension_numbers = #tpu.dot_dimension_numbers<[1], [0], [0], [1], [0, 0, 1, 1], [], []>} : vector<4x4xf32>, vector<4x128xf32>, vector<4x128xf32> -> vector<4x128xf32>
    %c0_9 = arith.constant 0 : index
    %c0_10 = arith.constant 0 : index
    %9 = vector.load %arg5[%c0_9, %c0_10] : memref<4x1xf32, #tpu.memory_space<vmem>>, vector<4x1xf32>
    %10 = vector.broadcast %9 : vector<4x1xf32> to vector<4x128xf32>
    %11 = arith.addf %8, %10 : vector<4x128xf32>
    %c0_11 = arith.constant 0 : index
    %c0_12 = arith.constant 0 : index
    %12 = vector.load %arg6[%c0_11, %c0_12] : memref<4x4xf32, #tpu.memory_space<vmem>>, vector<4x4xf32>
    %cst_13 = arith.constant dense<0.000000e+00> : vector<4x128xf32>
    %13 = tpu.matmul %12, %1, %cst_13 {dimension_numbers = #tpu.dot_dimension_numbers<[1], [0], [0], [1], [0, 0, 1, 1], [], []>} : vector<4x4xf32>, vector<4x128xf32>, vector<4x128xf32> -> vector<4x128xf32>
    %c0_14 = arith.constant 0 : index
    %c0_15 = arith.constant 0 : index
    %14 = vector.load %arg7[%c0_14, %c0_15] : memref<4x1xf32, #tpu.memory_space<vmem>>, vector<4x1xf32>
    %15 = vector.broadcast %14 : vector<4x1xf32> to vector<4x128xf32>
    %16 = arith.addf %13, %15 : vector<4x128xf32>
    %cst_16 = arith.constant dense<0.000000e+00> : vector<4xf32>
    %17 = vector.multi_reduction <add>, %16, %cst_16 [1] : vector<4x128xf32> to vector<4xf32>
    %18 = vector.shape_cast %17 : vector<4xf32> to vector<4x1xf32>
    %19 = arith.mulf %16, %16 : vector<4x128xf32>
    %cst_17 = arith.constant dense<0.000000e+00> : vector<4xf32>
    %20 = vector.multi_reduction <add>, %19, %cst_17 [1] : vector<4x128xf32> to vector<4xf32>
    %21 = vector.shape_cast %20 : vector<4xf32> to vector<4x1xf32>
    %c0_18 = arith.constant 0 : index
    %c0_19 = arith.constant 0 : index
    %22 = vector.load %arg8[%c0_18, %c0_19] : memref<4x4xf32, #tpu.memory_space<vmem>>, vector<4x4xf32>
    %cst_20 = arith.constant dense<0.000000e+00> : vector<4x1xf32>
    %23 = tpu.matmul %22, %18, %cst_20 {dimension_numbers = #tpu.dot_dimension_numbers<[1], [0], [0], [1], [0, 0, 1, 1], [], []>} : vector<4x4xf32>, vector<4x1xf32>, vector<4x1xf32> -> vector<4x1xf32>
    %c0_21 = arith.constant 0 : index
    %c0_22 = arith.constant 0 : index
    %24 = vector.load %arg8[%c0_21, %c0_22] : memref<4x4xf32, #tpu.memory_space<vmem>>, vector<4x4xf32>
    %cst_23 = arith.constant dense<0.000000e+00> : vector<4x1xf32>
    %25 = tpu.matmul %24, %21, %cst_23 {dimension_numbers = #tpu.dot_dimension_numbers<[1], [0], [0], [1], [0, 0, 1, 1], [], []>} : vector<4x4xf32>, vector<4x1xf32>, vector<4x1xf32> -> vector<4x1xf32>
    %cst_24 = arith.constant 7.812500e-03 : f32
    %26 = vector.broadcast %cst_24 : f32 to vector<4x1xf32>
    %27 = arith.mulf %23, %26 : vector<4x1xf32>
    %cst_25 = arith.constant 7.812500e-03 : f32
    %28 = vector.broadcast %cst_25 : f32 to vector<4x1xf32>
    %29 = arith.mulf %25, %28 : vector<4x1xf32>
    %30 = arith.mulf %27, %27 : vector<4x1xf32>
    %31 = arith.subf %29, %30 : vector<4x1xf32>
    %cst_26 = arith.constant 9.99999974E-6 : f32
    %32 = vector.broadcast %cst_26 : f32 to vector<4x1xf32>
    %33 = arith.addf %31, %32 : vector<4x1xf32>
    %34 = math.rsqrt %33 : vector<4x1xf32>
    %c0_27 = arith.constant 0 : index
    %c0_28 = arith.constant 0 : index
    %35 = vector.load %arg9[%c0_27, %c0_28] : memref<4x4xf32, #tpu.memory_space<vmem>>, vector<4x4xf32>
    %c0_29 = arith.constant 0 : index
    %c0_30 = arith.constant 0 : index
    %36 = vector.load %arg10[%c0_29, %c0_30] : memref<4x1xf32, #tpu.memory_space<vmem>>, vector<4x1xf32>
    %c0_31 = arith.constant 0 : index
    %c0_32 = arith.constant 0 : index
    %37 = vector.load %arg11[%c0_31, %c0_32] : memref<4x1xf32, #tpu.memory_space<vmem>>, vector<4x1xf32>
    %c0_33 = arith.constant 0 : index
    %c0_34 = arith.constant 0 : index
    %38 = vector.load %arg12[%c0_33, %c0_34] : memref<4x1xf32, #tpu.memory_space<vmem>>, vector<4x1xf32>
    %cst_35 = arith.constant dense<0.000000e+00> : vector<4x1xf32>
    %39 = tpu.matmul %35, %27, %cst_35 {dimension_numbers = #tpu.dot_dimension_numbers<[1], [0], [0], [1], [0, 0, 1, 1], [], []>} : vector<4x4xf32>, vector<4x1xf32>, vector<4x1xf32> -> vector<4x1xf32>
    %cst_36 = arith.constant dense<0.000000e+00> : vector<4x1xf32>
    %40 = tpu.matmul %35, %34, %cst_36 {dimension_numbers = #tpu.dot_dimension_numbers<[1], [0], [0], [1], [0, 0, 1, 1], [], []>} : vector<4x4xf32>, vector<4x1xf32>, vector<4x1xf32> -> vector<4x1xf32>
    %41 = arith.mulf %36, %40 : vector<4x1xf32>
    %42 = arith.addf %41, %38 : vector<4x1xf32>
    %43 = arith.mulf %39, %42 : vector<4x1xf32>
    %44 = arith.subf %37, %43 : vector<4x1xf32>
    %45 = vector.broadcast %42 : vector<4x1xf32> to vector<4x128xf32>
    %46 = arith.mulf %16, %45 : vector<4x128xf32>
    %47 = vector.broadcast %44 : vector<4x1xf32> to vector<4x128xf32>
    %48 = arith.addf %46, %47 : vector<4x128xf32>
    %cst_37 = arith.constant 0.000000e+00 : f32
    %49 = vector.broadcast %cst_37 : f32 to vector<4x128xf32>
    %50 = arith.maximumf %48, %49 : vector<4x128xf32>
    %cst_38 = arith.constant 0.000000e+00 : f32
    %51 = vector.broadcast %cst_38 : f32 to vector<4x128xf32>
    %52 = arith.maximumf %11, %51 : vector<4x128xf32>
    %cst_39 = arith.constant 0.000000e+00 : f32
    %53 = vector.broadcast %cst_39 : f32 to vector<4x128xf32>
    %54 = arith.maximumf %6, %53 : vector<4x128xf32>
    %cst_40 = arith.constant dense<0.000000e+00> : vector<4xf32>
    %55 = vector.multi_reduction <add>, %52, %cst_40 [1] : vector<4x128xf32> to vector<4xf32>
    %56 = vector.shape_cast %55 : vector<4xf32> to vector<4x1xf32>
    %57 = arith.mulf %52, %52 : vector<4x128xf32>
    %cst_41 = arith.constant dense<0.000000e+00> : vector<4xf32>
    %58 = vector.multi_reduction <add>, %57, %cst_41 [1] : vector<4x128xf32> to vector<4xf32>
    %59 = vector.shape_cast %58 : vector<4xf32> to vector<4x1xf32>
    %cst_42 = arith.constant dense<0.000000e+00> : vector<4xf32>
    %60 = vector.multi_reduction <add>, %54, %cst_42 [1] : vector<4x128xf32> to vector<4xf32>
    %61 = vector.shape_cast %60 : vector<4xf32> to vector<4x1xf32>
    %62 = arith.mulf %54, %54 : vector<4x128xf32>
    %cst_43 = arith.constant dense<0.000000e+00> : vector<4xf32>
    %63 = vector.multi_reduction <add>, %62, %cst_43 [1] : vector<4x128xf32> to vector<4xf32>
    %64 = vector.shape_cast %63 : vector<4xf32> to vector<4x1xf32>
    %c0_44 = arith.constant 0 : index
    %c0_45 = arith.constant 0 : index
    %65 = vector.load %arg13[%c0_44, %c0_45] : memref<8x4xf32, #tpu.memory_space<vmem>>, vector<8x4xf32>
    %cst_46 = arith.constant dense<0.000000e+00> : vector<8x1xf32>
    %66 = tpu.matmul %65, %56, %cst_46 {dimension_numbers = #tpu.dot_dimension_numbers<[1], [0], [0], [1], [0, 0, 1, 1], [], []>} : vector<8x4xf32>, vector<4x1xf32>, vector<8x1xf32> -> vector<8x1xf32>
    %c0_47 = arith.constant 0 : index
    %c0_48 = arith.constant 0 : index
    %67 = vector.load %arg14[%c0_47, %c0_48] : memref<8x4xf32, #tpu.memory_space<vmem>>, vector<8x4xf32>
    %cst_49 = arith.constant dense<0.000000e+00> : vector<8x1xf32>
    %68 = tpu.matmul %67, %61, %cst_49 {dimension_numbers = #tpu.dot_dimension_numbers<[1], [0], [0], [1], [0, 0, 1, 1], [], []>} : vector<8x4xf32>, vector<4x1xf32>, vector<8x1xf32> -> vector<8x1xf32>
    %69 = arith.addf %66, %68 : vector<8x1xf32>
    %c0_50 = arith.constant 0 : index
    %c0_51 = arith.constant 0 : index
    %70 = vector.load %arg13[%c0_50, %c0_51] : memref<8x4xf32, #tpu.memory_space<vmem>>, vector<8x4xf32>
    %cst_52 = arith.constant dense<0.000000e+00> : vector<8x1xf32>
    %71 = tpu.matmul %70, %59, %cst_52 {dimension_numbers = #tpu.dot_dimension_numbers<[1], [0], [0], [1], [0, 0, 1, 1], [], []>} : vector<8x4xf32>, vector<4x1xf32>, vector<8x1xf32> -> vector<8x1xf32>
    %c0_53 = arith.constant 0 : index
    %c0_54 = arith.constant 0 : index
    %72 = vector.load %arg14[%c0_53, %c0_54] : memref<8x4xf32, #tpu.memory_space<vmem>>, vector<8x4xf32>
    %cst_55 = arith.constant dense<0.000000e+00> : vector<8x1xf32>
    %73 = tpu.matmul %72, %64, %cst_55 {dimension_numbers = #tpu.dot_dimension_numbers<[1], [0], [0], [1], [0, 0, 1, 1], [], []>} : vector<8x4xf32>, vector<4x1xf32>, vector<8x1xf32> -> vector<8x1xf32>
    %74 = arith.addf %71, %73 : vector<8x1xf32>
    %cst_56 = arith.constant 7.812500e-03 : f32
    %75 = vector.broadcast %cst_56 : f32 to vector<8x1xf32>
    %76 = arith.mulf %69, %75 : vector<8x1xf32>
    %cst_57 = arith.constant 7.812500e-03 : f32
    %77 = vector.broadcast %cst_57 : f32 to vector<8x1xf32>
    %78 = arith.mulf %74, %77 : vector<8x1xf32>
    %79 = arith.mulf %76, %76 : vector<8x1xf32>
    %80 = arith.subf %78, %79 : vector<8x1xf32>
    %cst_58 = arith.constant 9.99999974E-6 : f32
    %81 = vector.broadcast %cst_58 : f32 to vector<8x1xf32>
    %82 = arith.addf %80, %81 : vector<8x1xf32>
    %83 = math.rsqrt %82 : vector<8x1xf32>
    %cst_59 = arith.constant 0.000000e+00 : f32
    %84 = vector.broadcast %cst_59 : f32 to vector<4x1xf32>
    %c0_60 = arith.constant 0 : index
    %c0_61 = arith.constant 0 : index
    %85 = vector.load %arg15[%c0_60, %c0_61] : memref<4x8xf32, #tpu.memory_space<vmem>>, vector<4x8xf32>
    %c0_62 = arith.constant 0 : index
    %c0_63 = arith.constant 0 : index
    %86 = vector.load %arg17[%c0_62, %c0_63] : memref<4x1xf32, #tpu.memory_space<vmem>>, vector<4x1xf32>
    %c0_64 = arith.constant 0 : index
    %c0_65 = arith.constant 0 : index
    %87 = vector.load %arg18[%c0_64, %c0_65] : memref<4x1xf32, #tpu.memory_space<vmem>>, vector<4x1xf32>
    %cst_66 = arith.constant dense<0.000000e+00> : vector<4x1xf32>
    %88 = tpu.matmul %85, %76, %cst_66 {dimension_numbers = #tpu.dot_dimension_numbers<[1], [0], [0], [1], [0, 0, 1, 1], [], []>} : vector<4x8xf32>, vector<8x1xf32>, vector<4x1xf32> -> vector<4x1xf32>
    %cst_67 = arith.constant dense<0.000000e+00> : vector<4x1xf32>
    %89 = tpu.matmul %85, %83, %cst_67 {dimension_numbers = #tpu.dot_dimension_numbers<[1], [0], [0], [1], [0, 0, 1, 1], [], []>} : vector<4x8xf32>, vector<8x1xf32>, vector<4x1xf32> -> vector<4x1xf32>
    %90 = arith.mulf %86, %89 : vector<4x1xf32>
    %91 = arith.addf %90, %84 : vector<4x1xf32>
    %92 = arith.mulf %88, %91 : vector<4x1xf32>
    %93 = arith.subf %87, %92 : vector<4x1xf32>
    %c0_68 = arith.constant 0 : index
    %c0_69 = arith.constant 0 : index
    %94 = vector.load %arg16[%c0_68, %c0_69] : memref<4x8xf32, #tpu.memory_space<vmem>>, vector<4x8xf32>
    %c0_70 = arith.constant 0 : index
    %c0_71 = arith.constant 0 : index
    %95 = vector.load %arg19[%c0_70, %c0_71] : memref<4x1xf32, #tpu.memory_space<vmem>>, vector<4x1xf32>
    %c0_72 = arith.constant 0 : index
    %c0_73 = arith.constant 0 : index
    %96 = vector.load %arg20[%c0_72, %c0_73] : memref<4x1xf32, #tpu.memory_space<vmem>>, vector<4x1xf32>
    %c0_74 = arith.constant 0 : index
    %c0_75 = arith.constant 0 : index
    %97 = vector.load %arg21[%c0_74, %c0_75] : memref<4x1xf32, #tpu.memory_space<vmem>>, vector<4x1xf32>
    %cst_76 = arith.constant dense<0.000000e+00> : vector<4x1xf32>
    %98 = tpu.matmul %94, %76, %cst_76 {dimension_numbers = #tpu.dot_dimension_numbers<[1], [0], [0], [1], [0, 0, 1, 1], [], []>} : vector<4x8xf32>, vector<8x1xf32>, vector<4x1xf32> -> vector<4x1xf32>
    %cst_77 = arith.constant dense<0.000000e+00> : vector<4x1xf32>
    %99 = tpu.matmul %94, %83, %cst_77 {dimension_numbers = #tpu.dot_dimension_numbers<[1], [0], [0], [1], [0, 0, 1, 1], [], []>} : vector<4x8xf32>, vector<8x1xf32>, vector<4x1xf32> -> vector<4x1xf32>
    %100 = arith.mulf %95, %99 : vector<4x1xf32>
    %101 = arith.addf %100, %97 : vector<4x1xf32>
    %102 = arith.mulf %98, %101 : vector<4x1xf32>
    %103 = arith.subf %96, %102 : vector<4x1xf32>
    %104 = vector.broadcast %91 : vector<4x1xf32> to vector<4x128xf32>
    %105 = arith.mulf %52, %104 : vector<4x128xf32>
    %106 = vector.broadcast %93 : vector<4x1xf32> to vector<4x128xf32>
    %107 = arith.addf %105, %106 : vector<4x128xf32>
    %108 = vector.broadcast %101 : vector<4x1xf32> to vector<4x128xf32>
    %109 = arith.mulf %54, %108 : vector<4x128xf32>
    %110 = vector.broadcast %103 : vector<4x1xf32> to vector<4x128xf32>
    %111 = arith.addf %109, %110 : vector<4x128xf32>
    %c0_78 = arith.constant 0 : index
    %c0_79 = arith.constant 0 : index
    %112 = vector.load %arg22[%c0_78, %c0_79] : memref<4x4xf32, #tpu.memory_space<vmem>>, vector<4x4xf32>
    %cst_80 = arith.constant dense<0.000000e+00> : vector<4x128xf32>
    %113 = tpu.matmul %112, %107, %cst_80 {dimension_numbers = #tpu.dot_dimension_numbers<[1], [0], [0], [1], [0, 0, 1, 1], [], []>} : vector<4x4xf32>, vector<4x128xf32>, vector<4x128xf32> -> vector<4x128xf32>
    %c0_81 = arith.constant 0 : index
    %c0_82 = arith.constant 0 : index
    %114 = vector.load %arg24[%c0_81, %c0_82] : memref<4x1xf32, #tpu.memory_space<vmem>>, vector<4x1xf32>
    %115 = vector.broadcast %114 : vector<4x1xf32> to vector<4x128xf32>
    %116 = arith.addf %113, %115 : vector<4x128xf32>
    %c0_83 = arith.constant 0 : index
    %c0_84 = arith.constant 0 : index
    %117 = vector.load %arg23[%c0_83, %c0_84] : memref<4x4xf32, #tpu.memory_space<vmem>>, vector<4x4xf32>
    %cst_85 = arith.constant dense<0.000000e+00> : vector<4x128xf32>
    %118 = tpu.matmul %117, %111, %cst_85 {dimension_numbers = #tpu.dot_dimension_numbers<[1], [0], [0], [1], [0, 0, 1, 1], [], []>} : vector<4x4xf32>, vector<4x128xf32>, vector<4x128xf32> -> vector<4x128xf32>
    %119 = tpu.concatenate %118, %118, %118, %118, %118, %118, %118, %118 in 1 : vector<4x128xf32>, vector<4x128xf32>, vector<4x128xf32>, vector<4x128xf32>, vector<4x128xf32>, vector<4x128xf32>, vector<4x128xf32>, vector<4x128xf32> -> vector<4x1024xf32>
    %c0_86 = arith.constant 0 : index
    %c0_87 = arith.constant 0 : index
    %120 = vector.load %arg29[%c0_86, %c0_87] : memref<8x1024xf32, #tpu.memory_space<vmem>>, vector<8x1024xf32>
    %c0_88 = arith.constant 0 : index
    %c0_89 = arith.constant 0 : index
    %121 = vector.load %arg30[%c0_88, %c0_89] : memref<1024x8xf32, #tpu.memory_space<vmem>>, vector<1024x8xf32>
    %cst_90 = arith.constant 0.000000e+00 : f32
    %122 = vector.broadcast %cst_90 : f32 to vector<4x1xf32>
    %cst_91 = arith.constant 0.000000e+00 : f32
    %123 = vector.broadcast %cst_91 : f32 to vector<4x1xf32>
    %c0_i32 = arith.constant 0 : i32
    %c16_i32 = arith.constant 16 : i32
    %124 = arith.addi %c0_i32, %c16_i32 : i32
    %c1_i32 = arith.constant 1 : i32
    %125:2 = scf.for %arg32 = %c0_i32 to %124 step %c1_i32 iter_args(%arg33 = %122, %arg34 = %123) -> (vector<4x1xf32>, vector<4x1xf32>)  : i32 {
      %157 = tpu.iota {dimensions = array<i32: 0>} : vector<128x8xi32>
      %158 = tpu.iota {dimensions = array<i32: 1>} : vector<128x8xi32>
      %c8_i32 = arith.constant 8 : i32
      %159 = arith.muli %arg32, %c8_i32 : i32
      %160 = vector.broadcast %159 : i32 to vector<128x8xi32>
      %161 = arith.addi %160, %158 : vector<128x8xi32>
      %162 = arith.cmpi eq, %157, %161 : vector<128x8xi32>
      %163 = arith.extui %162 : vector<128x8xi1> to vector<128x8xi32>
      %164 = arith.sitofp %163 : vector<128x8xi32> to vector<128x8xf32>
      %cst_124 = arith.constant dense<0.000000e+00> : vector<4x8xf32>
      %165 = tpu.matmul %116, %164, %cst_124 {dimension_numbers = #tpu.dot_dimension_numbers<[1], [0], [0], [1], [0, 0, 1, 1], [], []>} : vector<4x128xf32>, vector<128x8xf32>, vector<4x8xf32> -> vector<4x8xf32>
      %cst_125 = arith.constant dense<0.000000e+00> : vector<4x1024xf32>
      %166 = tpu.matmul %165, %120, %cst_125 {dimension_numbers = #tpu.dot_dimension_numbers<[1], [0], [0], [1], [0, 0, 1, 1], [], []>} : vector<4x8xf32>, vector<8x1024xf32>, vector<4x1024xf32> -> vector<4x1024xf32>
      %167 = arith.addf %166, %119 : vector<4x1024xf32>
      %cst_126 = arith.constant 0.000000e+00 : f32
      %168 = vector.broadcast %cst_126 : f32 to vector<4x1024xf32>
      %169 = arith.maximumf %167, %168 : vector<4x1024xf32>
      %cst_127 = arith.constant dense<0.000000e+00> : vector<4xf32>
      %170 = vector.multi_reduction <add>, %169, %cst_127 [1] : vector<4x1024xf32> to vector<4xf32>
      %171 = vector.shape_cast %170 : vector<4xf32> to vector<4x1xf32>
      %172 = arith.addf %arg33, %171 : vector<4x1xf32>
      %173 = arith.mulf %169, %169 : vector<4x1024xf32>
      %cst_128 = arith.constant dense<0.000000e+00> : vector<4xf32>
      %174 = vector.multi_reduction <add>, %173, %cst_128 [1] : vector<4x1024xf32> to vector<4xf32>
      %175 = vector.shape_cast %174 : vector<4xf32> to vector<4x1xf32>
      %176 = arith.addf %arg34, %175 : vector<4x1xf32>
      scf.yield %172, %176 : vector<4x1xf32>, vector<4x1xf32>
    }
    %c16_i32_92 = arith.constant 16 : i32
    %c0_93 = arith.constant 0 : index
    %c0_94 = arith.constant 0 : index
    %126 = vector.load %arg8[%c0_93, %c0_94] : memref<4x4xf32, #tpu.memory_space<vmem>>, vector<4x4xf32>
    %cst_95 = arith.constant dense<0.000000e+00> : vector<4x1xf32>
    %127 = tpu.matmul %126, %125#0, %cst_95 {dimension_numbers = #tpu.dot_dimension_numbers<[1], [0], [0], [1], [0, 0, 1, 1], [], []>} : vector<4x4xf32>, vector<4x1xf32>, vector<4x1xf32> -> vector<4x1xf32>
    %c0_96 = arith.constant 0 : index
    %c0_97 = arith.constant 0 : index
    %128 = vector.load %arg8[%c0_96, %c0_97] : memref<4x4xf32, #tpu.memory_space<vmem>>, vector<4x4xf32>
    %cst_98 = arith.constant dense<0.000000e+00> : vector<4x1xf32>
    %129 = tpu.matmul %128, %125#1, %cst_98 {dimension_numbers = #tpu.dot_dimension_numbers<[1], [0], [0], [1], [0, 0, 1, 1], [], []>} : vector<4x4xf32>, vector<4x1xf32>, vector<4x1xf32> -> vector<4x1xf32>
    %cst_99 = arith.constant 6.10351563E-5 : f32
    %130 = vector.broadcast %cst_99 : f32 to vector<4x1xf32>
    %131 = arith.mulf %127, %130 : vector<4x1xf32>
    %cst_100 = arith.constant 6.10351563E-5 : f32
    %132 = vector.broadcast %cst_100 : f32 to vector<4x1xf32>
    %133 = arith.mulf %129, %132 : vector<4x1xf32>
    %134 = arith.mulf %131, %131 : vector<4x1xf32>
    %135 = arith.subf %133, %134 : vector<4x1xf32>
    %cst_101 = arith.constant 9.99999974E-6 : f32
    %136 = vector.broadcast %cst_101 : f32 to vector<4x1xf32>
    %137 = arith.addf %135, %136 : vector<4x1xf32>
    %138 = math.rsqrt %137 : vector<4x1xf32>
    %c0_102 = arith.constant 0 : index
    %c0_103 = arith.constant 0 : index
    %139 = vector.load %arg9[%c0_102, %c0_103] : memref<4x4xf32, #tpu.memory_space<vmem>>, vector<4x4xf32>
    %c0_104 = arith.constant 0 : index
    %c0_105 = arith.constant 0 : index
    %140 = vector.load %arg25[%c0_104, %c0_105] : memref<4x1xf32, #tpu.memory_space<vmem>>, vector<4x1xf32>
    %c0_106 = arith.constant 0 : index
    %c0_107 = arith.constant 0 : index
    %141 = vector.load %arg26[%c0_106, %c0_107] : memref<4x1xf32, #tpu.memory_space<vmem>>, vector<4x1xf32>
    %c0_108 = arith.constant 0 : index
    %c0_109 = arith.constant 0 : index
    %142 = vector.load %arg12[%c0_108, %c0_109] : memref<4x1xf32, #tpu.memory_space<vmem>>, vector<4x1xf32>
    %cst_110 = arith.constant dense<0.000000e+00> : vector<4x1xf32>
    %143 = tpu.matmul %139, %131, %cst_110 {dimension_numbers = #tpu.dot_dimension_numbers<[1], [0], [0], [1], [0, 0, 1, 1], [], []>} : vector<4x4xf32>, vector<4x1xf32>, vector<4x1xf32> -> vector<4x1xf32>
    %cst_111 = arith.constant dense<0.000000e+00> : vector<4x1xf32>
    %144 = tpu.matmul %139, %138, %cst_111 {dimension_numbers = #tpu.dot_dimension_numbers<[1], [0], [0], [1], [0, 0, 1, 1], [], []>} : vector<4x4xf32>, vector<4x1xf32>, vector<4x1xf32> -> vector<4x1xf32>
    %145 = arith.mulf %140, %144 : vector<4x1xf32>
    %146 = arith.addf %145, %142 : vector<4x1xf32>
    %147 = arith.mulf %143, %146 : vector<4x1xf32>
    %148 = arith.subf %141, %147 : vector<4x1xf32>
    %c0_112 = arith.constant 0 : index
    %c0_113 = arith.constant 0 : index
    %149 = vector.load %arg27[%c0_112, %c0_113] : memref<4x4xf32, #tpu.memory_space<vmem>>, vector<4x4xf32>
    %150 = arith.truncf %149 : vector<4x4xf32> to vector<4x4xbf16>
    %c0_114 = arith.constant 0 : index
    %c0_115 = arith.constant 0 : index
    %151 = vector.load %arg28[%c0_114, %c0_115] : memref<4x1xf32, #tpu.memory_space<vmem>>, vector<4x1xf32>
    %cst_116 = arith.constant 0.000000e+00 : f32
    %152 = vector.broadcast %cst_116 : f32 to vector<4x128xf32>
    %c0_117 = arith.constant 0 : index
    %c0_118 = arith.constant 0 : index
    %c0_119 = arith.constant 0 : index
    %153 = vector.load %arg31[%c0_117, %c0_118, %c0_119] : memref<1x4x128xf32, #tpu.memory_space<vmem>>, vector<1x4x128xf32>
    %154 = vector.shape_cast %153 : vector<1x4x128xf32> to vector<4x128xf32>
    %155 = vector.shape_cast %152 : vector<4x128xf32> to vector<1x4x128xf32>
    tpu.vector_store %arg31[%c0_117, %c0_118, %c0_119], %155 {strides = array<i32>} : memref<1x4x128xf32, #tpu.memory_space<vmem>>, vector<1x4x128xf32>,
    %c0_i32_120 = arith.constant 0 : i32
    %c16_i32_121 = arith.constant 16 : i32
    %156 = arith.addi %c0_i32_120, %c16_i32_121 : i32
    %c1_i32_122 = arith.constant 1 : i32
    scf.for %arg32 = %c0_i32_120 to %156 step %c1_i32_122  : i32 {
      %c1_i32_124 = arith.constant 1 : i32
      %157 = arith.muli %arg32, %c1_i32_124 : i32
      %c0_i32_125 = arith.constant 0 : i32
      %158 = arith.addi %c0_i32_125, %157 : i32
      %159 = tpu.iota {dimensions = array<i32: 0>} : vector<128x8xi32>
      %160 = tpu.iota {dimensions = array<i32: 1>} : vector<128x8xi32>
      %c8_i32 = arith.constant 8 : i32
      %161 = arith.muli %158, %c8_i32 : i32
      %162 = vector.broadcast %161 : i32 to vector<128x8xi32>
      %163 = arith.addi %162, %160 : vector<128x8xi32>
      %164 = arith.cmpi eq, %159, %163 : vector<128x8xi32>
      %165 = arith.extui %164 : vector<128x8xi1> to vector<128x8xi32>
      %166 = arith.sitofp %165 : vector<128x8xi32> to vector<128x8xf32>
      %cst_126 = arith.constant dense<0.000000e+00> : vector<4x8xf32>
      %167 = tpu.matmul %116, %166, %cst_126 {dimension_numbers = #tpu.dot_dimension_numbers<[1], [0], [0], [1], [0, 0, 1, 1], [], []>} : vector<4x128xf32>, vector<128x8xf32>, vector<4x8xf32> -> vector<4x8xf32>
      %cst_127 = arith.constant dense<0.000000e+00> : vector<4x1024xf32>
      %168 = tpu.matmul %167, %120, %cst_127 {dimension_numbers = #tpu.dot_dimension_numbers<[1], [0], [0], [1], [0, 0, 1, 1], [], []>} : vector<4x8xf32>, vector<8x1024xf32>, vector<4x1024xf32> -> vector<4x1024xf32>
      %169 = arith.addf %168, %119 : vector<4x1024xf32>
      %cst_128 = arith.constant 0.000000e+00 : f32
      %170 = vector.broadcast %cst_128 : f32 to vector<4x1024xf32>
      %171 = arith.maximumf %169, %170 : vector<4x1024xf32>
      %172 = vector.broadcast %146 : vector<4x1xf32> to vector<4x1024xf32>
      %173 = arith.mulf %171, %172 : vector<4x1024xf32>
      %174 = vector.broadcast %148 : vector<4x1xf32> to vector<4x1024xf32>
      %175 = arith.addf %173, %174 : vector<4x1024xf32>
      %176 = arith.truncf %175 : vector<4x1024xf32> to vector<4x1024xbf16>
      %cst_129 = arith.constant dense<0.000000e+00> : vector<4x1024xf32>
      %177 = tpu.matmul %150, %176, %cst_129 {dimension_numbers = #tpu.dot_dimension_numbers<[1], [0], [0], [1], [0, 0, 1, 1], [], []>} : vector<4x4xbf16>, vector<4x1024xbf16>, vector<4x1024xf32> -> vector<4x1024xf32>
      %178 = vector.broadcast %151 : vector<4x1xf32> to vector<4x1024xf32>
      %179 = arith.addf %177, %178 : vector<4x1024xf32>
      %cst_130 = arith.constant dense<0xFF800000> : vector<4xf32>
      %180 = vector.multi_reduction <maximumf>, %179, %cst_130 [1] : vector<4x1024xf32> to vector<4xf32>
      %181 = vector.shape_cast %180 : vector<4xf32> to vector<4x1xf32>
      %182 = vector.broadcast %181 : vector<4x1xf32> to vector<4x1024xf32>
      %183 = arith.subf %179, %182 : vector<4x1024xf32>
      %184 = math.exp %183 : vector<4x1024xf32>
      %cst_131 = arith.constant dense<0.000000e+00> : vector<4x8xf32>
      %185 = tpu.matmul %184, %121, %cst_131 {dimension_numbers = #tpu.dot_dimension_numbers<[1], [0], [0], [1], [0, 0, 1, 1], [], []>} : vector<4x1024xf32>, vector<1024x8xf32>, vector<4x8xf32> -> vector<4x8xf32>
      %186 = tpu.reciprocal %185 {approx = true} : vector<4x8xf32> -> vector<4x8xf32>
      %187 = arith.mulf %185, %186 : vector<4x8xf32>
      %cst_132 = arith.constant dense<0.000000e+00> : vector<4x8xf32>
      %188 = tpu.matmul %50, %166, %cst_132 {dimension_numbers = #tpu.dot_dimension_numbers<[1], [0], [0], [1], [0, 0, 1, 1], [], []>} : vector<4x128xf32>, vector<128x8xf32>, vector<4x8xf32> -> vector<4x8xf32>
      %189 = arith.mulf %188, %187 : vector<4x8xf32>
      %190 = tpu.iota {dimensions = array<i32: 0>} : vector<8x128xi32>
      %191 = tpu.iota {dimensions = array<i32: 1>} : vector<8x128xi32>
      %c8_i32_133 = arith.constant 8 : i32
      %192 = arith.muli %158, %c8_i32_133 : i32
      %193 = vector.broadcast %192 : i32 to vector<8x128xi32>
      %194 = arith.addi %193, %190 : vector<8x128xi32>
      %195 = arith.cmpi eq, %191, %194 : vector<8x128xi32>
      %196 = arith.extui %195 : vector<8x128xi1> to vector<8x128xi32>
      %197 = arith.sitofp %196 : vector<8x128xi32> to vector<8x128xf32>
      %c0_134 = arith.constant 0 : index
      %c0_135 = arith.constant 0 : index
      %c0_136 = arith.constant 0 : index
      %198 = vector.load %arg31[%c0_134, %c0_135, %c0_136] : memref<1x4x128xf32, #tpu.memory_space<vmem>>, vector<1x4x128xf32>
      %199 = vector.shape_cast %198 : vector<1x4x128xf32> to vector<4x128xf32>
      %cst_137 = arith.constant dense<0.000000e+00> : vector<4x128xf32>
      %200 = tpu.matmul %189, %197, %cst_137 {dimension_numbers = #tpu.dot_dimension_numbers<[1], [0], [0], [1], [0, 0, 1, 1], [], []>} : vector<4x8xf32>, vector<8x128xf32>, vector<4x128xf32> -> vector<4x128xf32>
      %201 = arith.addf %199, %200 : vector<4x128xf32>
      %c0_138 = arith.constant 0 : index
      %c0_139 = arith.constant 0 : index
      %c0_140 = arith.constant 0 : index
      %202 = vector.load %arg31[%c0_138, %c0_139, %c0_140] : memref<1x4x128xf32, #tpu.memory_space<vmem>>, vector<1x4x128xf32>
      %203 = vector.shape_cast %202 : vector<1x4x128xf32> to vector<4x128xf32>
      %204 = vector.shape_cast %201 : vector<4x128xf32> to vector<1x4x128xf32>
      tpu.vector_store %arg31[%c0_138, %c0_139, %c0_140], %204 {strides = array<i32>} : memref<1x4x128xf32, #tpu.memory_space<vmem>>, vector<1x4x128xf32>,
    }
    %c16_i32_123 = arith.constant 16 : i32
    return
  }
  func.func @transform_0(%arg0: i32) -> (i32, i32, i32) {
    %c0_i32 = arith.constant 0 : i32
    %c0_i32_0 = arith.constant 0 : i32
    %c0_i32_1 = arith.constant 0 : i32
    return %arg0, %c0_i32, %c0_i32_0 : i32, i32, i32
  }
  func.func @transform_1(%arg0: i32) -> (i32, i32) {
    %c0_i32 = arith.constant 0 : i32
    %c0_i32_0 = arith.constant 0 : i32
    %c0_i32_1 = arith.constant 0 : i32
    return %c0_i32, %c0_i32_0 : i32, i32
  }
  func.func @transform_2(%arg0: i32) -> (i32, i32) {
    %c0_i32 = arith.constant 0 : i32
    %c0_i32_0 = arith.constant 0 : i32
    %c0_i32_1 = arith.constant 0 : i32
    return %c0_i32, %c0_i32_0 : i32, i32
  }
  func.func @transform_3(%arg0: i32) -> (i32, i32) {
    %c0_i32 = arith.constant 0 : i32
    %c0_i32_0 = arith.constant 0 : i32
    %c0_i32_1 = arith.constant 0 : i32
    return %c0_i32, %c0_i32_0 : i32, i32
  }
  func.func @transform_4(%arg0: i32) -> (i32, i32) {
    %c0_i32 = arith.constant 0 : i32
    %c0_i32_0 = arith.constant 0 : i32
    %c0_i32_1 = arith.constant 0 : i32
    return %c0_i32, %c0_i32_0 : i32, i32
  }
  func.func @transform_5(%arg0: i32) -> (i32, i32) {
    %c0_i32 = arith.constant 0 : i32
    %c0_i32_0 = arith.constant 0 : i32
    %c0_i32_1 = arith.constant 0 : i32
    return %c0_i32, %c0_i32_0 : i32, i32
  }
  func.func @transform_6(%arg0: i32) -> (i32, i32) {
    %c0_i32 = arith.constant 0 : i32
    %c0_i32_0 = arith.constant 0 : i32
    %c0_i32_1 = arith.constant 0 : i32
    return %c0_i32, %c0_i32_0 : i32, i32
  }
  func.func @transform_7(%arg0: i32) -> (i32, i32) {
    %c0_i32 = arith.constant 0 : i32
    %c0_i32_0 = arith.constant 0 : i32
    %c0_i32_1 = arith.constant 0 : i32
    return %c0_i32, %c0_i32_0 : i32, i32
  }
  func.func @transform_8(%arg0: i32) -> (i32, i32) {
    %c0_i32 = arith.constant 0 : i32
    %c0_i32_0 = arith.constant 0 : i32
    %c0_i32_1 = arith.constant 0 : i32
    return %c0_i32, %c0_i32_0 : i32, i32
  }
  func.func @transform_9(%arg0: i32) -> (i32, i32) {
    %c0_i32 = arith.constant 0 : i32
    %c0_i32_0 = arith.constant 0 : i32
    %c0_i32_1 = arith.constant 0 : i32
    return %c0_i32, %c0_i32_0 : i32, i32
  }
  func.func @transform_10(%arg0: i32) -> (i32, i32) {
    %c0_i32 = arith.constant 0 : i32
    %c0_i32_0 = arith.constant 0 : i32
    %c0_i32_1 = arith.constant 0 : i32
    return %c0_i32, %c0_i32_0 : i32, i32
  }
  func.func @transform_11(%arg0: i32) -> (i32, i32) {
    %c0_i32 = arith.constant 0 : i32
    %c0_i32_0 = arith.constant 0 : i32
    %c0_i32_1 = arith.constant 0 : i32
    return %c0_i32, %c0_i32_0 : i32, i32
  }
  func.func @transform_12(%arg0: i32) -> (i32, i32) {
    %c0_i32 = arith.constant 0 : i32
    %c0_i32_0 = arith.constant 0 : i32
    %c0_i32_1 = arith.constant 0 : i32
    return %c0_i32, %c0_i32_0 : i32, i32
  }
  func.func @transform_13(%arg0: i32) -> (i32, i32) {
    %c0_i32 = arith.constant 0 : i32
    %c0_i32_0 = arith.constant 0 : i32
    %c0_i32_1 = arith.constant 0 : i32
    return %c0_i32, %c0_i32_0 : i32, i32
  }
  func.func @transform_14(%arg0: i32) -> (i32, i32) {
    %c0_i32 = arith.constant 0 : i32
    %c0_i32_0 = arith.constant 0 : i32
    %c0_i32_1 = arith.constant 0 : i32
    return %c0_i32, %c0_i32_0 : i32, i32
  }
  func.func @transform_15(%arg0: i32) -> (i32, i32) {
    %c0_i32 = arith.constant 0 : i32
    %c0_i32_0 = arith.constant 0 : i32
    %c0_i32_1 = arith.constant 0 : i32
    return %c0_i32, %c0_i32_0 : i32, i32
  }
  func.func @transform_16(%arg0: i32) -> (i32, i32) {
    %c0_i32 = arith.constant 0 : i32
    %c0_i32_0 = arith.constant 0 : i32
    %c0_i32_1 = arith.constant 0 : i32
    return %c0_i32, %c0_i32_0 : i32, i32
  }
  func.func @transform_17(%arg0: i32) -> (i32, i32) {
    %c0_i32 = arith.constant 0 : i32
    %c0_i32_0 = arith.constant 0 : i32
    %c0_i32_1 = arith.constant 0 : i32
    return %c0_i32, %c0_i32_0 : i32, i32
  }
  func.func @transform_18(%arg0: i32) -> (i32, i32) {
    %c0_i32 = arith.constant 0 : i32
    %c0_i32_0 = arith.constant 0 : i32
    %c0_i32_1 = arith.constant 0 : i32
    return %c0_i32, %c0_i32_0 : i32, i32
  }
  func.func @transform_19(%arg0: i32) -> (i32, i32) {
    %c0_i32 = arith.constant 0 : i32
    %c0_i32_0 = arith.constant 0 : i32
    %c0_i32_1 = arith.constant 0 : i32
    return %c0_i32, %c0_i32_0 : i32, i32
  }
  func.func @transform_20(%arg0: i32) -> (i32, i32) {
    %c0_i32 = arith.constant 0 : i32
    %c0_i32_0 = arith.constant 0 : i32
    %c0_i32_1 = arith.constant 0 : i32
    return %c0_i32, %c0_i32_0 : i32, i32
  }
  func.func @transform_21(%arg0: i32) -> (i32, i32) {
    %c0_i32 = arith.constant 0 : i32
    %c0_i32_0 = arith.constant 0 : i32
    %c0_i32_1 = arith.constant 0 : i32
    return %c0_i32, %c0_i32_0 : i32, i32
  }
  func.func @transform_22(%arg0: i32) -> (i32, i32) {
    %c0_i32 = arith.constant 0 : i32
    %c0_i32_0 = arith.constant 0 : i32
    %c0_i32_1 = arith.constant 0 : i32
    return %c0_i32, %c0_i32_0 : i32, i32
  }
  func.func @transform_23(%arg0: i32) -> (i32, i32) {
    %c0_i32 = arith.constant 0 : i32
    %c0_i32_0 = arith.constant 0 : i32
    %c0_i32_1 = arith.constant 0 : i32
    return %c0_i32, %c0_i32_0 : i32, i32
  }
  func.func @transform_24(%arg0: i32) -> (i32, i32) {
    %c0_i32 = arith.constant 0 : i32
    %c0_i32_0 = arith.constant 0 : i32
    %c0_i32_1 = arith.constant 0 : i32
    return %c0_i32, %c0_i32_0 : i32, i32
  }
  func.func @transform_25(%arg0: i32) -> (i32, i32) {
    %c0_i32 = arith.constant 0 : i32
    %c0_i32_0 = arith.constant 0 : i32
    %c0_i32_1 = arith.constant 0 : i32
    return %c0_i32, %c0_i32_0 : i32, i32
  }
  func.func @transform_26(%arg0: i32) -> (i32, i32) {
    %c0_i32 = arith.constant 0 : i32
    %c0_i32_0 = arith.constant 0 : i32
    %c0_i32_1 = arith.constant 0 : i32
    return %c0_i32, %c0_i32_0 : i32, i32
  }
  func.func @transform_27(%arg0: i32) -> (i32, i32) {
    %c0_i32 = arith.constant 0 : i32
    %c0_i32_0 = arith.constant 0 : i32
    %c0_i32_1 = arith.constant 0 : i32
    return %c0_i32, %c0_i32_0 : i32, i32
  }
  func.func @transform_28(%arg0: i32) -> (i32, i32) {
    %c0_i32 = arith.constant 0 : i32
    %c0_i32_0 = arith.constant 0 : i32
    %c0_i32_1 = arith.constant 0 : i32
    return %c0_i32, %c0_i32_0 : i32, i32
  }
  func.func @transform_29(%arg0: i32) -> (i32, i32) {
    %c0_i32 = arith.constant 0 : i32
    %c0_i32_0 = arith.constant 0 : i32
    %c0_i32_1 = arith.constant 0 : i32
    return %c0_i32, %c0_i32_0 : i32, i32
  }
  func.func @transform_30(%arg0: i32) -> (i32, i32, i32) {
    %c0_i32 = arith.constant 0 : i32
    %c0_i32_0 = arith.constant 0 : i32
    %c0_i32_1 = arith.constant 0 : i32
    return %arg0, %c0_i32, %c0_i32_0 : i32, i32, i32
  }
}

</mosaic_0001>

<bundles_post_ra>
// kernel: tpu_custom_call.1
= control target key start
LH: loop header
LB: loop body
LE: loop exit
PB: predicated region body
PF: predicated region fallthrough
CT: control target
= control target key end

     0   :  { %s5342_s6 = smov 1   ;;  %s5343_s10 = smov 2   ;;  %s6816_s0 = inlined_call_operand.smem [shape: u32[31], index: -1, kind: input, shape index: {}] }
   0x1   :  { %s5391_s5 = sld [smem:[%s6816_s0]]   ;;  %s5344_s14 = smov 3  }
   0x2   :  { %s5396_s9 = sld [smem:[%s6816_s0 + %s5342_s6]]   ;;  %s5345_s18 = smov 4  }
   0x3   :  { %s5401_s13 = sld [smem:[%s6816_s0 + %s5343_s10]]   ;;  %s5346_s22 = smov 5  }
   0x4   :  { %s5406_s17 = sld [smem:[%s6816_s0 + %s5344_s14]]   ;;  %s5347_s26 = smov 6  }
   0x5   :  { %s5411_s21 = sld [smem:[%s6816_s0 + %s5345_s18]]   ;;  %s5348_s30 = smov 7  }
   0x6   :  { %s5416_s25 = sld [smem:[%s6816_s0 + %s5346_s22]]   ;;  %s5349_s4 = smov 8  }
   0x7   :  { %6842 = sst [smem:[#allocation5_spill]] %s5391_s5  ;;  %s5350_s10 = smov 9  }
   0x8   :  { %6843 = sst [smem:[#allocation6_spill]] %s5396_s9  ;;  %s5351_s15 = smov 10  }
   0x9   :  { %s5421_s29 = sld [smem:[%s6816_s0 + %s5347_s26]]   ;;  %s5352_s20 = smov 11  }
   0xa   :  { %s5426_s3 = sld [smem:[%s6816_s0 + %s5348_s30]]   ;;  %s5353_s26 = smov 12  }
   0xb   :  { %s5431_s8 = sld [smem:[%s6816_s0 + %s5349_s4]]   ;;  %s5354_s1 = smov 13  }
   0xc   :  { %s5436_s14 = sld [smem:[%s6816_s0 + %s5350_s10]]   ;;  %s5355_s7 = smov 14  }
   0xd   :  { %s5441_s19 = sld [smem:[%s6816_s0 + %s5351_s15]]   ;;  %s5356_s15 = smov 15  }
   0xe   :  { %s5446_s24 = sld [smem:[%s6816_s0 + %s5352_s20]]   ;;  %s5357_s22 = smov 16  }
   0xf   :  { %s5451_s30 = sld [smem:[%s6816_s0 + %s5353_s26]]   ;;  %s5358_s28 = smov 17  }
  0x10   :  { %6844 = sst [smem:[#allocation7_spill]] %s5426_s3 }
  0x11   :  { %6845 = sst [smem:[#allocation8_spill]] %s5431_s8 }
  0x12   :  { %s5456_s6 = sld [smem:[%s6816_s0 + %s5354_s1]]  }
  0x13   :  { %6846 = sst [smem:[#allocation9_spill]] %s5441_s19 }
  0x14   :  { %s5461_s12 = sld [smem:[%s6816_s0 + %s5355_s7]]   ;;  %s5359_s7 = smov 18  }
  0x15   :  { %s5466_s20 = sld [smem:[%s6816_s0 + %s5356_s15]]   ;;  %s5360_s15 = smov 19  }
  0x16   :  { %s5471_s27 = sld [smem:[%s6816_s0 + %s5357_s22]]   ;;  %s5361_s22 = smov 20  }
  0x17   :  { %s5476_s4 = sld [smem:[%s6816_s0 + %s5358_s28]]   ;;  %s5362_s28 = smov 21  }
  0x18   :  { %6847 = sst [smem:[#allocation10_spill]] %s5456_s6 }
  0x19   :  { %s5481_s19 = sld [smem:[%s6816_s0 + %s5359_s7]]   ;;  %s5363_s7 = smov 22  }
  0x1b   :  { %6848 = sst [smem:[#allocation11_spill]] %s5466_s20 }
  0x1c   :  { %6849 = sst [smem:[#allocation12_spill]] %s5471_s27 }
  0x1d   :  { %6850 = sst [smem:[#allocation13_spill]] %s5476_s4 }
  0x1e   :  { %s5486_s20 = sld [smem:[%s6816_s0 + %s5360_s15]]   ;;  %s5364_s15 = smov 23  }
  0x1f   :  { %6851 = sst [smem:[#allocation14_spill]] %s5481_s19 }
  0x20   :  { %s5491_s27 = sld [smem:[%s6816_s0 + %s5361_s22]]   ;;  %s5365_s22 = smov 24  }
  0x21   :  { %s5496_s4 = sld [smem:[%s6816_s0 + %s5362_s28]]   ;;  %s5366_s28 = smov 25  }
  0x22   :  { %s5501_s19 = sld [smem:[%s6816_s0 + %s5363_s7]]   ;;  %s5367_s7 = smov 26  }
  0x24   :  { %6852 = sst [smem:[#allocation15_spill]] %s5486_s20 }
  0x25   :  { %s5506_s20 = sld [smem:[%s6816_s0 + %s5364_s15]]   ;;  %s5368_s15 = smov 27  }
  0x26   :  { %6853 = sst [smem:[#allocation16_spill]] %s5491_s27 }
  0x27   :  { %6854 = sst [smem:[#allocation17_spill]] %s5496_s4 }
  0x28   :  { %6855 = sst [smem:[#allocation18_spill]] %s5501_s19 }
  0x29   :  { %s5511_s27 = sld [smem:[%s6816_s0 + %s5365_s22]]   ;;  %s5369_s22 = smov 28  }
  0x2a   :  { %s5516_s4 = sld [smem:[%s6816_s0 + %s5366_s28]]   ;;  %s5370_s28 = smov 29  }
  0x2b   :  { %6856 = sst [smem:[#allocation19_spill]] %s5506_s20 }
  0x2c   :  { %s5521_s19 = sld [smem:[%s6816_s0 + %s5367_s7]]   ;;  %s5371_s7 = smov 30  }
  0x2d   :  { %s5526_s20 = sld [smem:[%s6816_s0 + %s5368_s15]]  }
  0x2f   :  { %6857 = sst [smem:[#allocation20_spill]] %s5511_s27 }
  0x30   :  { %6858 = sst [smem:[#allocation21_spill]] %s5516_s4 }
  0x31   :  { %s5531_s27 = sld [smem:[%s6816_s0 + %s5369_s22]]  }
  0x32   :  { %6859 = sst [smem:[#allocation22_spill]] %s5521_s19 }
  0x33   :  { %s5536_s4 = sld [smem:[%s6816_s0 + %s5370_s28]]  }
  0x34   :  { %s5541_s19 = sld [smem:[%s6816_s0 + %s5371_s7]]  }
  0x39   :  { %6860 = sst [smem:[#allocation23_spill]] %s5536_s4 }
  0x3a   :  { %66 = vsyncpa [#allocation3], 0 }
  0x3b   :  { %68 = vsyncpa [#allocation3 + $0x1], 0  ;;  %s5543_s15 = smov 0   ;;  %s5545_s16 = smov 0  }
  0x3c   :  { %s5547_s18 = smov 0   ;;  %s5549_s22 = smov 0  }
  0x3d LB: > { %s6861_s4 = sld [smem:[#allocation23_spill]]  ;;  %s5564_s0 = sadd.s32 4294967295, %s5324_s22   ;;  %s5312_s15 = sphi %s5543_s15, %s7164_s15   ;;  %s5324_s22 = sphi %s5549_s22, %s7167_s22   ;;  %s5320_s18 = sphi %s5547_s18, %s7166_s18   ;;  %s5316_s16 = sphi %s5545_s16, %s7165_s16  }
  0x3e   : > { %s4510_s23 = sadd.s32 4294967294, %s5324_s22   ;;  %s5568_s26 = sadd.s32 1, %s5324_s22  }
  0x3f   : > { %s716_s28 = sadd.s32 1, %s5320_s18  ;;  %s713_s1 = ssub.s32 %s5324_s22, %s5568_s26 }
  0x40   : > { %p726_p0 = scmp.ne.s32.totalorder %s5320_s18, %s5316_s16  ;;  %p714_p1 = scmp.eq.s32.totalorder %s713_s1, 0 }
  0x41   : > { %p727_p2 = scmp.eq.s32.totalorder %s5564_s0, 1  ;;  %p732_p3 = scmp.ne.s32.totalorder %s5316_s16, %s5312_s15 }
  0x42   : > { %p733_p4 = scmp.eq.s32.totalorder %s4510_s23, 1  ;;  %p4513_p7 = scmp.ge.s32.totalorder %s5324_s22, 1 }
  0x43   : > { %s5579_s2 = scalar_select %p714_p1, %s5320_s18, %s716_s28  }
  0x44   : > { %p5581_p5 = por %p727_p2, %p726_p0  ;;  %p5585_p6 = por %p733_p4, %p732_p3 }
  0x45   : > { %p845_p8 = scmp.lt.s32.totalorder %s5324_s22, 3 }
  0x47   : > { %p846_p9 = pnand %p4513_p7, %p845_p8 }
  0x49   : > { %849 = sbr.rel (%p846_p9) target bundleno = 3679 (0xe5f), region = 140 }
  0x4e   : > { %s6817_s11 = sand.u32 1, %s5316_s16   ;;  %p922_p10 = scmp.lt.s32.totalorder %s5564_s0, 1  ;;  %v6818_v0 = vmov 0.0   ;;  %vm5373_vm0 = vmmov 0   ;;  %v5374_v1 = vmov 0   ;;  %vm939_vm1 = vcmask 1043456  }
  0x4f   : > { %s6864_s5 = sld [smem:[#allocation5_spill]]  ;;  %s5595_s23 = sshll.u32 %s6817_s11, 2  ;;  %4894 = vmatprep.subr.mxu0 %v6818_v0  ;;  %4896 = vmatprep.mubr.msk.f32.mxu0 %vm5373_vm0, %v6818_v0  ;;  %v1094_v2 = vld [vmem:[%s5421_s29] sm:$0xf]  ;;  %vm935_vm2 = vcmask 31744   ;;  %vm6835_vm3 = vcmask 64512  }
  0x50   : > { %s6865_s9 = sld [smem:[#allocation6_spill]]  ;;  %5220 = vset.pattern.permute.xlu0 %v5374_v1  ;;  %4899 = vmatprep.subr.mxu1 %v6818_v0  ;;  %v1013_v5 = vld [vmem:[%s5406_s17] sm:$0xf] }
  0x51   : > { %s923_s28 = scalar_select %p922_p10, %s5564_s0, 1  ;;  %1097 = vperm.xlu0 %5220, %v1094_v2   ;;  %4901 = vmatprep.mubr.msk.f32.mxu1 %vm5373_vm0, %v6818_v0  ;;  %v1093_v6 = vld [vmem:[%s5416_s25] sm:$0xf] }
  0x52   : > { %5221 = vset.pattern.permute.xlu1 %v5374_v1  ;;  %s6866_s3 = sld [smem:[#allocation7_spill]]  ;;  %v929_v16 = vld [vmem:[%s5401_s13] sm:$0xf] }
  0x53   : > { %s4515_s1 = sshll.u32 %s923_s28, 2  ;;  %v1014_v18 = vld [vmem:[%s5411_s21] sm:$0xf]  ;;  %s6867_s8 = sld [smem:[#allocation8_spill]] }
  0x54   : > { %s6868_s6 = sld [smem:[#allocation10_spill]]  ;;  %v1522_v51 = vld [vmem:[%s5451_s30] sm:$0xff] }
  0x55   : > { %s925_s11 = scalar_lea.vmem %s6864_s5, %s4515_s1  ;;  %v1337_v58 = vld [vmem:[%s5436_s14] sm:$0xf]  ;;  %s6870_s28 = sld [smem:[#allocation12_spill]] }
  0x56   : > { %v928_v3 = vld [vmem:[%s6865_s9] sm:$0xf]  ;;  %s6871_s1 = sld [smem:[#allocation13_spill]] }
  0x57   : > { %v927_v4 = vld [vmem:[%s925_s11] sm:$0xf]  ;;  %s6869_s11 = sld [smem:[#allocation11_spill]] }
  0x58   : > { %4895 = vmatpush3.msk.msra.mxu0 %vm939_vm1, %v927_v4  ;;  %4900 = vmatpush3.msk.msra.mxu1 %vm939_vm1, %v927_v4  ;;  %v5634_v20 = vld [vmem:[%s6866_s3] sm:$0xf]  ;;  %s6872_s3 = sld [smem:[#allocation14_spill]] }
  0x59   : > { %4897 = vmatmul.mubr.msk.f32.vlgmr.msra.gmra.mxu0 %vm935_vm2, %v928_v3  ;;  %4904 = vmatprep.subr.mxu0 %v6818_v0  ;;  %v5663_v39 = vld [vmem:[%s6867_s8] sm:$0xf]  ;;  %s6874_s5 = sld [smem:[#allocation15_spill]] }
  0x5a   : > { %4905 = vmatpush3.msk.msra.mxu0 %vm939_vm1, %v927_v4  ;;  %4906 = vmatprep.mubr.msk.f32.mxu0 %vm5373_vm0, %v6818_v0  ;;  %v1523_v46 = vld [vmem:[%s6868_s6] sm:$0xff]  ;;  %s6875_s6 = sld [smem:[#allocation9_spill]] }
  0x5b   : > { %4902 = vmatmul.mubr.msk.f32.vlgmr.msra.gmra.mxu1 %vm935_vm2, %v1013_v5  ;;  %4909 = vmatprep.subr.mxu1 %v6818_v0  ;;  %v5701_v59 = vld [vmem:[%s5446_s24] sm:$0xf]  ;;  %s6876_s8 = sld [smem:[#allocation19_spill]] }
  0x5c   : > { %4911 = vmatprep.mubr.msk.f32.mxu1 %vm5373_vm0, %v6818_v0  ;;  %4914 = vmatprep.subr.mxu0 %v6818_v0  ;;  %s6877_s9 = sld [smem:[#allocation17_spill]] }
  0x5d   : > { %4907 = vmatmul.mubr.msk.f32.vlgmr.msra.gmra.mxu0 %vm935_vm2, %v1093_v6  ;;  %v1828_v6 = vld [vmem:[%s5461_s12] sm:$0xf] }
  0x5e   : > { %4916 = vmatprep.mubr.msk.f32.mxu0 %vm5373_vm0, %v6818_v0 }
  0xcc   : > { %v1098_v9 = vpop.permute.xlu0 %1097 }
 0x119   : > { %v1009_v7 = vpop.f32.mrf.mxu0 }
 0x11b   : > { %v4898_v8 = vpop.f32.mrf.mxu0  ;;  %v1089_v17 = vpop.f32.mrf.mxu1 }
 0x11d   : > { %v1169_v10 = vpop.f32.mrf.mxu0  ;;  %v4903_v19 = vpop.f32.mrf.mxu1 }
 0x11e   : > { %v5624_v11 = vadd.f32 %v1169_v10, %v1098_v9 }
 0x11f   : > { %v4908_v12 = vpop.f32.mrf.mxu0 }
 0x120   : > { %v1173_v13 = vsel %vm939_vm1, %v5624_v11, 0.0  ;;  %v1176_v14 = vmul.f32 %v5624_v11, %v5624_v11 }
 0x121   : > { %1174 = vadd.xlane.f32.xlu0 %v1173_v13 }
 0x122   : > { %v1177_v15 = vsel %vm939_vm1, %v1176_v14, 0.0  ;;  %v1979_v14 = vld [vmem:[%s6869_s11] sm:$0xf]  ;;  %s6873_s11 = sld [smem:[#allocation16_spill]] }
 0x123   : > { %1178 = vadd.xlane.f32.xlu1 %v1177_v15 }
 0x134   : > { %932 = vperm.xlu1 %5221, %v929_v16  }
 0x138   : > { %1017 = vperm.xlu1 %5221, %v1014_v18  }
 0x1aa   : > { %v1175_v21 = vpop.xlane.xlu0 %1174 }
 0x1ab   : > { %4910 = vmatpush3.msk.msra.mxu1 %vm939_vm1, %v1175_v21 }
 0x1ac   : > { %v1179_v22 = vpop.xlane.xlu1 %1178  ;;  %4912 = vmatmul.mubr.msk.f32.vlgmr.msra.gmra.mxu1 %vm935_vm2, %v5634_v20  ;;  %4919 = vmatprep.subr.mxu1 %v6818_v0 }
 0x1ad   : > { %4915 = vmatpush3.msk.msra.mxu0 %vm939_vm1, %v1179_v22  ;;  %4921 = vmatprep.mubr.msk.f32.mxu1 %vm5373_vm0, %v6818_v0  ;;  %v1829_v22 = vld [vmem:[%s6870_s28] sm:$0xf]  ;;  %s6878_s28 = sld [smem:[#allocation18_spill]] }
 0x1ae   : > { %4917 = vmatmul.mubr.msk.f32.vlgmr.msra.gmra.mxu0 %vm935_vm2, %v5634_v20  ;;  %4924 = vmatprep.subr.mxu0 %v6818_v0 }
 0x1af   : > { %4926 = vmatprep.mubr.msk.f32.mxu0 %vm5373_vm0, %v6818_v0 }
 0x1b0   : > { %v933_v23 = vpop.permute.xlu1 %932 }
 0x1b1   : > { %v1010_v24 = vadd.f32 %v1009_v7, %v933_v23 }
 0x1b3   : > { %v5648_v25 = vmax.f32 %v1010_v24, 0.0 }
 0x1b4   : > { %v1018_v26 = vpop.permute.xlu1 %1017 }
 0x1b5   : > { %v1090_v27 = vadd.f32 %v1089_v17, %v1018_v26  ;;  %v1515_v28 = vsel %vm939_vm1, %v5648_v25, 0.0  ;;  %v1518_v33 = vmul.f32 %v5648_v25, %v5648_v25  ;;  %v1830_v26 = vld [vmem:[%s6871_s1] sm:$0xf] }
 0x1b6   : > { %1516 = vadd.xlane.f32.xlu0 %v1515_v28  ;;  %v1980_v28 = vld [vmem:[%s6872_s3] sm:$0xf] }
 0x1b7   : > { %v5652_v29 = vmax.f32 %v1090_v27, 0.0  ;;  %v1519_v34 = vsel %vm939_vm1, %v1518_v33, 0.0 }
 0x1b9   : > { %v1511_v30 = vmul.f32 %v5652_v29, %v5652_v29  ;;  %v1508_v31 = vsel %vm939_vm1, %v5652_v29, 0.0 }
 0x1ba   : > { %1509 = vadd.xlane.f32.xlu1 %v1508_v31 }
 0x1bb   : > { %v1512_v32 = vsel %vm939_vm1, %v1511_v30, 0.0 }
 0x1bc   : > { %1513 = vadd.xlane.f32.xlu0 %v1512_v32  ;;  %v1982_v32 = vld [vmem:[%s6873_s11] sm:$0xf] }
 0x1c0   : > { %1520 = vadd.xlane.f32.xlu0 %v1519_v34 }
 0x23f   : > { %v1517_v35 = vpop.xlane.xlu0 %1516 }
 0x243   : > { %v1510_v50 = vpop.xlane.xlu1 %1509 }
 0x245   : > { %v1514_v37 = vpop.xlane.xlu0 %1513 }
 0x249   : > { %v1521_v48 = vpop.xlane.xlu0 %1520 }
 0x26c   : > { %v1253_v36 = vpop.f32.mrf.mxu1 }
 0x26d   : > { %v1330_v38 = vmul.f32 0.0078125, %v1253_v36 }
 0x26e   : > { %v4913_v40 = vpop.f32.mrf.mxu1  ;;  %v1326_v41 = vpop.f32.mrf.mxu0 }
 0x26f   : > { %v1332_v42 = vmul.f32 %v1330_v38, %v1330_v38  ;;  %v1331_v43 = vmul.f32 0.0078125, %v1326_v41  ;;  %4920 = vmatpush3.msk.msra.mxu1 %vm939_vm1, %v1330_v38  ;;  %v1338_v38 = vld [vmem:[%s6875_s6] sm:$0xf] }
 0x270   : > { %v4918_v44 = vpop.f32.mrf.mxu0  ;;  %4922 = vmatmul.mubr.msk.f32.vlgmr.msra.gmra.mxu1 %vm935_vm2, %v5663_v39  ;;  %4929 = vmatprep.subr.mxu1 %v6818_v0 }
 0x271   : > { %v1333_v45 = vsub.f32 %v1331_v43, %v1332_v42  ;;  %4930 = vmatpush3.msk.msra.mxu1 %vm939_vm1, %v1517_v35  ;;  %4931 = vmatprep.mubr.msk.f32.mxu1 %vm5373_vm0, %v6818_v0  ;;  %v2155_v43 = vld [vmem:[%s6876_s8] sm:$0xf] }
 0x272   : > { %4939 = vmatprep.subr.mxu1 %v6818_v0 }
 0x273   : > { %v1334_v47 = vadd.f32 1e-05, %v1333_v45 }
 0x274   : > { %4932 = vmatmul.mubr.msk.f32.vlgmr.msra.gmra.mxu1 %vm935_vm2, %v1523_v46 }
 0x275   : > { %5222 = vrsqrt.f32 %v1334_v47  ;;  %4940 = vmatpush3.msk.msra.mxu1 %vm939_vm1, %v1521_v48  ;;  %4941 = vmatprep.mubr.msk.f32.mxu1 %vm5373_vm0, %v6818_v0  ;;  %v2154_v48 = vld [vmem:[%s6877_s9] sm:$0xf]  ;;  %s6160_s9 = smov 0  }
 0x276   : > { %4949 = vmatprep.subr.mxu1 %v6818_v0 }
 0x278   : > { %4942 = vmatmul.mubr.msk.f32.vlgmr.msra.gmra.mxu1 %vm935_vm2, %v1523_v46 }
 0x279   : > { %4951 = vmatprep.mubr.msk.f32.mxu1 %vm5373_vm0, %v6818_v0 }
 0x282   : > { %v5223_v49 = vpop.eup %5222 }
 0x283   : > { %4925 = vmatpush3.msk.msra.mxu0 %vm939_vm1, %v5223_v49 }
 0x284   : > { %4927 = vmatmul.mubr.msk.f32.vlgmr.msra.gmra.mxu0 %vm935_vm2, %v5663_v39  ;;  %4934 = vmatprep.subr.mxu0 %v6818_v0 }
 0x285   : > { %4935 = vmatpush3.msk.msra.mxu0 %vm939_vm1, %v1510_v50  ;;  %4936 = vmatprep.mubr.msk.f32.mxu0 %vm5373_vm0, %v6818_v0 }
 0x286   : > { %4944 = vmatprep.subr.mxu0 %v6818_v0 }
 0x288   : > { %4937 = vmatmul.mubr.msk.f32.vlgmr.msra.gmra.mxu0 %vm935_vm2, %v1522_v51 }
 0x289   : > { %4945 = vmatpush3.msk.msra.mxu0 %vm939_vm1, %v1514_v37  ;;  %4946 = vmatprep.mubr.msk.f32.mxu0 %vm5373_vm0, %v6818_v0  ;;  %v1981_v37 = vld [vmem:[%s6874_s5] sm:$0xf]  ;;  %s6154_s5 = scalar_lea.vmem [#allocation2], %s5595_s23 }
 0x28a   : > { %4954 = vmatprep.subr.mxu0 %v6818_v0 }
 0x28c   : > { %4947 = vmatmul.mubr.msk.f32.vlgmr.msra.gmra.mxu0 %vm935_vm2, %v1522_v51 }
 0x28d   : > { %4956 = vmatprep.mubr.msk.f32.mxu0 %vm5373_vm0, %v6818_v0 }
 0x330   : > { %v1412_v52 = vpop.f32.mrf.mxu1 }
 0x332   : > { %v4923_v53 = vpop.f32.mrf.mxu1 }
 0x334   : > { %v1596_v54 = vpop.f32.mrf.mxu1 }
 0x336   : > { %v4933_v55 = vpop.f32.mrf.mxu1 }
 0x338   : > { %v1745_v56 = vpop.f32.mrf.mxu1 }
 0x33a   : > { %v4943_v57 = vpop.f32.mrf.mxu1 }
 0x33b   : > { %v5742_v57 = vld [vmem:[%s5531_s27] sm:$0xff] }
 0x344   : > { %v1485_v60 = vpop.f32.mrf.mxu0 }
 0x345   : > { %v1489_v61 = vmul.f32 %v1485_v60, %v1337_v58  ;;  %v5745_v58 = vld [vmem:[%s5531_s27 + $0x8] sm:$0xff]  ;;  %v5748_v60 = vld [vmem:[%s5531_s27 + $0x10] sm:$0xff] }
 0x346   : > { %v4928_v62 = vpop.f32.mrf.mxu0 }
 0x347   : > { %v1490_v63 = vadd.f32 %v1489_v61, %v5701_v59  ;;  %v5751_v61 = vld [vmem:[%s5531_s27 + $0x18] sm:$0xff]  ;;  %v5757_v62 = vld [vmem:[%s5531_s27 + $0x28] sm:$0xff] }
 0x348   : > { %v1672_v1 = vpop.f32.mrf.mxu0 }
 0x349   : > { %v1491_v2 = vmul.f32 %v1490_v63, %v1412_v52  ;;  %v1673_v3 = vadd.f32 %v1672_v1, %v1596_v54  ;;  %v5763_v1 = vld [vmem:[%s5531_s27 + $0x38] sm:$0xff] }
 0x34a   : > { %v4938_v4 = vpop.f32.mrf.mxu0  ;;  %6881 = vst [vmem:[#allocation26_spill] sm:$0xff] %v5763_v1 }
 0x34b   : > { %v1822_v5 = vmul.f32 0.0078125, %v1673_v3  ;;  %v1492_v42 = vsub.f32 %v1338_v38, %v1491_v2  ;;  %v5766_v2 = vld [vmem:[%s6861_s4] sm:$0xff]  ;;  %v5769_v3 = vld [vmem:[%s6861_s4 + $0x8] sm:$0xff]  ;;  %v5772_v4 = vld [vmem:[%s6861_s4 + $0x10] sm:$0xff] }
 0x34c   : > { %v1818_v7 = vpop.f32.mrf.mxu0  ;;  %6882 = vst [vmem:[#allocation27_spill] sm:$0xff] %v5766_v2  ;;  %6883 = vst [vmem:[#allocation28_spill] sm:$0xff] %v5769_v3  ;;  %v5862_v38 = vld [vmem:[%s6861_s4 + $0x100] sm:$0xff]  ;;  %v5925_v2 = vld [vmem:[%s6861_s4 + $0x1a8] sm:$0xff] }
 0x34d   : > { %v1819_v8 = vadd.f32 %v1818_v7, %v1745_v56  ;;  %4950 = vmatpush3.msra.mxu1 %v1822_v5  ;;  %v1824_v12 = vmul.f32 %v1822_v5, %v1822_v5  ;;  %6884 = vst [vmem:[#allocation29_spill] sm:$0xff] %v5772_v4  ;;  %v5781_v7 = vld [vmem:[%s6861_s4 + $0x28] sm:$0xff]  ;;  %6913 = vst [vmem:[#allocation58_spill] sm:$0xff] %v5862_v38  ;;  %v5916_v56 = vld [vmem:[%s6861_s4 + $0x190] sm:$0xff] }
 0x34e   : > { %v4948_v9 = vpop.f32.mrf.mxu0  ;;  %4959 = vmatprep.subr.mxu1 %v6818_v0  ;;  %4952 = vmatmul.mubr.msk.f32.vlgmr.msra.gmra.mxu1 %vm6835_vm3, %v1828_v6  ;;  %6887 = vst [vmem:[#allocation32_spill] sm:$0xff] %v5781_v7  ;;  %6930 = vst [vmem:[#allocation75_spill] sm:$0xff] %v5916_v56  ;;  %v5928_v38 = vld [vmem:[%s6861_s4 + $0x1b0] sm:$0xff]  ;;  %v5937_v3 = vld [vmem:[%s6861_s4 + $0x1c8] sm:$0xff] }
 0x34f   : > { %v1823_v10 = vmul.f32 0.0078125, %v1819_v8  ;;  %4960 = vmatpush3.msra.mxu1 %v1822_v5  ;;  %4961 = vmatprep.mubr.msk.f32.mxu1 %vm5373_vm0, %v6818_v0  ;;  %v5775_v5 = vld [vmem:[%s6861_s4 + $0x18] sm:$0xff]  ;;  %v5784_v8 = vld [vmem:[%s6861_s4 + $0x30] sm:$0xff]  ;;  %6933 = vst [vmem:[#allocation78_spill] sm:$0xff] %v5925_v2  ;;  %6934 = vst [vmem:[#allocation79_spill] sm:$0xff] %v5928_v38 }
 0x350   : > { %4969 = vmatprep.subr.mxu1 %v6818_v0  ;;  %6885 = vst [vmem:[#allocation30_spill] sm:$0xff] %v5775_v5  ;;  %6888 = vst [vmem:[#allocation33_spill] sm:$0xff] %v5784_v8  ;;  %v5787_v9 = vld [vmem:[%s6861_s4 + $0x38] sm:$0xff]  ;;  %v5949_v4 = vld [vmem:[%s6861_s4 + $0x1e8] sm:$0xff] }
 0x351   : > { %v1825_v13 = vsub.f32 %v1823_v10, %v1824_v12  ;;  %6889 = vst [vmem:[#allocation34_spill] sm:$0xff] %v5787_v9  ;;  %v5790_v10 = vld [vmem:[%s6861_s4 + $0x40] sm:$0xff]  ;;  %v5793_v12 = vld [vmem:[%s6861_s4 + $0x48] sm:$0xff]  ;;  %6937 = vst [vmem:[#allocation82_spill] sm:$0xff] %v5937_v3 }
 0x352   : > { %4962 = vmatmul.mubr.msk.f32.vlgmr.msra.gmra.mxu1 %vm6835_vm3, %v1979_v14  ;;  %6890 = vst [vmem:[#allocation35_spill] sm:$0xff] %v5790_v10  ;;  %6891 = vst [vmem:[#allocation36_spill] sm:$0xff] %v5793_v12  ;;  %v5958_v56 = vld [vmem:[%s6861_s4 + $0x200] sm:$0xff]  ;;  %v5961_v5 = vld [vmem:[%s6861_s4 + $0x208] sm:$0xff] }
 0x353   : > { %v1826_v15 = vadd.f32 1e-05, %v1825_v13  ;;  %4971 = vmatprep.mubr.msk.f32.mxu1 %vm5373_vm0, %v6818_v0  ;;  %v5796_v13 = vld [vmem:[%s6861_s4 + $0x50] sm:$0xff]  ;;  %6941 = vst [vmem:[#allocation86_spill] sm:$0xff] %v5949_v4  ;;  %6943 = vst [vmem:[#allocation88_spill] sm:$0xff] %v5958_v56  ;;  %v5979_v56 = vld [vmem:[%s6861_s4 + $0x238] sm:$0xff] }
 0x354   : > { %6892 = vst [vmem:[#allocation37_spill] sm:$0xff] %v5796_v13  ;;  %6944 = vst [vmem:[#allocation89_spill] sm:$0xff] %v5961_v5  ;;  %v5982_v5 = vld [vmem:[%s6861_s4 + $0x240] sm:$0xff] }
 0x355   : > { %5224 = vrsqrt.f32 %v1826_v15  ;;  %v5802_v15 = vld [vmem:[%s6861_s4 + $0x60] sm:$0xff]  ;;  %6950 = vst [vmem:[#allocation95_spill] sm:$0xff] %v5979_v56  ;;  %6951 = vst [vmem:[#allocation96_spill] sm:$0xff] %v5982_v5  ;;  %v6000_v56 = vld [vmem:[%s6861_s4 + $0x270] sm:$0xff] }
 0x356   : > { %6894 = vst [vmem:[#allocation39_spill] sm:$0xff] %v5802_v15  ;;  %6957 = vst [vmem:[#allocation102_spill] sm:$0xff] %v6000_v56  ;;  %v6003_v5 = vld [vmem:[%s6861_s4 + $0x278] sm:$0xff]  ;;  %v6021_v56 = vld [vmem:[%s6861_s4 + $0x2a8] sm:$0xff] }
 0x357   : > { %6958 = vst [vmem:[#allocation103_spill] sm:$0xff] %v6003_v5  ;;  %6964 = vst [vmem:[#allocation109_spill] sm:$0xff] %v6021_v56  ;;  %v6024_v5 = vld [vmem:[%s6861_s4 + $0x2b0] sm:$0xff]  ;;  %v6042_v56 = vld [vmem:[%s6861_s4 + $0x2e0] sm:$0xff] }
 0x358   : > { %6965 = vst [vmem:[#allocation110_spill] sm:$0xff] %v6024_v5  ;;  %6971 = vst [vmem:[#allocation116_spill] sm:$0xff] %v6042_v56  ;;  %v6045_v5 = vld [vmem:[%s6861_s4 + $0x2e8] sm:$0xff]  ;;  %v6063_v56 = vld [vmem:[%s6861_s4 + $0x318] sm:$0xff] }
 0x359   : > { %6972 = vst [vmem:[#allocation117_spill] sm:$0xff] %v6045_v5  ;;  %6978 = vst [vmem:[#allocation123_spill] sm:$0xff] %v6063_v56  ;;  %v6066_v5 = vld [vmem:[%s6861_s4 + $0x320] sm:$0xff]  ;;  %v6084_v56 = vld [vmem:[%s6861_s4 + $0x350] sm:$0xff] }
 0x35a   : > { %6979 = vst [vmem:[#allocation124_spill] sm:$0xff] %v6066_v5  ;;  %6985 = vst [vmem:[#allocation130_spill] sm:$0xff] %v6084_v56  ;;  %v6087_v5 = vld [vmem:[%s6861_s4 + $0x358] sm:$0xff]  ;;  %v6108_v56 = vld [vmem:[%s6861_s4 + $0x390] sm:$0xff] }
 0x35b   : > { %6986 = vst [vmem:[#allocation131_spill] sm:$0xff] %v6087_v5  ;;  %6993 = vst [vmem:[#allocation138_spill] sm:$0xff] %v6108_v56  ;;  %v6111_v5 = vld [vmem:[%s6861_s4 + $0x398] sm:$0xff]  ;;  %v6126_v7 = vld [vmem:[%s6861_s4 + $0x3c0] sm:$0xff] }
 0x35c   : > { %6994 = vst [vmem:[#allocation139_spill] sm:$0xff] %v6111_v5  ;;  %6999 = vst [vmem:[#allocation144_spill] sm:$0xff] %v6126_v7  ;;  %v6138_v56 = vld [vmem:[%s6861_s4 + $0x3e0] sm:$0xff]  ;;  %v6141_v5 = vld [vmem:[%s6861_s4 + $0x3e8] sm:$0xff] }
 0x35d   : > { %7003 = vst [vmem:[#allocation148_spill] sm:$0xff] %v6138_v56  ;;  %7004 = vst [vmem:[#allocation149_spill] sm:$0xff] %v6141_v5 }
 0x362   : > { %v5225_v16 = vpop.eup %5224 }
 0x363   : > { %4955 = vmatpush3.msra.mxu0 %v5225_v16 }
 0x364   : > { %4957 = vmatmul.mubr.msk.f32.vlgmr.msra.gmra.mxu0 %vm6835_vm3, %v1828_v6  ;;  %4964 = vmatprep.subr.mxu0 %v6818_v0  ;;  %v5778_v6 = vld [vmem:[%s6861_s4 + $0x20] sm:$0xff] }
 0x365   : > { %4965 = vmatpush3.msra.mxu0 %v5225_v16  ;;  %4966 = vmatprep.mubr.msk.f32.mxu0 %vm5373_vm0, %v6818_v0  ;;  %6886 = vst [vmem:[#allocation31_spill] sm:$0xff] %v5778_v6  ;;  %v5805_v16 = vld [vmem:[%s6861_s4 + $0x68] sm:$0xff] }
 0x366   : > { %4974 = vmatprep.subr.mxu0 %v6818_v0  ;;  %6895 = vst [vmem:[#allocation40_spill] sm:$0xff] %v5805_v16  ;;  %v5973_v6 = vld [vmem:[%s6861_s4 + $0x228] sm:$0xff] }
 0x367   : > { %6948 = vst [vmem:[#allocation93_spill] sm:$0xff] %v5973_v6  ;;  %v5994_v6 = vld [vmem:[%s6861_s4 + $0x260] sm:$0xff] }
 0x368   : > { %4967 = vmatmul.mubr.msk.f32.vlgmr.msra.gmra.mxu0 %vm6835_vm3, %v1979_v14  ;;  %v5799_v14 = vld [vmem:[%s6861_s4 + $0x58] sm:$0xff]  ;;  %6955 = vst [vmem:[#allocation100_spill] sm:$0xff] %v5994_v6 }
 0x369   : > { %4976 = vmatprep.mubr.msk.f32.mxu0 %vm5373_vm0, %v6818_v0  ;;  %6893 = vst [vmem:[#allocation38_spill] sm:$0xff] %v5799_v14  ;;  %v5919_v0 = vld [vmem:[%s6861_s4 + $0x198] sm:$0xff] }
 0x36a   : > { %6931 = vst [vmem:[#allocation76_spill] sm:$0xff] %v5919_v0  ;;  %v5970_v0 = vld [vmem:[%s6861_s4 + $0x220] sm:$0xff]  ;;  %v6015_v6 = vld [vmem:[%s6861_s4 + $0x298] sm:$0xff] }
 0x36b   : > { %6947 = vst [vmem:[#allocation92_spill] sm:$0xff] %v5970_v0  ;;  %v5991_v0 = vld [vmem:[%s6861_s4 + $0x258] sm:$0xff]  ;;  %6962 = vst [vmem:[#allocation107_spill] sm:$0xff] %v6015_v6  ;;  %v6036_v6 = vld [vmem:[%s6861_s4 + $0x2d0] sm:$0xff] }
 0x36c   : > { %6954 = vst [vmem:[#allocation99_spill] sm:$0xff] %v5991_v0  ;;  %v6012_v0 = vld [vmem:[%s6861_s4 + $0x290] sm:$0xff]  ;;  %6969 = vst [vmem:[#allocation114_spill] sm:$0xff] %v6036_v6  ;;  %v6057_v6 = vld [vmem:[%s6861_s4 + $0x308] sm:$0xff] }
 0x36d   : > { %6961 = vst [vmem:[#allocation106_spill] sm:$0xff] %v6012_v0  ;;  %v6033_v0 = vld [vmem:[%s6861_s4 + $0x2c8] sm:$0xff]  ;;  %6976 = vst [vmem:[#allocation121_spill] sm:$0xff] %v6057_v6  ;;  %v6078_v6 = vld [vmem:[%s6861_s4 + $0x340] sm:$0xff] }
 0x36e   : > { %6968 = vst [vmem:[#allocation113_spill] sm:$0xff] %v6033_v0  ;;  %v6054_v0 = vld [vmem:[%s6861_s4 + $0x300] sm:$0xff]  ;;  %6983 = vst [vmem:[#allocation128_spill] sm:$0xff] %v6078_v6  ;;  %v6099_v6 = vld [vmem:[%s6861_s4 + $0x378] sm:$0xff] }
 0x36f   : > { %6975 = vst [vmem:[#allocation120_spill] sm:$0xff] %v6054_v0  ;;  %v6075_v0 = vld [vmem:[%s6861_s4 + $0x338] sm:$0xff]  ;;  %6990 = vst [vmem:[#allocation135_spill] sm:$0xff] %v6099_v6  ;;  %v6129_v6 = vld [vmem:[%s6861_s4 + $0x3c8] sm:$0xff] }
 0x370   : > { %6982 = vst [vmem:[#allocation127_spill] sm:$0xff] %v6075_v0  ;;  %v6096_v0 = vld [vmem:[%s6861_s4 + $0x370] sm:$0xff]  ;;  %7000 = vst [vmem:[#allocation145_spill] sm:$0xff] %v6129_v6 }
 0x371   : > { %6989 = vst [vmem:[#allocation134_spill] sm:$0xff] %v6096_v0  ;;  %v6123_v0 = vld [vmem:[%s6861_s4 + $0x3b8] sm:$0xff] }
 0x372   : > { %6998 = vst [vmem:[#allocation143_spill] sm:$0xff] %v6123_v0 }
 0x40e   : > { %v1901_v17 = vpop.f32.mrf.mxu1 }
 0x410   : > { %v4953_v18 = vpop.f32.mrf.mxu1 }
 0x411   : > { %v5811_v18 = vld [vmem:[%s6861_s4 + $0x78] sm:$0xff] }
 0x412   : > { %v2052_v19 = vpop.f32.mrf.mxu1  ;;  %6897 = vst [vmem:[#allocation42_spill] sm:$0xff] %v5811_v18 }
 0x414   : > { %v4963_v21 = vpop.f32.mrf.mxu1 }
 0x415   : > { %v5817_v21 = vld [vmem:[%s6861_s4 + $0x88] sm:$0xff] }
 0x416   : > { %6899 = vst [vmem:[#allocation44_spill] sm:$0xff] %v5817_v21  ;;  %v5943_v21 = vld [vmem:[%s6861_s4 + $0x1d8] sm:$0xff] }
 0x417   : > { %6939 = vst [vmem:[#allocation84_spill] sm:$0xff] %v5943_v21 }
 0x424   : > { %v1971_v23 = vpop.f32.mrf.mxu0 }
 0x425   : > { %v1975_v24 = vmul.f32 %v1971_v23, %v1829_v22  ;;  %v5820_v22 = vld [vmem:[%s6861_s4 + $0x90] sm:$0xff]  ;;  %v5823_v23 = vld [vmem:[%s6861_s4 + $0x98] sm:$0xff] }
 0x426   : > { %v4958_v27 = vpop.f32.mrf.mxu0  ;;  %6900 = vst [vmem:[#allocation45_spill] sm:$0xff] %v5820_v22  ;;  %6901 = vst [vmem:[#allocation46_spill] sm:$0xff] %v5823_v23  ;;  %v5955_v22 = vld [vmem:[%s6861_s4 + $0x1f8] sm:$0xff] }
 0x427   : > { %v1977_v30 = vmul.f32 %v1975_v24, %v1901_v17  ;;  %2132 = vperm.xlu0 %5220, %v1975_v24   ;;  %v5808_v17 = vld [vmem:[%s6861_s4 + $0x70] sm:$0xff]  ;;  %v5826_v24 = vld [vmem:[%s6861_s4 + $0xa0] sm:$0xff]  ;;  %6942 = vst [vmem:[#allocation87_spill] sm:$0xff] %v5955_v22  ;;  %v5967_v23 = vld [vmem:[%s6861_s4 + $0x218] sm:$0xff] }
 0x428   : > { %v2122_v31 = vpop.f32.mrf.mxu0  ;;  %6896 = vst [vmem:[#allocation41_spill] sm:$0xff] %v5808_v17  ;;  %6902 = vst [vmem:[#allocation47_spill] sm:$0xff] %v5826_v24  ;;  %v5832_v27 = vld [vmem:[%s6861_s4 + $0xb0] sm:$0xff]  ;;  %v6105_v24 = vld [vmem:[%s6861_s4 + $0x388] sm:$0xff] }
 0x429   : > { %v1978_v33 = vsub.f32 %v1830_v26, %v1977_v30  ;;  %v2126_v34 = vmul.f32 %v2122_v31, %v1980_v28  ;;  %v5829_v26 = vld [vmem:[%s6861_s4 + $0xa8] sm:$0xff]  ;;  %6904 = vst [vmem:[#allocation49_spill] sm:$0xff] %v5832_v27  ;;  %v5835_v28 = vld [vmem:[%s6861_s4 + $0xb8] sm:$0xff]  ;;  %v5838_v30 = vld [vmem:[%s6861_s4 + $0xc0] sm:$0xff] }
 0x42a   : > { %v4968_v35 = vpop.f32.mrf.mxu0  ;;  %6903 = vst [vmem:[#allocation48_spill] sm:$0xff] %v5829_v26  ;;  %6905 = vst [vmem:[#allocation50_spill] sm:$0xff] %v5835_v28  ;;  %v5841_v31 = vld [vmem:[%s6861_s4 + $0xc8] sm:$0xff] }
 0x42b   : > { %v2127_v36 = vadd.f32 %v2126_v34, %v1982_v32  ;;  %2138 = vperm.xlu0 %5220, %v1978_v33   ;;  %6906 = vst [vmem:[#allocation51_spill] sm:$0xff] %v5838_v30  ;;  %6907 = vst [vmem:[#allocation52_spill] sm:$0xff] %v5841_v31  ;;  %v5844_v32 = vld [vmem:[%s6861_s4 + $0xd0] sm:$0xff]  ;;  %v5847_v33 = vld [vmem:[%s6861_s4 + $0xd8] sm:$0xff] }
 0x42c   : > { %6908 = vst [vmem:[#allocation53_spill] sm:$0xff] %v5844_v32  ;;  %6909 = vst [vmem:[#allocation54_spill] sm:$0xff] %v5847_v33  ;;  %v5850_v34 = vld [vmem:[%s6861_s4 + $0xe0] sm:$0xff]  ;;  %v5853_v35 = vld [vmem:[%s6861_s4 + $0xe8] sm:$0xff] }
 0x42d   : > { %v2128_v40 = vmul.f32 %v2127_v36, %v2052_v19  ;;  %2144 = vperm.xlu1 %5221, %v2127_v36   ;;  %v5814_v19 = vld [vmem:[%s6861_s4 + $0x80] sm:$0xff]  ;;  %6910 = vst [vmem:[#allocation55_spill] sm:$0xff] %v5850_v34  ;;  %6911 = vst [vmem:[#allocation56_spill] sm:$0xff] %v5853_v35  ;;  %v5856_v36 = vld [vmem:[%s6861_s4 + $0xf0] sm:$0xff] }
 0x42e   : > { %6898 = vst [vmem:[#allocation43_spill] sm:$0xff] %v5814_v19  ;;  %6912 = vst [vmem:[#allocation57_spill] sm:$0xff] %v5856_v36  ;;  %v5931_v19 = vld [vmem:[%s6861_s4 + $0x1b8] sm:$0xff] }
 0x42f   : > { %v2129_v41 = vsub.f32 %v1981_v37, %v2128_v40  ;;  %v5859_v37 = vld [vmem:[%s6861_s4 + $0xf8] sm:$0xff]  ;;  %v5865_v40 = vld [vmem:[%s6861_s4 + $0x108] sm:$0xff]  ;;  %6935 = vst [vmem:[#allocation80_spill] sm:$0xff] %v5931_v19  ;;  %6946 = vst [vmem:[#allocation91_spill] sm:$0xff] %v5967_v23 }
 0x430   : > { %6914 = vst [vmem:[#allocation59_spill] sm:$0xff] %v5865_v40  ;;  %v5940_v40 = vld [vmem:[%s6861_s4 + $0x1d0] sm:$0xff]  ;;  %6992 = vst [vmem:[#allocation137_spill] sm:$0xff] %v6105_v24  ;;  %v6135_v24 = vld [vmem:[%s6861_s4 + $0x3d8] sm:$0xff] }
 0x431   : > { %1501 = vperm.xlu1 %5221, %v1492_v42   ;;  %2150 = vperm.xlu0 %5220, %v2129_v41   ;;  %v5868_v41 = vld [vmem:[%s6861_s4 + $0x110] sm:$0xff]  ;;  %v5871_v42 = vld [vmem:[%s6861_s4 + $0x118] sm:$0xff]  ;;  %6938 = vst [vmem:[#allocation83_spill] sm:$0xff] %v5940_v40  ;;  %7002 = vst [vmem:[#allocation147_spill] sm:$0xff] %v6135_v24  ;;  %v6158_v24 = vmov 0.0  }
 0x432   : > { %6915 = vst [vmem:[#allocation60_spill] sm:$0xff] %v5868_v41  ;;  %6916 = vst [vmem:[#allocation61_spill] sm:$0xff] %v5871_v42  ;;  %v5952_v41 = vld [vmem:[%s6861_s4 + $0x1f0] sm:$0xff] }
 0x433   : > { %v5964_v42 = vld [vmem:[%s6861_s4 + $0x210] sm:$0xff] }
 0x434   : > { %6945 = vst [vmem:[#allocation90_spill] sm:$0xff] %v5964_v42  ;;  %v5985_v42 = vld [vmem:[%s6861_s4 + $0x248] sm:$0xff]  ;;  %v5988_v23 = vld [vmem:[%s6861_s4 + $0x250] sm:$0xff] }
 0x435   : > { %1495 = vperm.xlu0 %5220, %v1490_v63   ;;  %v5760_v63 = vld [vmem:[%s5531_s27 + $0x30] sm:$0xff]  ;;  %6952 = vst [vmem:[#allocation97_spill] sm:$0xff] %v5985_v42  ;;  %6953 = vst [vmem:[#allocation98_spill] sm:$0xff] %v5988_v23  ;;  %v6006_v42 = vld [vmem:[%s6861_s4 + $0x280] sm:$0xff] }
 0x436   : > { %6959 = vst [vmem:[#allocation104_spill] sm:$0xff] %v6006_v42  ;;  %v6009_v23 = vld [vmem:[%s6861_s4 + $0x288] sm:$0xff]  ;;  %v6027_v42 = vld [vmem:[%s6861_s4 + $0x2b8] sm:$0xff] }
 0x437   : > { %6960 = vst [vmem:[#allocation105_spill] sm:$0xff] %v6009_v23  ;;  %6966 = vst [vmem:[#allocation111_spill] sm:$0xff] %v6027_v42  ;;  %v6030_v23 = vld [vmem:[%s6861_s4 + $0x2c0] sm:$0xff]  ;;  %v6048_v42 = vld [vmem:[%s6861_s4 + $0x2f0] sm:$0xff] }
 0x438   : > { %6967 = vst [vmem:[#allocation112_spill] sm:$0xff] %v6030_v23  ;;  %6973 = vst [vmem:[#allocation118_spill] sm:$0xff] %v6048_v42  ;;  %v6051_v23 = vld [vmem:[%s6861_s4 + $0x2f8] sm:$0xff]  ;;  %v6069_v42 = vld [vmem:[%s6861_s4 + $0x328] sm:$0xff] }
 0x439   : > { %2158 = vperm.xlu0 %5220, %v2155_v43   ;;  %v5874_v43 = vld [vmem:[%s6861_s4 + $0x120] sm:$0xff]  ;;  %6974 = vst [vmem:[#allocation119_spill] sm:$0xff] %v6051_v23  ;;  %6980 = vst [vmem:[#allocation125_spill] sm:$0xff] %v6069_v42  ;;  %v6072_v23 = vld [vmem:[%s6861_s4 + $0x330] sm:$0xff] }
 0x43a   : > { %6917 = vst [vmem:[#allocation62_spill] sm:$0xff] %v5874_v43  ;;  %v5976_v43 = vld [vmem:[%s6861_s4 + $0x230] sm:$0xff]  ;;  %6981 = vst [vmem:[#allocation126_spill] sm:$0xff] %v6072_v23  ;;  %v6090_v42 = vld [vmem:[%s6861_s4 + $0x360] sm:$0xff] }
 0x43b   : > { %6949 = vst [vmem:[#allocation94_spill] sm:$0xff] %v5976_v43  ;;  %v5997_v43 = vld [vmem:[%s6861_s4 + $0x268] sm:$0xff]  ;;  %6987 = vst [vmem:[#allocation132_spill] sm:$0xff] %v6090_v42 }
 0x43c   : > { %6956 = vst [vmem:[#allocation101_spill] sm:$0xff] %v5997_v43  ;;  %v6018_v43 = vld [vmem:[%s6861_s4 + $0x2a0] sm:$0xff]  ;;  %v6093_v23 = vld [vmem:[%s6861_s4 + $0x368] sm:$0xff] }
 0x43d   : > { %6963 = vst [vmem:[#allocation108_spill] sm:$0xff] %v6018_v43  ;;  %v6039_v43 = vld [vmem:[%s6861_s4 + $0x2d8] sm:$0xff]  ;;  %6988 = vst [vmem:[#allocation133_spill] sm:$0xff] %v6093_v23  ;;  %v6117_v42 = vld [vmem:[%s6861_s4 + $0x3a8] sm:$0xff] }
 0x43e   : > { %6970 = vst [vmem:[#allocation115_spill] sm:$0xff] %v6039_v43  ;;  %v6060_v43 = vld [vmem:[%s6861_s4 + $0x310] sm:$0xff]  ;;  %6996 = vst [vmem:[#allocation141_spill] sm:$0xff] %v6117_v42  ;;  %v6147_v42 = vld [vmem:[%s6861_s4 + $0x3f8] sm:$0xff] }
 0x43f   : > { %6977 = vst [vmem:[#allocation122_spill] sm:$0xff] %v6060_v43  ;;  %v6081_v43 = vld [vmem:[%s6861_s4 + $0x348] sm:$0xff]  ;;  %v6120_v23 = vld [vmem:[%s6861_s4 + $0x3b0] sm:$0xff]  ;;  %7006 = vst [vmem:[#allocation151_spill] sm:$0xff] %v6147_v42 }
 0x440   : > { %6984 = vst [vmem:[#allocation129_spill] sm:$0xff] %v6081_v43  ;;  %v6102_v43 = vld [vmem:[%s6861_s4 + $0x380] sm:$0xff]  ;;  %6997 = vst [vmem:[#allocation142_spill] sm:$0xff] %v6120_v23 }
 0x441   : > { %6991 = vst [vmem:[#allocation136_spill] sm:$0xff] %v6102_v43  ;;  %v6132_v43 = vld [vmem:[%s6861_s4 + $0x3d0] sm:$0xff] }
 0x442   : > { %7001 = vst [vmem:[#allocation146_spill] sm:$0xff] %v6132_v43  ;;  %v6156_v43 = vmov 0.0  }
 0x4a2   : > { %v2133_v44 = vpop.permute.xlu0 %2132 }
 0x4a3   : > { %v2135_v45 = vmul.f32 %v2133_v44, %v5652_v29  ;;  %v2237_v29 = vld [vmem:[%s6878_s28] sm:$0xf]  ;;  %v5877_v44 = vld [vmem:[%s6861_s4 + $0x128] sm:$0xff] }
 0x4a4   : > { %6918 = vst [vmem:[#allocation63_spill] sm:$0xff] %v5877_v44 }
 0x4a6   : > { %v2139_v46 = vpop.permute.xlu0 %2138 }
 0x4a7   : > { %v2141_v47 = vadd.f32 %v2139_v46, %v2135_v45  ;;  %v5880_v45 = vld [vmem:[%s6861_s4 + $0x130] sm:$0xff]  ;;  %v5883_v46 = vld [vmem:[%s6861_s4 + $0x138] sm:$0xff] }
 0x4a8   : > { %v2145_v49 = vpop.permute.xlu1 %2144  ;;  %6919 = vst [vmem:[#allocation64_spill] sm:$0xff] %v5880_v45  ;;  %6920 = vst [vmem:[#allocation65_spill] sm:$0xff] %v5883_v46 }
 0x4a9   : > { %4970 = vmatpush3.msk.msra.mxu1 %vm939_vm1, %v2141_v47  ;;  %v2147_v50 = vmul.f32 %v2145_v49, %v5648_v25  ;;  %v5886_v47 = vld [vmem:[%s6861_s4 + $0x140] sm:$0xff]  ;;  %v5892_v49 = vld [vmem:[%s6861_s4 + $0x150] sm:$0xff] }
 0x4aa   : > { %4972 = vmatmul.mubr.msk.f32.vlgmr.msra.gmra.mxu1 %vm935_vm2, %v2154_v48  ;;  %6921 = vst [vmem:[#allocation66_spill] sm:$0xff] %v5886_v47  ;;  %v5889_v48 = vld [vmem:[%s6861_s4 + $0x148] sm:$0xff]  ;;  %6923 = vst [vmem:[#allocation68_spill] sm:$0xff] %v5892_v49 }
 0x4ab   : > { %6922 = vst [vmem:[#allocation67_spill] sm:$0xff] %v5889_v48 }
 0x4ac   : > { %v2151_v51 = vpop.permute.xlu0 %2150  ;;  %v1502_v55 = vpop.permute.xlu1 %1501 }
 0x4ad   : > { %v2153_v52 = vadd.f32 %v2151_v51, %v2147_v50  ;;  %v5895_v50 = vld [vmem:[%s6861_s4 + $0x158] sm:$0xff]  ;;  %v5898_v51 = vld [vmem:[%s6861_s4 + $0x160] sm:$0xff] }
 0x4ae   : > { %6924 = vst [vmem:[#allocation69_spill] sm:$0xff] %v5895_v50  ;;  %6925 = vst [vmem:[#allocation70_spill] sm:$0xff] %v5898_v51 }
 0x4af   : > { %4975 = vmatpush3.msk.msra.mxu0 %vm939_vm1, %v2153_v52  ;;  %v5901_v52 = vld [vmem:[%s6861_s4 + $0x168] sm:$0xff] }
 0x4b0   : > { %v1496_v53 = vpop.permute.xlu0 %1495  ;;  %4977 = vmatmul.mubr.msk.f32.vlgmr.msra.gmra.mxu0 %vm935_vm2, %v2237_v29  ;;  %6926 = vst [vmem:[#allocation71_spill] sm:$0xff] %v5901_v52  ;;  %v5904_v29 = vld [vmem:[%s6861_s4 + $0x170] sm:$0xff] }
 0x4b1   : > { %v1498_v54 = vmul.f32 %v1496_v53, %v5624_v11  ;;  %v5754_v11 = vld [vmem:[%s5531_s27 + $0x20] sm:$0xff]  ;;  %6927 = vst [vmem:[#allocation72_spill] sm:$0xff] %v5904_v29  ;;  %v5907_v53 = vld [vmem:[%s6861_s4 + $0x178] sm:$0xff] }
 0x4b2   : > { %6880 = vst [vmem:[#allocation25_spill] sm:$0xff] %v5754_v11 }
 0x4b3   : > { %v5738_v25 = vadd.f32 %v1502_v55, %v1498_v54  ;;  %v5910_v54 = vld [vmem:[%s6861_s4 + $0x180] sm:$0xff]  ;;  %v5913_v55 = vld [vmem:[%s6861_s4 + $0x188] sm:$0xff] }
 0x4b4   : > { %6928 = vst [vmem:[#allocation73_spill] sm:$0xff] %v5910_v54  ;;  %6929 = vst [vmem:[#allocation74_spill] sm:$0xff] %v5913_v55  ;;  %v5934_v54 = vld [vmem:[%s6861_s4 + $0x1c0] sm:$0xff]  ;;  %v2159_v23 = vpop.permute.xlu0 %2158 }
 0x4b5   : > { %6879 = vst [vmem:[#allocation24_spill] sm:$0xff] %v5738_v25  ;;  %v5922_v25 = vld [vmem:[%s6861_s4 + $0x1a0] sm:$0xff]  ;;  %6936 = vst [vmem:[#allocation81_spill] sm:$0xff] %v5934_v54 }
 0x4b6   : > { %6932 = vst [vmem:[#allocation77_spill] sm:$0xff] %v5922_v25  ;;  %v5946_v55 = vld [vmem:[%s6861_s4 + $0x1e0] sm:$0xff] }
 0x4b7   : > { %6940 = vst [vmem:[#allocation85_spill] sm:$0xff] %v5946_v55  ;;  %v6114_v25 = vld [vmem:[%s6861_s4 + $0x3a0] sm:$0xff] }
 0x4b8   : > { %6995 = vst [vmem:[#allocation140_spill] sm:$0xff] %v6114_v25  ;;  %v6144_v25 = vld [vmem:[%s6861_s4 + $0x3f0] sm:$0xff] }
 0x4b9   : > { %7005 = vst [vmem:[#allocation150_spill] sm:$0xff] %v6144_v25 }
 0x56a   : > { %v2233_v44 = vpop.f32.mrf.mxu1 }
 0x56b   : > { %v6149_v26 = vadd.f32 %v2233_v44, %v2159_v23 }
 0x56c   : > { %v4973_v0 = vpop.f32.mrf.mxu1 }
 0x56d   : > { %7007 = vst [vmem:[#allocation152_spill] sm:$0xff] %v6149_v26 }
 0x570   : > { %v6151_v7 = vpop.f32.mrf.mxu0 }
 0x571   : > { %7008 = vst [vmem:[#allocation153_spill] sm:$0xff] %v6151_v7 }
 0x572   : > { %v4978_v6 = vpop.f32.mrf.mxu0 }
 0x573 LB: >> { %v2458_v0 = vlaneseq  ;;  %2631 = vmatprep.subr.mxu1 %v5745_v58  ;;  %v6821_v6 = vmov 0.0   ;;  %vm5376_vm4 = vmmov 0   ;;  %s4546_s3 = sshll.u32 %s5336_s9, 3  ;;  %v5377_v2 = vmov 1.0   ;;  %s2455_s9 = sadd.s32 1, %s5336_s9   ;;  %s5336_s9 = sphi %s6160_s9, %s2455_s9   ;;  %v5332_v24 = vphi %v6158_v24, %v7011_v24   ;;  %v5328_v43 = vphi %v6156_v43, %v7010_v43  }
 0x574   : >> { %4979 = vmatprep.subr.mxu0 %v6821_v6  ;;  %5011 = vmatprep.mubr.msk.f32.mxu0 %vm5376_vm4, %v6821_v6  ;;  %v2478_v56 = vstv %s4546_s3  ;;  %v7009_v8 = vmov 0.0   ;;  %p2452_p11 = scmp.ge.s32.totalorder %s2455_s9, 16  }
 0x575   : >> { %v6174_v23 = vshrl.u32 %v2458_v0, 7  ;;  %v6176_v44 = vand.u32 127, %v2458_v0  ;;  %2632 = vmatpush1.msra.mxu1 %v5742_v57  ;;  %2665 = vmatprep.mubr.f32.mxu1 %v6821_v6  ;;  %s7013_s8 = sld [smem:[#allocation22_spill]] (%p2452_p11)  ;;  %s6367_s1 = smov (%p2452_p11), 0  }
 0x576   : >> { %2702 = vmatprep.subr.mxu1 %v5751_v61  ;;  %s7014_s6 = sld [smem:[#allocation20_spill]] (%p2452_p11) }
 0x577   : >> { %v6183_v5 = vadd.s32 120, %v6174_v23  ;;  %v6186_v25 = vadd.s32 %v2478_v56, %v6176_v44  ;;  %v6189_v42 = vadd.s32 112, %v6174_v23  ;;  %v6192_v0 = vadd.s32 104, %v6174_v23  ;;  %s7015_s23 = sld [smem:[#allocation21_spill]] (%p2452_p11) }
 0x578   : >> { %v6199_v6 = vadd.s32 96, %v6174_v23  ;;  %v6205_v56 = vadd.s32 88, %v6174_v23  ;;  %v6211_v45 = vadd.s32 80, %v6174_v23  ;;  %v6217_v27 = vadd.s32 72, %v6174_v23 }
 0x579   : >> { %vm2495_vm5 = vcmp.eq.s32.totalorder %v6183_v5, %v6186_v25  ;;  %vm2494_vm6 = vcmp.eq.s32.totalorder %v6189_v42, %v6186_v25  ;;  %vm2493_vm7 = vcmp.eq.s32.totalorder %v6192_v0, %v6186_v25  ;;  %v6223_v38 = vadd.s32 64, %v6174_v23 }
 0x57a   : >> { %4980 = vmatpush3.msk.msra.mxu0 %vm2495_vm5, %v5377_v2  ;;  %vm2492_vm8 = vcmp.eq.s32.totalorder %v6199_v6, %v6186_v25  ;;  %vm2491_vm9 = vcmp.eq.s32.totalorder %v6205_v56, %v6186_v25  ;;  %vm2490_vm10 = vcmp.eq.s32.totalorder %v6211_v45, %v6186_v25  ;;  %vm2489_vm11 = vcmp.eq.s32.totalorder %v6217_v27, %v6186_v25 }
 0x57b   : >> { %4981 = vmatprep.subr.mxu0 %v7009_v8  ;;  %v6229_v9 = vadd.s32 56, %v6174_v23  ;;  %vm2488_vm12 = vcmp.eq.s32.totalorder %v6223_v38, %v6186_v25  ;;  %v6235_v46 = vadd.s32 48, %v6174_v23  ;;  %v6241_v28 = vadd.s32 40, %v6174_v23 }
 0x57c   : >> { %4982 = vmatpush3.msk.msra.mxu0 %vm2494_vm6, %v5377_v2  ;;  %v6247_v19 = vadd.s32 32, %v6174_v23  ;;  %v6253_v10 = vadd.s32 24, %v6174_v23  ;;  %v6259_v47 = vadd.s32 16, %v6174_v23  ;;  %v6265_v30 = vadd.s32 8, %v6174_v23 }
 0x57d   : >> { %4983 = vmatprep.subr.mxu0 %v7009_v8  ;;  %vm2487_vm13 = vcmp.eq.s32.totalorder %v6229_v9, %v6186_v25  ;;  %vm2486_vm14 = vcmp.eq.s32.totalorder %v6235_v46, %v6186_v25  ;;  %vm2485_vm15 = vcmp.eq.s32.totalorder %v6241_v28, %v6186_v25 }
 0x57e   : >> { %4984 = vmatpush3.msk.msra.mxu0 %vm2493_vm7, %v5377_v2  ;;  %vm2484_vm4 = vcmp.eq.s32.totalorder %v6247_v19, %v6186_v25  ;;  %vm2483_vm5 = vcmp.eq.s32.totalorder %v6253_v10, %v6186_v25  ;;  %vm2482_vm6 = vcmp.eq.s32.totalorder %v6259_v47, %v6186_v25  ;;  %vm2481_vm7 = vcmp.eq.s32.totalorder %v6265_v30, %v6186_v25 }
 0x57f   : >> { %4985 = vmatprep.subr.mxu0 %v7009_v8 }
 0x580   : >> { %4986 = vmatpush3.msk.msra.mxu0 %vm2492_vm8, %v5377_v2  ;;  %vm2480_vm8 = vcmp.eq.s32.totalorder %v6174_v23, %v6186_v25 }
 0x581   : >> { %4987 = vmatprep.subr.mxu0 %v7009_v8 }
 0x582   : >> { %4988 = vmatpush3.msk.msra.mxu0 %vm2491_vm9, %v5377_v2 }
 0x583   : >> { %4989 = vmatprep.subr.mxu0 %v7009_v8 }
 0x584   : >> { %4990 = vmatpush3.msk.msra.mxu0 %vm2490_vm10, %v5377_v2 }
 0x585   : >> { %4991 = vmatprep.subr.mxu0 %v7009_v8 }
 0x586   : >> { %4992 = vmatpush3.msk.msra.mxu0 %vm2489_vm11, %v5377_v2 }
 0x587   : >> { %4993 = vmatprep.subr.mxu0 %v7009_v8 }
 0x588   : >> { %4994 = vmatpush3.msk.msra.mxu0 %vm2488_vm12, %v5377_v2 }
 0x589   : >> { %4995 = vmatprep.subr.mxu0 %v7009_v8 }
 0x58a   : >> { %4996 = vmatpush3.msk.msra.mxu0 %vm2487_vm13, %v5377_v2 }
 0x58b   : >> { %4997 = vmatprep.subr.mxu0 %v7009_v8 }
 0x58c   : >> { %4998 = vmatpush3.msk.msra.mxu0 %vm2486_vm14, %v5377_v2 }
 0x58d   : >> { %4999 = vmatprep.subr.mxu0 %v7009_v8 }
 0x58e   : >> { %5000 = vmatpush3.msk.msra.mxu0 %vm2485_vm15, %v5377_v2 }
 0x58f   : >> { %5001 = vmatprep.subr.mxu0 %v7009_v8 }
 0x590   : >> { %5002 = vmatpush3.msk.msra.mxu0 %vm2484_vm4, %v5377_v2 }
 0x591   : >> { %5003 = vmatprep.subr.mxu0 %v7009_v8 }
 0x592   : >> { %5004 = vmatpush3.msk.msra.mxu0 %vm2483_vm5, %v5377_v2 }
 0x593   : >> { %5005 = vmatprep.subr.mxu0 %v7009_v8 }
 0x594   : >> { %5006 = vmatpush3.msk.msra.mxu0 %vm2482_vm6, %v5377_v2 }
 0x595   : >> { %5007 = vmatprep.subr.mxu0 %v7009_v8 }
 0x596   : >> { %5008 = vmatpush3.msk.msra.mxu0 %vm2481_vm7, %v5377_v2 }
 0x597   : >> { %5009 = vmatprep.subr.mxu0 %v7009_v8 }
 0x598   : >> { %5010 = vmatpush3.msk.msra.mxu0 %vm2480_vm8, %v5377_v2 }
 0x599   : >> { %5012 = vmatmul.mubr.f32.vlgmr.msra.gmra.mxu0 %v6149_v26 }
 0x659   : >> { %v2594_v54 = vpop.f32.mrf.mxu0 }
 0x65a   : >> { %4579 = vmatmul.mubr.msk.f32.vlgmr.msra.gmra.mxu1 %vm6835_vm3, %v2594_v54 }
 0x65b   : >> { %2703 = vmatpush1.msra.mxu1 %v5748_v60  ;;  %v5013_v12 = vpop.f32.mrf.mxu0  ;;  %2736 = vmatprep.mubr.f32.mxu1 %v7009_v8 }
 0x65c   : >> { %2773 = vmatprep.subr.mxu1 %v5757_v62 }
 0x65e   : >> { %4580 = vmatmul.mubr.msk.f32.vlgmr.msra.gmra.mxu1 %vm6835_vm3, %v2594_v54 }
 0x65f   : >> { %2774 = vmatpush1.msra.mxu1 %v5754_v11  ;;  %2807 = vmatprep.mubr.f32.mxu1 %v7009_v8 }
 0x660   : >> { %2844 = vmatprep.subr.mxu1 %v5763_v1 }
 0x662   : >> { %4581 = vmatmul.mubr.msk.f32.vlgmr.msra.gmra.mxu1 %vm6835_vm3, %v2594_v54 }
 0x663   : >> { %2845 = vmatpush1.msra.mxu1 %v5760_v63  ;;  %2878 = vmatprep.mubr.f32.mxu1 %v7009_v8 }
 0x666   : >> { %4582 = vmatmul.mubr.msk.f32.vlgmr.msra.gmra.mxu1 %vm6835_vm3, %v2594_v54 }
 0x71a   : >> { %v2667_v25 = vpop.f32.mrf.mxu1 }
 0x71b   : >> { %v2668_v2 = vadd.f32 %v2667_v25, %v6151_v7 }
 0x71c   : >> { %v2669_v12 = vpop.f32.mrf.mxu1 }
 0x71d   : >> { %v2885_v48 = vmax.f32 %v2668_v2, 0.0  ;;  %v2670_v31 = vadd.f32 %v2669_v12, %v6151_v7 }
 0x71e   : >> { %v2738_v3 = vpop.f32.mrf.mxu1 }
 0x71f   : >> { %v2911_v13 = vmul.f32 %v2885_v48, %v2885_v48  ;;  %v2886_v49 = vmax.f32 %v2670_v31, 0.0  ;;  %v2739_v32 = vadd.f32 %v2738_v3, %v6151_v7  ;;  %v2893_v14 = vsel %vm939_vm1, %v2885_v48, 0.0 }
 0x720   : >> { %v2740_v40 = vpop.f32.mrf.mxu1 }
 0x721   : >> { %v2894_v50 = vsel %vm939_vm1, %v2886_v49, 0.0  ;;  %v2912_v8 = vmul.f32 %v2886_v49, %v2886_v49  ;;  %v2887_v33 = vmax.f32 %v2739_v32, 0.0  ;;  %v2919_v54 = vsel %vm939_vm1, %v2911_v13, 0.0 }
 0x722   : >> { %v2895_v21 = vadd.f32 %v2894_v50, %v2893_v14  ;;  %v2741_v25 = vadd.f32 %v2740_v40, %v6151_v7  ;;  %v2809_v2 = vpop.f32.mrf.mxu1 }
 0x723   : >> { %v2920_v12 = vsel %vm939_vm1, %v2912_v8, 0.0  ;;  %v2896_v15 = vsel %vm939_vm1, %v2887_v33, 0.0  ;;  %v2913_v31 = vmul.f32 %v2887_v33, %v2887_v33  ;;  %v2810_v3 = vadd.f32 %v2809_v2, %v6151_v7 }
 0x724   : >> { %v2921_v51 = vadd.f32 %v2920_v12, %v2919_v54  ;;  %v2897_v34 = vadd.f32 %v2896_v15, %v2895_v21  ;;  %v2888_v48 = vmax.f32 %v2741_v25, 0.0  ;;  %v2811_v55 = vpop.f32.mrf.mxu1 }
 0x725   : >> { %v2922_v49 = vsel %vm939_vm1, %v2913_v31, 0.0  ;;  %v2889_v32 = vmax.f32 %v2810_v3, 0.0  ;;  %v2812_v13 = vadd.f32 %v2811_v55, %v6151_v7 }
 0x726   : >> { %v2923_v14 = vadd.f32 %v2922_v49, %v2921_v51  ;;  %v2898_v40 = vsel %vm939_vm1, %v2888_v48, 0.0  ;;  %v2914_v50 = vmul.f32 %v2888_v48, %v2888_v48  ;;  %v2880_v16 = vpop.f32.mrf.mxu1 }
 0x727   : >> { %v2899_v8 = vadd.f32 %v2898_v40, %v2897_v34  ;;  %v2900_v52 = vsel %vm939_vm1, %v2889_v32, 0.0  ;;  %v2915_v33 = vmul.f32 %v2889_v32, %v2889_v32  ;;  %v2890_v35 = vmax.f32 %v2812_v13, 0.0 }
 0x728   : >> { %v2924_v54 = vsel %vm939_vm1, %v2914_v50, 0.0  ;;  %v2881_v15 = vadd.f32 %v2880_v16, %v6151_v7  ;;  %v2882_v21 = vpop.f32.mrf.mxu1 }
 0x729   : >> { %v2925_v25 = vadd.f32 %v2924_v54, %v2923_v14  ;;  %v2901_v2 = vadd.f32 %v2900_v52, %v2899_v8  ;;  %v2926_v12 = vsel %vm939_vm1, %v2915_v33, 0.0  ;;  %v2902_v51 = vsel %vm939_vm1, %v2890_v35, 0.0 }
 0x72a   : >> { %v2916_v55 = vmul.f32 %v2890_v35, %v2890_v35  ;;  %v2891_v31 = vmax.f32 %v2881_v15, 0.0  ;;  %v2883_v3 = vadd.f32 %v2882_v21, %v6151_v7 }
 0x72b   : >> { %v2927_v34 = vadd.f32 %v2926_v12, %v2925_v25  ;;  %v2903_v48 = vadd.f32 %v2902_v51, %v2901_v2  ;;  %v7012_v51 = vmov (%p2452_p11), 0.0  }
 0x72c   : >> { %v2928_v49 = vsel %vm939_vm1, %v2916_v55, 0.0  ;;  %v2917_v32 = vmul.f32 %v2891_v31, %v2891_v31  ;;  %v2892_v13 = vmax.f32 %v2883_v3, 0.0  ;;  %v2904_v40 = vsel %vm939_vm1, %v2891_v31, 0.0  ;;  %5014 = vmatprep.subr.mxu0 (%p2452_p11), %v7012_v51  ;;  %5019 = vmatprep.subr.mxu1 (%p2452_p11), %v7012_v51  ;;  %3244 = vst [vmem:[%s6154_s5] sm:$0xf] (%p2452_p11), %v7012_v51 }
 0x72d   : >> { %v2929_v16 = vadd.f32 %v2928_v49, %v2927_v34  ;;  %v2905_v50 = vadd.f32 %v2904_v40, %v2903_v48  ;;  %5016 = vmatprep.mubr.msk.f32.mxu0 (%p2452_p11), %vm5373_vm0, %v7012_v51  ;;  %5021 = vmatprep.mubr.msk.f32.mxu1 (%p2452_p11), %vm5373_vm0, %v7012_v51 }
 0x72e   : >> { %v2930_v52 = vsel %vm939_vm1, %v2917_v32, 0.0  ;;  %v2918_v14 = vmul.f32 %v2892_v13, %v2892_v13  ;;  %v2906_v8 = vsel %vm939_vm1, %v2892_v13, 0.0  ;;  %v3241_v13 = vld [vmem:[%s7013_s8] sm:$0xf] (%p2452_p11) }
 0x72f   : >> { %v2907_v33 = vadd.f32 %v2906_v8, %v2905_v50  ;;  %v2931_v35 = vadd.f32 %v2930_v52, %v2929_v16  ;;  %v6350_v40 = vpack.c.bf16 (%p2452_p11), %v3241_v13, %v3241_v13  ;;  %v6353_v16 = vld [vmem:[%s5526_s20] sm:$0xf] (%p2452_p11) }
 0x730   : >> { %v2932_v54 = vsel %vm939_vm1, %v2918_v14, 0.0  ;;  %7016 = vst [vmem:[#allocation154_spill] sm:$0xff] (%p2452_p11), %v6353_v16  ;;  %v3089_v14 = vld [vmem:[%s7014_s6] sm:$0xf] (%p2452_p11) }
 0x731   : >> { %2908 = vadd.xlane.f32.xlu0 %v2907_v33  ;;  %v2933_v15 = vadd.f32 %v2932_v54, %v2931_v35 }
 0x735   : >> { %2934 = vadd.xlane.f32.xlu0 %v2933_v15  ;;  %v6360_v15 = vld [vmem:[%s7015_s23] sm:$0xf] (%p2452_p11) }
 0x736   : > { %7017 = vst [vmem:[#allocation155_spill] sm:$0xff] (%p2452_p11), %v6360_v15 }
 0x7ba   : >> { %v2909_v21 = vpop.xlane.xlu0 %2908 }
 0x7bb   : >> { %v2910_v25 = vadd.f32 %v5332_v24, %v2909_v21  }
 0x7bd   : >> { %v7011_v24 = vmov %v2910_v25  ;;  %2454 = sbr.rel (!%p2452_p11) target bundleno = 1395 (0x573), region = 219  ;;  %5015 = vmatpush3.msk.msra.mxu0 (%p2452_p11), %vm939_vm1, %v2910_v25 }
 0x7be   : >> { %v2935_v2 = vpop.xlane.xlu0 %2934  ;;  %5017 = vmatmul.mubr.msk.f32.vlgmr.msra.gmra.mxu0 (%p2452_p11), %vm935_vm2, %v5634_v20  ;;  %5024 = vmatprep.subr.mxu0 (%p2452_p11), %v7012_v51 }
 0x7bf   : >> { %v2936_v12 = vadd.f32 %v5328_v43, %v2935_v2   ;;  %5026 = vmatprep.mubr.msk.f32.mxu0 (%p2452_p11), %vm5373_vm0, %v7012_v51 }
 0x7c1   : >> { %v7010_v43 = vmov %v2936_v12  ;;  %5020 = vmatpush3.msk.msra.mxu1 (%p2452_p11), %vm939_vm1, %v2936_v12 }
 0x7c2   : > { %5022 = vmatmul.mubr.msk.f32.vlgmr.msra.gmra.mxu1 %vm935_vm2, %v5634_v20  ;;  %5029 = vmatprep.subr.mxu1 %v7012_v51 }
 0x7c3   : > { %5031 = vmatprep.mubr.msk.f32.mxu1 %vm5373_vm0, %v7012_v51 }
 0x87e   : > { %v3006_v24 = vpop.f32.mrf.mxu0 }
 0x87f   : > { %v3083_v55 = vmul.f32 6.1035156e-05, %v3006_v24 }
 0x880   : > { %v5018_v3 = vpop.f32.mrf.mxu0 }
 0x881   : > { %v3085_v20 = vmul.f32 %v3083_v55, %v3083_v55  ;;  %5025 = vmatpush3.msk.msra.mxu0 %vm939_vm1, %v3083_v55 }
 0x882   : > { %v3079_v43 = vpop.f32.mrf.mxu1  ;;  %5027 = vmatmul.mubr.msk.f32.vlgmr.msra.gmra.mxu0 %vm935_vm2, %v5663_v39 }
 0x883   : > { %v3084_v31 = vmul.f32 6.1035156e-05, %v3079_v43 }
 0x884   : > { %v5023_v34 = vpop.f32.mrf.mxu1 }
 0x885   : > { %v3086_v48 = vsub.f32 %v3084_v31, %v3085_v20 }
 0x887   : > { %v3087_v49 = vadd.f32 1e-05, %v3086_v48 }
 0x889   : > { %5226 = vrsqrt.f32 %v3087_v49 }
 0x896   : > { %v5227_v32 = vpop.eup %5226 }
 0x897   : > { %5030 = vmatpush3.msk.msra.mxu1 %vm939_vm1, %v5227_v32 }
 0x898   : > { %5032 = vmatmul.mubr.msk.f32.vlgmr.msra.gmra.mxu1 %vm935_vm2, %v5663_v39 }
 0x942   : > { %v3160_v50 = vpop.f32.mrf.mxu0 }
 0x944   : > { %v5028_v52 = vpop.f32.mrf.mxu0 }
 0x958   : > { %v3233_v8 = vpop.f32.mrf.mxu1 }
 0x959   : > { %v3237_v33 = vmul.f32 %v3233_v8, %v3089_v14 }
 0x95a   : > { %v5033_v35 = vpop.f32.mrf.mxu1 }
 0x95b   : > { %v6357_v54 = vadd.f32 %v3237_v33, %v5701_v59 }
 0x95d   : > { %v6363_v21 = vmul.f32 %v6357_v54, %v3160_v50 }
 0x95f   : > { %7018 = vst [vmem:[#allocation156_spill] sm:$0xff] %v6363_v21 }
 0x960 LB: >> { %v7019_v7 = vld [vmem:[#allocation153_spill] sm:$0xff]  ;;  %3495 = vmatprep.subr.mxu1 %v5751_v61  ;;  %v6829_v59 = vmov 0.0   ;;  %vm5379_vm0 = vmmov 0   ;;  %s4591_s11 = sshll.u32 %s5340_s1, 3  ;;  %v6827_v12 = vmov 1.0   ;;  %v7020_v26 = vld [vmem:[#allocation152_spill] sm:$0xff]  ;;  %s5340_s1 = sphi %s6367_s1, %s3250_s1  }
 0x961   : >> { %5034 = vmatprep.subr.mxu0 %v6829_v59  ;;  %5066 = vmatprep.mubr.msk.f32.mxu0 %vm5379_vm0, %v6829_v59  ;;  %v6379_v25 = vstv %s4591_s11  ;;  %v6831_v51 = vmov 0   ;;  %v7021_v16 = vld [vmem:[#allocation154_spill] sm:$0xff]  ;;  %v7022_v15 = vld [vmem:[#allocation155_spill] sm:$0xff]  ;;  %vm7025_vm3 = vcmask 64512   ;;  %v7026_v11 = vld [vmem:[#allocation25_spill] sm:$0xff]  ;;  %s3250_s1 = sadd.s32 1, %s5340_s1  }
 0x962   : >> { %3496 = vmatpush1.msra.mxu1 %v5748_v60  ;;  %3529 = vmatprep.mubr.f32.mxu1 %v6829_v59  ;;  %v6384_v2 = vadd.s32 %v6379_v25, %v6176_v44  ;;  %v7027_v1 = vld [vmem:[#allocation26_spill] sm:$0xff]  ;;  %v7029_v22 = vld [vmem:[#allocation87_spill] sm:$0xff]  ;;  %v7031_v36 = vld [vmem:[#allocation57_spill] sm:$0xff]  ;;  %p3247_p12 = scmp.ge.s32.totalorder %s3250_s1, 16  }
 0x963   : >> { %3566 = vmatprep.subr.mxu1 %v5757_v62  ;;  %5228 = vset.pattern.permute.xlu0 %v6831_v51  ;;  %v7030_v18 = vld [vmem:[#allocation42_spill] sm:$0xff]  ;;  %v7032_v29 = vld [vmem:[#allocation72_spill] sm:$0xff]  ;;  %v7033_v17 = vld [vmem:[#allocation41_spill] sm:$0xff]  ;;  %s4656_s28 = sshll.u32 (%p3247_p12), %s5564_s0, 6  ;;  %s4405_s3 = sshll.u32 (%p3247_p12), %s6154_s5, 4  ;;  %s4406_s3 = int_to_ptr.vmem [resolvable:$true] %s4405_s3 }
 0x964   : >> { %vm3288_vm9 = vcmp.eq.s32.totalorder %v6183_v5, %v6384_v2  ;;  %vm3287_vm10 = vcmp.eq.s32.totalorder %v6189_v42, %v6384_v2  ;;  %vm3286_vm11 = vcmp.eq.s32.totalorder %v6192_v0, %v6384_v2  ;;  %vm3285_vm12 = vcmp.eq.s32.totalorder %v6199_v6, %v6384_v2  ;;  %5229 = vset.pattern.permute.xlu1 %v6831_v51  ;;  %v7034_v4 = vld [vmem:[#allocation86_spill] sm:$0xff]  ;;  %s4403_s9 = scalar_lea.hbm (%p3247_p12), %s5541_s19, %s4656_s28  ;;  %s7163_s8 = sand.u32 (%p3247_p12), 1, %s5316_s16  }
 0x965   : >> { %5035 = vmatpush3.msk.msra.mxu0 %vm3288_vm9, %v6827_v12  ;;  %vm3284_vm13 = vcmp.eq.s32.totalorder %v6205_v56, %v6384_v2  ;;  %vm3283_vm14 = vcmp.eq.s32.totalorder %v6211_v45, %v6384_v2  ;;  %vm3282_vm15 = vcmp.eq.s32.totalorder %v6217_v27, %v6384_v2  ;;  %vm3281_vm4 = vcmp.eq.s32.totalorder %v6223_v38, %v6384_v2  ;;  %s4392_s6 = scalar_lea.sflag (%p3247_p12), [#allocation3], %s7163_s8  ;;  %s5248_s23 = scalar_lea.vmem (%p3247_p12), %s4406_s3, 64 }
 0x966   : >> { %5036 = vmatprep.subr.mxu0 %v6829_v59  ;;  %vm6823_vm5 = vcmp.eq.s32.totalorder %v6229_v9, %v6384_v2  ;;  %vm6824_vm6 = vcmp.eq.s32.totalorder %v6235_v46, %v6384_v2  ;;  %vm6825_vm7 = vcmp.eq.s32.totalorder %v6241_v28, %v6384_v2  ;;  %vm6826_vm8 = vcmp.eq.s32.totalorder %v6247_v19, %v6384_v2  ;;  %v7023_v21 = vld [vmem:[#allocation156_spill] sm:$0xff]  ;;  %p5249_p13 = scmp.ne.s32.totalorder (%p3247_p12), %s4406_s3, %s5248_s23  ;;  %s5382_s11 = smov (%p3247_p12), [#allocation2]  }
 0x967   : >> { %5037 = vmatpush3.msk.msra.mxu0 %vm3287_vm10, %v6827_v12  ;;  %3688 = vperm.xlu0 %5228, %v6357_v54   ;;  %v7024_v39 = vsub.f32 %v7022_v15, %v7023_v21  ;;  %s5252_s4 = sshll.u32 (%p3247_p12), %s5382_s11, 4  ;;  %s5253_s4 = int_to_ptr.vmem [resolvable:$false] %s5252_s4 }
 0x968   : >> { %5038 = vmatprep.subr.mxu0 %v6829_v59  ;;  %3722 = vperm.xlu1 %5229, %v7021_v16   ;;  %p5250_p0 = pnand (%p3247_p12), %p5249_p13, %p5581_p5  ;;  %s5254_s1 = scalar_lea.vmem (%p3247_p12), %s5253_s4, 128 }
 0x969   : >> { %5039 = vmatpush3.msk.msra.mxu0 %vm3286_vm11, %v6827_v12  ;;  %p5255_p2 = scmp.lt.s32.totalorder (%p3247_p12), %s4406_s3, %s5253_s4  ;;  %p5256_p3 = scmp.lt.s32.totalorder (%p3247_p12), %s5254_s1, %s5248_s23 }
 0x96a   : >> { %5040 = vmatprep.subr.mxu0 %v6829_v59  ;;  %p5251_p1 = pneg (%p3247_p12), %p5250_p0 }
 0x96b   : >> { %5041 = vmatpush3.msk.msra.mxu0 %vm3285_vm12, %v6827_v12  ;;  %3701 = vperm.xlu0 %5228, %v7024_v39   ;;  %p5257_p4 = por (%p3247_p12), %p5256_p3, %p5255_p2 }
 0x96c   : >> { %5042 = vmatprep.subr.mxu0 %v6829_v59 }
 0x96d   : >> { %5043 = vmatpush3.msk.msra.mxu0 %vm3284_vm13, %v6827_v12  ;;  %p5258_p7 = pnand (%p3247_p12), %p5257_p4, %p5251_p1 }
 0x96e   : >> { %5044 = vmatprep.subr.mxu0 %v6829_v59 }
 0x96f   : >> { %5045 = vmatpush3.msk.msra.mxu0 %vm3283_vm14, %v6827_v12 }
 0x970   : >> { %5046 = vmatprep.subr.mxu0 %v6829_v59 }
 0x971   : >> { %5047 = vmatpush3.msk.msra.mxu0 %vm3282_vm15, %v6827_v12 }
 0x972   : >> { %5048 = vmatprep.subr.mxu0 %v6829_v59 }
 0x973   : >> { %5049 = vmatpush3.msk.msra.mxu0 %vm3281_vm4, %v6827_v12 }
 0x974   : >> { %5050 = vmatprep.subr.mxu0 %v6829_v59 }
 0x975   : >> { %5051 = vmatpush3.msk.msra.mxu0 %vm6823_vm5, %v6827_v12  ;;  %vm3276_vm5 = vcmp.eq.s32.totalorder %v6253_v10, %v6384_v2 }
 0x976   : >> { %5052 = vmatprep.subr.mxu0 %v6829_v59 }
 0x977   : >> { %5053 = vmatpush3.msk.msra.mxu0 %vm6824_vm6, %v6827_v12  ;;  %vm3275_vm6 = vcmp.eq.s32.totalorder %v6259_v47, %v6384_v2 }
 0x978   : >> { %5054 = vmatprep.subr.mxu0 %v6829_v59 }
 0x979   : >> { %5055 = vmatpush3.msk.msra.mxu0 %vm6825_vm7, %v6827_v12  ;;  %vm3274_vm7 = vcmp.eq.s32.totalorder %v6265_v30, %v6384_v2 }
 0x97a   : >> { %5056 = vmatprep.subr.mxu0 %v6829_v59 }
 0x97b   : >> { %5057 = vmatpush3.msk.msra.mxu0 %vm6826_vm8, %v6827_v12  ;;  %vm3273_vm8 = vcmp.eq.s32.totalorder %v6174_v23, %v6384_v2 }
 0x97c   : >> { %5058 = vmatprep.subr.mxu0 %v6829_v59 }
 0x97d   : >> { %5059 = vmatpush3.msk.msra.mxu0 %vm3276_vm5, %v6827_v12 }
 0x97e   : >> { %5060 = vmatprep.subr.mxu0 %v6829_v59 }
 0x97f   : >> { %5061 = vmatpush3.msk.msra.mxu0 %vm3275_vm6, %v6827_v12 }
 0x980   : >> { %5062 = vmatprep.subr.mxu0 %v6829_v59 }
 0x981   : >> { %5063 = vmatpush3.msk.msra.mxu0 %vm3274_vm7, %v6827_v12 }
 0x982   : >> { %5064 = vmatprep.subr.mxu0 %v6829_v59 }
 0x983   : >> { %5065 = vmatpush3.msk.msra.mxu0 %vm3273_vm8, %v6827_v12 }
 0x984   : >> { %5067 = vmatmul.mubr.f32.vlgmr.msra.gmra.mxu0 %v7020_v26  ;;  %3424 = vmatprep.subr.mxu0 %v5745_v58 }
 0x985   : >> { %3425 = vmatpush1.msra.mxu0 %v5742_v57  ;;  %3458 = vmatprep.mubr.f32.mxu0 %v6829_v59 }
 0x9e2   : >> { %v3689_v20 = vpop.permute.xlu0 %3688 }
 0xa44   : >> { %v3387_v24 = vpop.f32.mrf.mxu0 }
 0xa45   : >> { %4624 = vmatmul.mubr.msk.f32.vlgmr.msra.gmra.mxu0 %vm7025_vm3, %v3387_v24  ;;  %4625 = vmatmul.mubr.msk.f32.vlgmr.msra.gmra.mxu1 %vm7025_vm3, %v3387_v24 }
 0xa46   : >> { %v5068_v43 = vpop.f32.mrf.mxu0  ;;  %3567 = vmatpush1.msra.mxu1 %v7026_v11  ;;  %3600 = vmatprep.mubr.f32.mxu1 %v6829_v59 }
 0xa47   : >> { %3637 = vmatprep.subr.mxu1 %v7027_v1  ;;  %3785 = vmatprep.mubr.bf16.mxu0 %v6831_v51 }
 0xa49   : >> { %4626 = vmatmul.mubr.msk.f32.vlgmr.msra.gmra.mxu1 %vm7025_vm3, %v3387_v24 }
 0xa4a   : >> { %3638 = vmatpush1.msra.mxu1 %v5760_v63  ;;  %3671 = vmatprep.mubr.f32.mxu1 %v6829_v59  ;;  %v3702_v59 = vpop.permute.xlu0 %3701 }
 0xa4d   : >> { %4627 = vmatmul.mubr.msk.f32.vlgmr.msra.gmra.mxu1 %vm7025_vm3, %v3387_v24  ;;  %vm3728_vm3 = vcmask 1041408  }
 0xa4e   : >> { %3826 = vmatprep.mubr.bf16.mxu1 %v6831_v51 }
 0xb05   : >> { %v3460_v55 = vpop.f32.mrf.mxu0  ;;  %v3531_v31 = vpop.f32.mrf.mxu1 }
 0xb06   : >> { %v3461_v3 = vadd.f32 %v3460_v55, %v7019_v7  ;;  %v3532_v34 = vadd.f32 %v3531_v31, %v7019_v7 }
 0xb07   : >> { %v3462_v48 = vpop.f32.mrf.mxu0  ;;  %v3533_v49 = vpop.f32.mrf.mxu1 }
 0xb08   : >> { %v3678_v32 = vmax.f32 %v3461_v3, 0.0  ;;  %v3680_v13 = vmax.f32 %v3532_v34, 0.0  ;;  %v3463_v50 = vadd.f32 %v3462_v48, %v7019_v7  ;;  %v3534_v52 = vadd.f32 %v3533_v49, %v7019_v7 }
 0xb09   : >> { %v3602_v14 = vpop.f32.mrf.mxu1 }
 0xb0a   : >> { %v3679_v8 = vmax.f32 %v3463_v50, 0.0  ;;  %v3681_v33 = vmax.f32 %v3534_v52, 0.0  ;;  %v3603_v35 = vadd.f32 %v3602_v14, %v7019_v7  ;;  %v3691_v24 = vmul.f32 %v3689_v20, %v3678_v32 }
 0xb0b   : >> { %v3604_v43 = vpop.f32.mrf.mxu1  ;;  %v3693_v39 = vmul.f32 %v3689_v20, %v3680_v13 }
 0xb0c   : >> { %v3692_v55 = vmul.f32 %v3689_v20, %v3679_v8  ;;  %v3694_v12 = vmul.f32 %v3689_v20, %v3681_v33  ;;  %v3682_v31 = vmax.f32 %v3603_v35, 0.0  ;;  %v3605_v51 = vadd.f32 %v3604_v43, %v7019_v7 }
 0xb0d   : >> { %v3673_v3 = vpop.f32.mrf.mxu1  ;;  %v3704_v34 = vadd.f32 %v3702_v59, %v3691_v24  ;;  %v3706_v1 = vadd.f32 %v3702_v59, %v3693_v39 }
 0xb0e   : >> { %v3695_v48 = vmul.f32 %v3689_v20, %v3682_v31  ;;  %v3683_v11 = vmax.f32 %v3605_v51, 0.0  ;;  %v3674_v49 = vadd.f32 %v3673_v3, %v7019_v7  ;;  %v3705_v50 = vadd.f32 %v3702_v59, %v3692_v55 }
 0xb0f   : >> { %v3675_v52 = vpop.f32.mrf.mxu1  ;;  %v3707_v14 = vadd.f32 %v3702_v59, %v3694_v12  ;;  %v3712_v32 = vpack.c.bf16 %v3704_v34, %v3704_v34  ;;  %v3714_v15 = vpack.c.bf16 %v3706_v1, %v3706_v1 }
 0xb10   : >> { %v3696_v13 = vmul.f32 %v3689_v20, %v3683_v11  ;;  %v3684_v8 = vmax.f32 %v3674_v49, 0.0  ;;  %v3676_v33 = vadd.f32 %v3675_v52, %v7019_v7  ;;  %v3713_v35 = vpack.c.bf16 %v3705_v50, %v3705_v50  ;;  %v7037_v49 = vld [vmem:[#allocation40_spill] sm:$0xff]  ;;  %v7038_v50 = vld [vmem:[#allocation85_spill] sm:$0xff]  ;;  %v7039_v52 = vld [vmem:[#allocation55_spill] sm:$0xff] }
 0xb11   : >> { %v3715_v16 = vpack.c.bf16 %v3707_v14, %v3707_v14  ;;  %v3708_v43 = vadd.f32 %v3702_v59, %v3695_v48  ;;  %v3730_v51 = vsel %vm3728_vm3, %v3712_v32, 0  ;;  %v3736_v12 = vsel %vm3728_vm3, %v3714_v15, 0  ;;  %v7040_v14 = vld [vmem:[#allocation70_spill] sm:$0xff]  ;;  %v7041_v32 = vld [vmem:[#allocation39_spill] sm:$0xff] }
 0xb12   : >> { %v3709_v21 = vadd.f32 %v3702_v59, %v3696_v13  ;;  %v3697_v24 = vmul.f32 %v3689_v20, %v3684_v8  ;;  %v3685_v39 = vmax.f32 %v3676_v33, 0.0  ;;  %4628 = vmatprep.subr.msk.bf16.mxu0 %vm3728_vm3, %v3713_v35  ;;  %v7028_v48 = vmov 0   ;;  %v7042_v13 = vld [vmem:[#allocation84_spill] sm:$0xff]  ;;  %v7043_v8 = vld [vmem:[#allocation54_spill] sm:$0xff]  ;;  %v7044_v33 = vld [vmem:[#allocation69_spill] sm:$0xff] }
 0xb13   : >> { %4630 = vmatprep.subr.msk.bf16.mxu1 %vm3728_vm3, %v3715_v16  ;;  %3768 = vmatpush1.bf16.msra.mxu0 %v3730_v51  ;;  %v3716_v1 = vpack.c.bf16 %v3708_v43, %v3708_v43  ;;  %v7045_v35 = vld [vmem:[#allocation38_spill] sm:$0xff]  ;;  %v7046_v43 = vld [vmem:[#allocation83_spill] sm:$0xff]  ;;  %v7049_v51 = vld [vmem:[#allocation37_spill] sm:$0xff] }
 0xb14   : >> { %v3717_v11 = vpack.c.bf16 %v3709_v21, %v3709_v21  ;;  %v3710_v55 = vadd.f32 %v3702_v59, %v3697_v24  ;;  %v3698_v31 = vmul.f32 %v3689_v20, %v3685_v39  ;;  %3809 = vmatpush1.bf16.msra.mxu1 %v3736_v12  ;;  %v7036_v20 = vld [vmem:[#allocation71_spill] sm:$0xff]  ;;  %v7047_v24 = vld [vmem:[#allocation53_spill] sm:$0xff]  ;;  %v7048_v39 = vld [vmem:[#allocation68_spill] sm:$0xff] }
 0xb15   : >> { %v3742_v16 = vsel %vm3728_vm3, %v3716_v1, 0  ;;  %v7050_v12 = vld [vmem:[#allocation82_spill] sm:$0xff]  ;;  %v7051_v1 = vld [vmem:[#allocation52_spill] sm:$0xff] }
 0xb16   : >> { %v3711_v3 = vadd.f32 %v3702_v59, %v3698_v31  ;;  %4629 = vmatmul.mubr.msk.bf16.vlgmr.msra.gmra.mxu0 %vm935_vm2, %v6350_v40  ;;  %4632 = vmatprep.subr.msk.bf16.mxu1 %vm3728_vm3, %v3717_v11  ;;  %v3718_v34 = vpack.c.bf16 %v3710_v55, %v3710_v55  ;;  %v7035_v59 = vld [vmem:[#allocation56_spill] sm:$0xff]  ;;  %v7052_v11 = vld [vmem:[#allocation67_spill] sm:$0xff]  ;;  %v7054_v31 = vld [vmem:[#allocation81_spill] sm:$0xff] }
 0xb17   : >> { %4631 = vmatmul.mubr.msk.bf16.vlgmr.msra.gmra.mxu1 %vm935_vm2, %v6350_v40  ;;  %3908 = vmatprep.mubr.bf16.mxu0 %v7028_v48  ;;  %v7053_v55 = vld [vmem:[#allocation36_spill] sm:$0xff] }
 0xb18   : >> { %v3719_v15 = vpack.c.bf16 %v3711_v3, %v3711_v3  ;;  %3850 = vmatpush1.bf16.msra.mxu1 %v3742_v16  ;;  %3867 = vmatprep.mubr.bf16.mxu1 %v7028_v48  ;;  %v3748_v21 = vsel %vm3728_vm3, %v3718_v34, 0  ;;  %v7055_v3 = vld [vmem:[#allocation51_spill] sm:$0xff]  ;;  %v7056_v34 = vld [vmem:[#allocation66_spill] sm:$0xff]  ;;  %v7058_v48 = vld [vmem:[#allocation80_spill] sm:$0xff] }
 0xb19   : >> { %4735 = vmatprep.subr.mxu1 %v5859_v37  ;;  %v7057_v16 = vld [vmem:[#allocation35_spill] sm:$0xff] }
 0xb1a   : >> { %4634 = vmatprep.subr.msk.bf16.mxu0 %vm3728_vm3, %v3719_v15  ;;  %v7059_v15 = vld [vmem:[#allocation50_spill] sm:$0xff]  ;;  %vm7156_vm3 = vcmp.eq.s32.totalorder %v6229_v9, %v6384_v2 }
 0xb1b   : >> { %3891 = vmatpush1.bf16.msra.mxu0 %v3748_v21  ;;  %v7060_v21 = vld [vmem:[#allocation65_spill] sm:$0xff] }
 0xb1c   : >> { %4770 = vmatprep.subr.mxu0 %v7029_v22 }
 0xb1e   : >> { %4635 = vmatmul.mubr.msk.bf16.vlgmr.msra.gmra.mxu0 %vm935_vm2, %v6350_v40 }
 0xb1f   : >> { %4633 = vmatmul.mubr.msk.bf16.vlgmr.msra.gmra.mxu1 %vm935_vm2, %v6350_v40  ;;  %4771 = vmatpush3.msra.mxu0 %v5907_v53 }
 0xb20   : >> { %4736 = vmatpush3.msra.mxu1 %v7030_v18  ;;  %4772 = vmatprep.subr.mxu0 %v5952_v41 }
 0xb21   : >> { %4737 = vmatprep.subr.mxu1 %v7031_v36  ;;  %4773 = vmatpush3.msra.mxu0 %v7032_v29 }
 0xb22   : >> { %4738 = vmatpush3.msra.mxu1 %v7033_v17  ;;  %4774 = vmatprep.subr.mxu0 %v7034_v4 }
 0xb23   : >> { %4739 = vmatprep.subr.mxu1 %v7035_v59  ;;  %4775 = vmatpush3.msra.mxu0 %v7036_v20  ;;  %v7061_v59 = vld [vmem:[#allocation34_spill] sm:$0xff]  ;;  %v7062_v20 = vld [vmem:[#allocation79_spill] sm:$0xff] }
 0xb24   : >> { %4740 = vmatpush3.msra.mxu1 %v7037_v49  ;;  %4776 = vmatprep.subr.mxu0 %v7038_v50  ;;  %v7063_v49 = vld [vmem:[#allocation49_spill] sm:$0xff]  ;;  %v7064_v50 = vld [vmem:[#allocation64_spill] sm:$0xff] }
 0xb25   : >> { %4741 = vmatprep.subr.mxu1 %v7039_v52  ;;  %4777 = vmatpush3.msra.mxu0 %v7040_v14  ;;  %v7065_v52 = vld [vmem:[#allocation33_spill] sm:$0xff]  ;;  %v7066_v14 = vld [vmem:[#allocation78_spill] sm:$0xff] }
 0xb26   : >> { %4742 = vmatpush3.msra.mxu1 %v7041_v32  ;;  %4778 = vmatprep.subr.mxu0 %v7042_v13  ;;  %v7067_v32 = vld [vmem:[#allocation48_spill] sm:$0xff]  ;;  %v7068_v13 = vld [vmem:[#allocation63_spill] sm:$0xff] }
 0xb27   : >> { %4743 = vmatprep.subr.mxu1 %v7043_v8  ;;  %4779 = vmatpush3.msra.mxu0 %v7044_v33  ;;  %v7069_v8 = vld [vmem:[#allocation32_spill] sm:$0xff]  ;;  %v7070_v33 = vld [vmem:[#allocation77_spill] sm:$0xff] }
 0xb28   : >> { %4744 = vmatpush3.msra.mxu1 %v7045_v35  ;;  %4780 = vmatprep.subr.mxu0 %v7046_v43  ;;  %v7071_v35 = vld [vmem:[#allocation47_spill] sm:$0xff]  ;;  %v7072_v43 = vld [vmem:[#allocation62_spill] sm:$0xff] }
 0xb29   : >> { %4745 = vmatprep.subr.mxu1 %v7047_v24  ;;  %4781 = vmatpush3.msra.mxu0 %v7048_v39  ;;  %v7073_v24 = vld [vmem:[#allocation31_spill] sm:$0xff]  ;;  %v7074_v39 = vld [vmem:[#allocation76_spill] sm:$0xff] }
 0xb2a   : >> { %4746 = vmatpush3.msra.mxu1 %v7049_v51  ;;  %4782 = vmatprep.subr.mxu0 %v7050_v12  ;;  %v7075_v51 = vld [vmem:[#allocation46_spill] sm:$0xff]  ;;  %v7076_v12 = vld [vmem:[#allocation61_spill] sm:$0xff] }
 0xb2b   : >> { %4747 = vmatprep.subr.mxu1 %v7051_v1  ;;  %4783 = vmatpush3.msra.mxu0 %v7052_v11  ;;  %v7077_v1 = vld [vmem:[#allocation30_spill] sm:$0xff]  ;;  %v7078_v11 = vld [vmem:[#allocation75_spill] sm:$0xff] }
 0xb2c   : >> { %4748 = vmatpush3.msra.mxu1 %v7053_v55  ;;  %4784 = vmatprep.subr.mxu0 %v7054_v31  ;;  %v7079_v55 = vld [vmem:[#allocation45_spill] sm:$0xff]  ;;  %v7080_v31 = vld [vmem:[#allocation60_spill] sm:$0xff] }
 0xb2d   : >> { %4749 = vmatprep.subr.mxu1 %v7055_v3  ;;  %4785 = vmatpush3.msra.mxu0 %v7056_v34  ;;  %v7081_v3 = vld [vmem:[#allocation29_spill] sm:$0xff]  ;;  %v7082_v34 = vld [vmem:[#allocation74_spill] sm:$0xff] }
 0xb2e   : >> { %4750 = vmatpush3.msra.mxu1 %v7057_v16  ;;  %4786 = vmatprep.subr.mxu0 %v7058_v48  ;;  %v7083_v16 = vld [vmem:[#allocation44_spill] sm:$0xff]  ;;  %v7084_v48 = vld [vmem:[#allocation59_spill] sm:$0xff] }
 0xb2f   : >> { %4751 = vmatprep.subr.mxu1 %v7059_v15  ;;  %4787 = vmatpush3.msra.mxu0 %v7060_v21  ;;  %v7085_v15 = vld [vmem:[#allocation28_spill] sm:$0xff]  ;;  %v7086_v21 = vld [vmem:[#allocation73_spill] sm:$0xff] }
 0xb30   : >> { %4752 = vmatpush3.msra.mxu1 %v7061_v59  ;;  %4788 = vmatprep.subr.mxu0 %v7062_v20  ;;  %v7087_v59 = vld [vmem:[#allocation43_spill] sm:$0xff]  ;;  %v7088_v20 = vld [vmem:[#allocation58_spill] sm:$0xff] }
 0xb31   : >> { %4753 = vmatprep.subr.mxu1 %v7063_v49  ;;  %4789 = vmatpush3.msra.mxu0 %v7064_v50  ;;  %v7089_v49 = vld [vmem:[#allocation27_spill] sm:$0xff] }
 0xb32   : >> { %4754 = vmatpush3.msra.mxu1 %v7065_v52  ;;  %4790 = vmatprep.subr.mxu0 %v7066_v14  ;;  %v7090_v50 = vld [vmem:[#allocation151_spill] sm:$0xff] }
 0xb33   : >> { %4755 = vmatprep.subr.mxu1 %v7067_v32  ;;  %4791 = vmatpush3.msra.mxu0 %v7068_v13  ;;  %v7091_v52 = vld [vmem:[#allocation119_spill] sm:$0xff] }
 0xb34   : >> { %4756 = vmatpush3.msra.mxu1 %v7069_v8  ;;  %4792 = vmatprep.subr.mxu0 %v7070_v33 }
 0xb35   : >> { %4757 = vmatprep.subr.mxu1 %v7071_v35  ;;  %4793 = vmatpush3.msra.mxu0 %v7072_v43  ;;  %v3723_v43 = vpop.permute.xlu1 %3722 }
 0xb36   : >> { %4758 = vmatpush3.msra.mxu1 %v7073_v24  ;;  %4794 = vmatprep.subr.mxu0 %v7074_v39 }
 0xb37   : >> { %4759 = vmatprep.subr.mxu1 %v7075_v51  ;;  %4795 = vmatpush3.msra.mxu0 %v7076_v12 }
 0xb38   : >> { %4760 = vmatpush3.msra.mxu1 %v7077_v1  ;;  %4796 = vmatprep.subr.mxu0 %v7078_v11 }
 0xb39   : >> { %4761 = vmatprep.subr.mxu1 %v7079_v55  ;;  %4797 = vmatpush3.msra.mxu0 %v7080_v31 }
 0xb3a   : >> { %4762 = vmatpush3.msra.mxu1 %v7081_v3  ;;  %4798 = vmatprep.subr.mxu0 %v7082_v34 }
 0xb3b   : >> { %4763 = vmatprep.subr.mxu1 %v7083_v16  ;;  %4799 = vmatpush3.msra.mxu0 %v7084_v48 }
 0xb3c   : >> { %4764 = vmatpush3.msra.mxu1 %v7085_v15  ;;  %4800 = vmatprep.subr.mxu0 %v7086_v21 }
 0xb3d   : >> { %4765 = vmatprep.subr.mxu1 %v7087_v59  ;;  %4801 = vmatpush3.msra.mxu0 %v7088_v20 }
 0xb3e   : >> { %4766 = vmatpush3.msra.mxu1 %v7089_v49  ;;  %4840 = vmatprep.subr.mxu0 %v7090_v50 }
 0xb3f   : >> { %4805 = vmatprep.subr.mxu1 %v7091_v52 }
 0xbd6   : >> { %v3787_v14 = vpop.f32.mrf.mxu0 }
 0xbd7   : >> { %v3828_v32 = vpop.f32.mrf.mxu1  ;;  %v3788_v12 = vadd.f32 %v3787_v14, %v3723_v43 }
 0xbd8   : >> { %v3789_v13 = vpop.f32.mrf.mxu0  ;;  %v3829_v11 = vadd.f32 %v3828_v32, %v3723_v43 }
 0xbd9   : >> { %v3830_v8 = vpop.f32.mrf.mxu1  ;;  %v3790_v34 = vadd.f32 %v3789_v13, %v3723_v43  ;;  %v3917_v50 = vsel %vm939_vm1, %v3788_v12, -inf }
 0xbda   : >> { %v3791_v33 = vpop.f32.mrf.mxu0  ;;  %v3831_v31 = vadd.f32 %v3830_v8, %v3723_v43  ;;  %v3919_v52 = vsel %vm939_vm1, %v3829_v11, -inf }
 0xbdb   : >> { %v3832_v35 = vpop.f32.mrf.mxu1  ;;  %v3918_v33 = vsel %vm939_vm1, %v3790_v34, -inf }
 0xbdc   : >> { %v3792_v24 = vpop.f32.mrf.mxu0  ;;  %v3920_v14 = vsel %vm939_vm1, %v3831_v31, -inf }
 0xbdd   : >> { %v3833_v39 = vpop.f32.mrf.mxu1 }
 0xbde   : >> { %v3910_v51 = vpop.f32.mrf.mxu0 }
 0xbdf   : >> { %v3869_v1 = vpop.f32.mrf.mxu1  ;;  %v6611_v55 = vadd.f32 %v3910_v51, %v3723_v43 }
 0xbe0   : >> { %v6613_v3 = vadd.f32 %v3869_v1, %v3723_v43  ;;  %v3912_v16 = vpop.f32.mrf.mxu0 }
 0xbe1   : >> { %v3925_v48 = vsel %vm939_vm1, %v6611_v55, -inf  ;;  %v3871_v15 = vpop.f32.mrf.mxu1  ;;  %v3913_v21 = vadd.f32 %v3912_v16, %v3723_v43 }
 0xbe2   : >> { %v3921_v59 = vsel %vm939_vm1, %v6613_v3, -inf  ;;  %v3872_v20 = vadd.f32 %v3871_v15, %v3723_v43  ;;  %v3914_v49 = vpop.f32.mrf.mxu0  ;;  %v3926_v8 = vmax.f32 %v3919_v52, %v3925_v48 }
 0xbe3   : >> { %v3927_v32 = vsel %vm939_vm1, %v3913_v21, -inf  ;;  %v3873_v13 = vpop.f32.mrf.mxu1  ;;  %v3922_v51 = vmax.f32 %v3917_v50, %v3921_v59 }
 0xbe4   : >> { %v3923_v35 = vsel %vm939_vm1, %v3872_v20, -inf  ;;  %v3928_v24 = vmax.f32 %v3920_v14, %v3927_v32  ;;  %v3915_v39 = vpop.f32.mrf.mxu0 }
 0xbe5   : >> { %v3924_v1 = vmax.f32 %v3918_v33, %v3923_v35  ;;  %v3874_v43 = vpop.f32.mrf.mxu1  ;;  %v7102_v33 = vld [vmem:[#allocation116_spill] sm:$0xff] }
 0xbe6   : >> { %v3930_v16 = vmax.f32 %v3926_v8, %v3928_v24  ;;  %v7101_v8 = vld [vmem:[#allocation133_spill] sm:$0xff]  ;;  %v7103_v35 = vld [vmem:[#allocation148_spill] sm:$0xff] }
 0xbe7   : >> { %v3929_v15 = vmax.f32 %v3922_v51, %v3924_v1  ;;  %v7104_v24 = vld [vmem:[#allocation100_spill] sm:$0xff]  ;;  %v7106_v51 = vld [vmem:[#allocation115_spill] sm:$0xff] }
 0xbe8   : >> { %v7105_v39 = vld [vmem:[#allocation132_spill] sm:$0xff]  ;;  %v7107_v1 = vld [vmem:[#allocation147_spill] sm:$0xff] }
 0xbe9   : >> { %v3931_v49 = vmax.f32 %v3929_v15, %v3930_v16  ;;  %v7108_v16 = vld [vmem:[#allocation99_spill] sm:$0xff] }
 0xbea   : >> { %v7109_v15 = vld [vmem:[#allocation131_spill] sm:$0xff] }
 0xbeb   : >> { %3932 = vmax.xlane.f32.xlu1 %v3931_v49 }
 0xc74   : >> { %v3933_v4 = vpop.xlane.xlu1 %3932 }
 0xc75   : >> { %v3934_v7 = vsub.f32 %v3788_v12, %v3933_v4  ;;  %v3935_v17 = vsub.f32 %v3790_v34, %v3933_v4  ;;  %v3936_v18 = vsub.f32 %v3829_v11, %v3933_v4  ;;  %v3937_v22 = vsub.f32 %v3831_v31, %v3933_v4  ;;  %v7097_v31 = vld [vmem:[#allocation134_spill] sm:$0xff]  ;;  %v7098_v34 = vld [vmem:[#allocation117_spill] sm:$0xff] }
 0xc76   : >> { %v3939_v13 = vsub.f32 %v3872_v20, %v3933_v4  ;;  %v3941_v29 = vsub.f32 %v3913_v21, %v3933_v4  ;;  %v7099_v21 = vld [vmem:[#allocation149_spill] sm:$0xff]  ;;  %v3938_v43 = vsub.f32 %v6613_v3, %v3933_v4  ;;  %v3940_v49 = vsub.f32 %v6611_v55, %v3933_v4  ;;  %v7119_v4 = vld [vmem:[#allocation144_spill] sm:$0xff] }
 0xc77   : >> { %v3942_v48 = vmul.f32 1.442695, %v3934_v7  ;;  %v3944_v52 = vmul.f32 1.442695, %v3935_v17  ;;  %v3946_v26 = vmul.f32 1.442695, %v3936_v18 }
 0xc78   : >> { %v3948_v36 = vmul.f32 1.442695, %v3937_v22  ;;  %v3952_v59 = vmul.f32 1.442695, %v3939_v13  ;;  %v3956_v50 = vmul.f32 1.442695, %v3941_v29 }
 0xc79   : >> { %5230 = vpow2.f32 %v3942_v48  ;;  %v7092_v7 = vld [vmem:[#allocation103_spill] sm:$0xff]  ;;  %v7093_v18 = vld [vmem:[#allocation118_spill] sm:$0xff]  ;;  %v7100_v20 = vld [vmem:[#allocation101_spill] sm:$0xff] }
 0xc7a   : >> { %5232 = vpow2.f32 %v3944_v52  ;;  %v7094_v22 = vld [vmem:[#allocation135_spill] sm:$0xff]  ;;  %v7096_v29 = vld [vmem:[#allocation102_spill] sm:$0xff]  ;;  %v7116_v3 = vld [vmem:[#allocation97_spill] sm:$0xff] }
 0xc7b   : >> { %5234 = vpow2.f32 %v3946_v26  ;;  %v7110_v13 = vld [vmem:[#allocation114_spill] sm:$0xff]  ;;  %v7120_v55 = vld [vmem:[#allocation96_spill] sm:$0xff] }
 0xc7c   : >> { %5236 = vpow2.f32 %v3948_v36  ;;  %v7095_v36 = vld [vmem:[#allocation150_spill] sm:$0xff] }
 0xc7d   : >> { %5238 = vpow2.f32 %v3952_v59  ;;  %v7111_v48 = vld [vmem:[#allocation146_spill] sm:$0xff] }
 0xc7e   : >> { %5240 = vpow2.f32 %v3956_v50  ;;  %v7112_v52 = vld [vmem:[#allocation98_spill] sm:$0xff]  ;;  %v7114_v50 = vld [vmem:[#allocation113_spill] sm:$0xff] }
 0xc7f   : >> { %v7113_v59 = vld [vmem:[#allocation130_spill] sm:$0xff] }
 0xc86   : >> { %v5231_v14 = vpop.eup %5230 }
 0xc87   : >> { %v5233_v32 = vpop.eup %5232 }
 0xc88   : >> { %v5235_v12 = vpop.eup %5234  ;;  %4022 = vmatprep.mubr.f32.mxu1 %v5233_v32  ;;  %v3950_v32 = vmul.f32 1.442695, %v3938_v43  ;;  %v7138_v43 = vld [vmem:[#allocation107_spill] sm:$0xff] }
 0xc89   : >> { %v5237_v11 = vpop.eup %5236  ;;  %4023 = vmatmul.mubr.f32.vlgmr.msra.gmra.mxu1 %v5231_v14  ;;  %v7115_v14 = vld [vmem:[#allocation145_spill] sm:$0xff] }
 0xc8a   : >> { %4092 = vmatprep.mubr.f32.mxu0 %v5237_v11  ;;  %4806 = vmatpush3.msra.mxu1 %v7092_v7  ;;  %v5239_v17 = vpop.eup %5238  ;;  %v3954_v11 = vmul.f32 1.442695, %v3940_v49  ;;  %v7118_v7 = vld [vmem:[#allocation112_spill] sm:$0xff]  ;;  %5242 = vpow2.f32 %v3950_v32  ;;  %v7141_v49 = vld [vmem:[#allocation123_spill] sm:$0xff]  ;;  %v7148_v32 = vld [vmem:[#allocation89_spill] sm:$0xff] }
 0xc8b   : >> { %4093 = vmatmul.mubr.f32.vlgmr.msra.gmra.mxu0 %v5235_v12  ;;  %4807 = vmatprep.subr.mxu1 %v7093_v18  ;;  %v5241_v26 = vpop.eup %5240  ;;  %v7117_v12 = vld [vmem:[#allocation129_spill] sm:$0xff]  ;;  %v7122_v18 = vld [vmem:[#allocation111_spill] sm:$0xff] }
 0xc8c   : >> { %4841 = vmatpush3.msra.mxu0 %v7094_v22  ;;  %4162 = vmatprep.mubr.f32.mxu1 %v5239_v17  ;;  %v7121_v17 = vld [vmem:[#allocation128_spill] sm:$0xff]  ;;  %v7123_v22 = vld [vmem:[#allocation143_spill] sm:$0xff]  ;;  %5244 = vpow2.f32 %v3954_v11 }
 0xc8d   : >> { %4842 = vmatprep.subr.mxu0 %v7095_v36  ;;  %4808 = vmatpush3.msra.mxu1 %v7096_v29  ;;  %v7125_v36 = vld [vmem:[#allocation127_spill] sm:$0xff]  ;;  %v7126_v29 = vld [vmem:[#allocation110_spill] sm:$0xff]  ;;  %v7150_v11 = vld [vmem:[#allocation104_spill] sm:$0xff] }
 0xc8e   : >> { %4232 = vmatprep.mubr.f32.mxu0 %v5241_v26  ;;  %4843 = vmatpush3.msra.mxu0 %v7097_v31  ;;  %v7124_v26 = vld [vmem:[#allocation95_spill] sm:$0xff]  ;;  %v7127_v31 = vld [vmem:[#allocation142_spill] sm:$0xff] }
 0xc8f   : >> { %4809 = vmatprep.subr.mxu1 %v7098_v34  ;;  %4844 = vmatprep.subr.mxu0 %v7099_v21  ;;  %v7128_v34 = vld [vmem:[#allocation94_spill] sm:$0xff] }
 0xc90   : >> { %4810 = vmatpush3.msra.mxu1 %v7100_v20  ;;  %4845 = vmatpush3.msra.mxu0 %v7101_v8  ;;  %v7129_v21 = vld [vmem:[#allocation126_spill] sm:$0xff]  ;;  %v7130_v20 = vld [vmem:[#allocation109_spill] sm:$0xff] }
 0xc91   : >> { %4811 = vmatprep.subr.mxu1 %v7102_v33  ;;  %4846 = vmatprep.subr.mxu0 %v7103_v35  ;;  %v7131_v8 = vld [vmem:[#allocation141_spill] sm:$0xff] }
 0xc92   : >> { %4812 = vmatpush3.msra.mxu1 %v7104_v24  ;;  %4847 = vmatpush3.msra.mxu0 %v7105_v39  ;;  %v7132_v33 = vld [vmem:[#allocation93_spill] sm:$0xff]  ;;  %v7134_v24 = vld [vmem:[#allocation108_spill] sm:$0xff] }
 0xc93   : >> { %4813 = vmatprep.subr.mxu1 %v7106_v51  ;;  %4848 = vmatprep.subr.mxu0 %v7107_v1  ;;  %v7133_v35 = vld [vmem:[#allocation125_spill] sm:$0xff]  ;;  %v7135_v39 = vld [vmem:[#allocation140_spill] sm:$0xff] }
 0xc94   : >> { %4814 = vmatpush3.msra.mxu1 %v7108_v16  ;;  %4849 = vmatpush3.msra.mxu0 %v7109_v15  ;;  %v7136_v51 = vld [vmem:[#allocation92_spill] sm:$0xff]  ;;  %v7139_v16 = vld [vmem:[#allocation139_spill] sm:$0xff] }
 0xc95   : >> { %4815 = vmatprep.subr.mxu1 %v7110_v13  ;;  %4850 = vmatprep.subr.mxu0 %v7111_v48  ;;  %v7137_v1 = vld [vmem:[#allocation124_spill] sm:$0xff]  ;;  %v7140_v15 = vld [vmem:[#allocation91_spill] sm:$0xff]  ;;  %v7142_v13 = vld [vmem:[#allocation106_spill] sm:$0xff] }
 0xc96   : >> { %4816 = vmatpush3.msra.mxu1 %v7112_v52  ;;  %4851 = vmatpush3.msra.mxu0 %v7113_v59  ;;  %v7143_v48 = vld [vmem:[#allocation138_spill] sm:$0xff] }
 0xc97   : >> { %4817 = vmatprep.subr.mxu1 %v7114_v50  ;;  %4852 = vmatprep.subr.mxu0 %v7115_v14  ;;  %v7144_v52 = vld [vmem:[#allocation90_spill] sm:$0xff]  ;;  %v7146_v50 = vld [vmem:[#allocation105_spill] sm:$0xff] }
 0xc98   : >> { %4818 = vmatpush3.msra.mxu1 %v7116_v3  ;;  %4853 = vmatpush3.msra.mxu0 %v7117_v12  ;;  %v7145_v59 = vld [vmem:[#allocation122_spill] sm:$0xff]  ;;  %v7147_v14 = vld [vmem:[#allocation137_spill] sm:$0xff]  ;;  %v5243_v12 = vpop.eup %5242 }
 0xc99   : >> { %4819 = vmatprep.subr.mxu1 %v7118_v7  ;;  %4854 = vmatprep.subr.mxu0 %v7119_v4  ;;  %v7149_v3 = vld [vmem:[#allocation121_spill] sm:$0xff]  ;;  %v7151_v7 = vld [vmem:[#allocation136_spill] sm:$0xff]  ;;  %v5245_v4 = vpop.eup %5244 }
 0xc9a   : >> { %4820 = vmatpush3.msra.mxu1 %v7120_v55  ;;  %4855 = vmatpush3.msra.mxu0 %v7121_v17  ;;  %v7152_v55 = vld [vmem:[#allocation88_spill] sm:$0xff] }
 0xc9b   : >> { %4821 = vmatprep.subr.mxu1 %v7122_v18  ;;  %4856 = vmatprep.subr.mxu0 %v7123_v22  ;;  %v7153_v17 = vld [vmem:[#allocation120_spill] sm:$0xff]  ;;  %v7154_v18 = vmov 0.0   ;;  %v7155_v22 = vmov 1.0  }
 0xc9c   : >> { %4822 = vmatpush3.msra.mxu1 %v7124_v26  ;;  %4857 = vmatpush3.msra.mxu0 %v7125_v36  ;;  %v7160_v26 = vld [vmem:[#allocation24_spill] sm:$0xff] }
 0xc9d   : >> { %4823 = vmatprep.subr.mxu1 %v7126_v29  ;;  %4858 = vmatprep.subr.mxu0 %v7127_v31  ;;  %v7161_v36 = vmax.f32 %v7160_v26, 0.0  ;;  %v4311_v29 = vadd.s32 %v6379_v25, %v6174_v23 }
 0xc9e   : >> { %4824 = vmatpush3.msra.mxu1 %v7128_v34  ;;  %4859 = vmatpush3.msra.mxu0 %v7129_v21 }
 0xc9f   : >> { %4825 = vmatprep.subr.mxu1 %v7130_v20  ;;  %4860 = vmatprep.subr.mxu0 %v7131_v8 }
 0xca0   : >> { %4826 = vmatpush3.msra.mxu1 %v7132_v33  ;;  %4861 = vmatpush3.msra.mxu0 %v7133_v35 }
 0xca1   : >> { %4827 = vmatprep.subr.mxu1 %v7134_v24  ;;  %4862 = vmatprep.subr.mxu0 %v7135_v39 }
 0xca2   : >> { %4828 = vmatpush3.msra.mxu1 %v7136_v51  ;;  %4863 = vmatpush3.msra.mxu0 %v7137_v1 }
 0xca3   : >> { %4829 = vmatprep.subr.mxu1 %v7138_v43  ;;  %4864 = vmatprep.subr.mxu0 %v7139_v16 }
 0xca4   : >> { %4830 = vmatpush3.msra.mxu1 %v7140_v15  ;;  %4865 = vmatpush3.msra.mxu0 %v7141_v49 }
 0xca5   : >> { %4831 = vmatprep.subr.mxu1 %v7142_v13  ;;  %4866 = vmatprep.subr.mxu0 %v7143_v48 }
 0xca6   : >> { %4832 = vmatpush3.msra.mxu1 %v7144_v52  ;;  %4867 = vmatpush3.msra.mxu0 %v7145_v59  ;;  %v4315_v59 = vld [vmem:[%s6154_s5] sm:$0xf] }
 0xca7   : >> { %4833 = vmatprep.subr.mxu1 %v7146_v50  ;;  %4868 = vmatprep.subr.mxu0 %v7147_v14 }
 0xca8   : >> { %4834 = vmatpush3.msra.mxu1 %v7148_v32  ;;  %4869 = vmatpush3.msra.mxu0 %v7149_v3 }
 0xca9   : >> { %4835 = vmatprep.subr.mxu1 %v7150_v11  ;;  %4870 = vmatprep.subr.mxu0 %v7151_v7 }
 0xcaa   : >> { %4836 = vmatpush3.msra.mxu1 %v7152_v55  ;;  %4871 = vmatpush3.msra.mxu0 %v7153_v17 }
 0xcab   : >> { %4163 = vmatmul.mubr.f32.vlgmr.msra.gmra.mxu1 %v5243_v12  ;;  %4233 = vmatmul.mubr.f32.vlgmr.msra.gmra.mxu0 %v5245_v4 }
 0xcac   : >> { %5069 = vmatprep.subr.mxu1 %v7154_v18  ;;  %5101 = vmatprep.mubr.msk.f32.mxu1 %vm5379_vm0, %v7154_v18 }
 0xcad   : >> { %5070 = vmatpush3.msk.msra.mxu1 %vm3288_vm9, %v7155_v22  ;;  %5104 = vmatprep.subr.mxu0 %v7154_v18  ;;  %vm7158_vm9 = vcmp.eq.s32.totalorder %v6241_v28, %v6384_v2 }
 0xcae   : >> { %5071 = vmatprep.subr.mxu1 %v7154_v18  ;;  %5106 = vmatprep.mubr.msk.f32.mxu0 %vm5379_vm0, %v7154_v18  ;;  %vm7157_vm0 = vcmp.eq.s32.totalorder %v6235_v46, %v6384_v2 }
 0xcaf   : >> { %5072 = vmatpush3.msk.msra.mxu1 %vm3287_vm10, %v7155_v22  ;;  %vm7159_vm10 = vcmp.eq.s32.totalorder %v6247_v19, %v6384_v2 }
 0xcb0   : >> { %5073 = vmatprep.subr.mxu1 %v7154_v18 }
 0xcb1   : >> { %5074 = vmatpush3.msk.msra.mxu1 %vm3286_vm11, %v7155_v22  ;;  %vm4312_vm11 = vcmp.eq.s32.totalorder %v6176_v44, %v4311_v29 }
 0xcb2   : >> { %5075 = vmatprep.subr.mxu1 %v7154_v18  ;;  %5105 = vmatpush3.msk.msra.mxu0 %vm4312_vm11, %v7155_v22 }
 0xcb3   : >> { %5076 = vmatpush3.msk.msra.mxu1 %vm3285_vm12, %v7155_v22  ;;  %vm7162_vm12 = vcmask 64512  }
 0xcb4   : >> { %5077 = vmatprep.subr.mxu1 %v7154_v18 }
 0xcb5   : >> { %5078 = vmatpush3.msk.msra.mxu1 %vm3284_vm13, %v7155_v22 }
 0xcb6   : >> { %5079 = vmatprep.subr.mxu1 %v7154_v18 }
 0xcb7   : >> { %5080 = vmatpush3.msk.msra.mxu1 %vm3283_vm14, %v7155_v22 }
 0xcb8   : >> { %5081 = vmatprep.subr.mxu1 %v7154_v18 }
 0xcb9   : >> { %5082 = vmatpush3.msk.msra.mxu1 %vm3282_vm15, %v7155_v22 }
 0xcba   : >> { %5083 = vmatprep.subr.mxu1 %v7154_v18 }
 0xcbb   : >> { %5084 = vmatpush3.msk.msra.mxu1 %vm3281_vm4, %v7155_v22 }
 0xcbc   : >> { %5085 = vmatprep.subr.mxu1 %v7154_v18 }
 0xcbd   : >> { %5086 = vmatpush3.msk.msra.mxu1 %vm7156_vm3, %v7155_v22 }
 0xcbe   : >> { %5087 = vmatprep.subr.mxu1 %v7154_v18 }
 0xcbf   : >> { %5088 = vmatpush3.msk.msra.mxu1 %vm7157_vm0, %v7155_v22 }
 0xcc0   : >> { %5089 = vmatprep.subr.mxu1 %v7154_v18 }
 0xcc1   : >> { %5090 = vmatpush3.msk.msra.mxu1 %vm7158_vm9, %v7155_v22 }
 0xcc2   : >> { %5091 = vmatprep.subr.mxu1 %v7154_v18 }
 0xcc3   : >> { %5092 = vmatpush3.msk.msra.mxu1 %vm7159_vm10, %v7155_v22 }
 0xcc4   : >> { %5093 = vmatprep.subr.mxu1 %v7154_v18 }
 0xcc5   : >> { %5094 = vmatpush3.msk.msra.mxu1 %vm3276_vm5, %v7155_v22 }
 0xcc6   : >> { %5095 = vmatprep.subr.mxu1 %v7154_v18 }
 0xcc7   : >> { %5096 = vmatpush3.msk.msra.mxu1 %vm3275_vm6, %v7155_v22 }
 0xcc8   : >> { %5097 = vmatprep.subr.mxu1 %v7154_v18 }
 0xcc9   : >> { %5098 = vmatpush3.msk.msra.mxu1 %vm3274_vm7, %v7155_v22 }
 0xcca   : >> { %5099 = vmatprep.subr.mxu1 %v7154_v18 }
 0xccb   : >> { %5100 = vmatpush3.msk.msra.mxu1 %vm3273_vm8, %v7155_v22 }
 0xccc   : >> { %5102 = vmatmul.mubr.f32.vlgmr.msra.gmra.mxu1 %v7161_v36 }
 0xd49   : >> { %v4767_v31 = vpop.f32.mrf.mxu1 }
 0xd4b   : >> { %v4802_v34 = vpop.f32.mrf.mxu0  ;;  %v4768_v21 = vpop.f32.mrf.mxu1 }
 0xd4c   : >> { %v4769_v33 = vadd.f32 %v4768_v21, %v4767_v31 }
 0xd4d   : >> { %v4803_v20 = vpop.f32.mrf.mxu0 }
 0xd4e   : >> { %v4804_v35 = vadd.f32 %v4803_v20, %v4802_v34 }
 0xd50   : >> { %v4095_v51 = vadd.f32 %v4804_v35, %v4769_v33 }
 0xd6b   : >> { %v4837_v8 = vpop.f32.mrf.mxu1  ;;  %v4872_v24 = vpop.f32.mrf.mxu0 }
 0xd6d   : >> { %v4838_v2 = vpop.f32.mrf.mxu1  ;;  %v4873_v1 = vpop.f32.mrf.mxu0 }
 0xd6e   : >> { %v4839_v39 = vadd.f32 %v4838_v2, %v4837_v8  ;;  %v4874_v25 = vadd.f32 %v4873_v1, %v4872_v24 }
 0xd70   : >> { %v4165_v43 = vadd.f32 %v4839_v39, %v4095_v51 }
 0xd72   : >> { %v4235_v16 = vadd.f32 %v4874_v25, %v4165_v43 }
 0xd74   : >> { %5246 = vrcp.f32 %v4235_v16 }
 0xd81   : >> { %v5247_v15 = vpop.eup %5246 }
 0xd82   : >> { %v4239_v49 = vmul.f32 %v5247_v15, %v4235_v16 }
 0xd8c   : >> { %v4306_v13 = vpop.f32.mrf.mxu1 }
 0xd8d   : >> { %v4310_v48 = vmul.f32 %v4306_v13, %v4239_v49 }
 0xd8e   : >> { %v5103_v52 = vpop.f32.mrf.mxu1 }
 0xd8f   : >> { %5107 = vmatmul.mubr.msk.f32.vlgmr.msra.gmra.mxu0 %vm7162_vm12, %v4310_v48 }
 0xe4e   : > { %3249 = sbr.rel (!%p3247_p12) target bundleno = 2400 (0x960), region = 230 }
 0xe4f   : >> { %v4385_v50 = vpop.f32.mrf.mxu0 }
 0xe50   : >> { %v4389_v14 = vadd.f32 %v4385_v50, %v4315_v59 }
 0xe51   : >> { %v5108_v32 = vpop.f32.mrf.mxu0 }
 0xe52   : >> { %4390 = vst [vmem:[%s6154_s5] sm:$0xf] %v4389_v14 }
 0xe53   : > { %5261 = shalt.err (!%p5258_p7)
}
 0xe54   : > { %s5262_s0 = scalar_lea.hbm %s4403_s9, 64  ;;  %s5266_s5 = scalar_lea.hbm %s5541_s19, 128 }
 0xe55   : > { %p5263_p8 = scmp.ne.s32.totalorder %s4403_s9, %s5262_s0  ;;  %p5267_p11 = scmp.lt.s32.totalorder %s4403_s9, %s5541_s19 }
 0xe56   : > { %p5268_p12 = scmp.lt.s32.totalorder %s5266_s5, %s5262_s0 }
 0xe57   : > { %p5264_p9 = pnand %p5263_p8, %p5581_p5 }
 0xe58   : > { %p5269_p13 = por %p5268_p12, %p5267_p11 }
 0xe59   : > { %p5265_p10 = pneg %p5264_p9 }
 0xe5b   : > { %p5270_p0 = pnand %p5269_p13, %p5265_p10 }
 0xe5d   : > { %5273 = shalt.err (!%p5270_p0)
}
 0xe5e   : > { %5109 = dma.vmem_to_hbm [thread:$0]  (%p5581_p5), %s4406_s3, 64, %s4403_s9, %s4392_s6  }
 0xe5f PF: > { %p5115_p1 = scmp.ge.s32.totalorder %s5324_s22, 2  ;;  %s4417_s4 = sand.u32 1, %s5312_s15  }
 0xe60   : > { %s4418_s28 = scalar_lea.sflag [#allocation3], %s4417_s4 }
 0xe61   : > { %p5112_p2 = pnand %p5115_p1, %p5585_p6 }
 0xe63   : > { %p5113_p3 = pneg %p5112_p2 }
 0xe65   : > { %5307 = dma.done.wait (%p5113_p3), %s4418_s28, 64  }
 0xe66   : > { %5309 = vsyncadd (%p5113_p3), %s4418_s28, 4294967232  ;;  %p71_p4 = scmp.ge.s32.totalorder %s5568_s26, 4   ;;  %s7164_s15 = smov %s5316_s16 }
 0xe67   : > { %s7165_s16 = smov %s5320_s18  ;;  %s7166_s18 = smov %s5579_s2 }
 0xe68   : > { %s7167_s22 = smov %s5568_s26  ;;  %73 = sbr.rel (!%p71_p4) target bundleno = 61 (0x3d), region = 241 }
 0xe6d   :  { %4423 = vsyncpa [#allocation3], 1 }
 0xe6e   :  { %4425 = vsyncpa [#allocation3 + $0x1], 1 }

</bundles_post_ra>
